<compile_context>
chip_gen: v7x
topology: tpu7x:2x2x1
jax: 0.10.0
libtpu: 0.0.40
codegen_flags: <defaults>
</compile_context>

<pallas_src>
import functools
import math

import jax
import jax.numpy as jnp
from jax.experimental import pallas as pl
from jax.experimental.pallas import tpu as pltpu

_EPS = 1e-5
_MASK = -1e30  # large-negative finite additive mask (f32-safe)

# Gridless full-array-in-VMEM spec (no pipelining machinery for these tiny blocks).
_VMEM_SPEC = pl.BlockSpec(memory_space=pltpu.MemorySpace.VMEM)


def _round_up(x, m):
    return ((x + m - 1) // m) * m


# --------------------------------------------------------------------------
# In-kernel helpers (pure jnp, traced inside the Pallas kernels)
# --------------------------------------------------------------------------

def _ln(x, g, b):
    mu = jnp.mean(x, axis=-1, keepdims=True)
    var = jnp.mean(jnp.square(x - mu), axis=-1, keepdims=True)
    return (x - mu) * jax.lax.rsqrt(var + _EPS) * g + b


def _mha(q_all, k_all, v_all, H, Dh, bias):
    """Multi-head attention fully in VMEM/vregs.

    q_all: (B, Tq, E) with the softmax scale pre-folded into the q weights,
    k_all / v_all: (B, Tk, E), bias: additive (B,1,Tk) / (1,Tq,Tk) or None.
    Heads are static lane slices; contexts are lane-concatenated back to E.
    """
    ctx = []
    for h in range(H):
        lo, hi = h * Dh, (h + 1) * Dh
        q = q_all[:, :, lo:hi]
        k = k_all[:, :, lo:hi]
        v = v_all[:, :, lo:hi]
        s = jnp.einsum("bqd,bkd->bqk", q, k, preferred_element_type=jnp.float32)
        if bias is not None:
            s = s + bias
        m = jnp.max(s, axis=-1, keepdims=True)
        p = jnp.exp(s - m)
        denom = jnp.sum(p, axis=-1, keepdims=True)
        ctx.append(jnp.einsum("bqk,bkd->bqd", p, v,
                              preferred_element_type=jnp.float32) / denom)
    return jnp.concatenate(ctx, axis=-1)          # (B, Tq, E)


# --------------------------------------------------------------------------
# Fused per-layer Pallas kernels
# --------------------------------------------------------------------------
# Per-layer packed vector slab (rows, W) with W a multiple of 128:
#   encoder rows: 0 b_qkv(3E) | 1 b_out(E) | 2 ln1_g | 3 ln1_b | 4 b1(nhid)
#                 5 b2 | 6 ln2_g | 7 ln2_b | 8 enc_norm_g | 9 enc_norm_b
#   decoder rows: 0 sa_b_qkv(3E) | 1 sa_b_out | 2 ln1_g | 3 ln1_b | 4 ca_b_q
#                 5 ca_b_kv(2E) | 6 ca_b_out | 7 ln2_g | 8 ln2_b | 9 b1(nhid)
#                 10 b2 | 11 ln3_g | 12 ln3_b

def _encoder_layer_kernel(x_ref, kpm_ref, w_qkv_ref, w_out_ref, w1_ref, w2_ref,
                          vec_ref, o_ref, *, B, S, H, E, nhid, final_norm):
    Dh = E // H
    x = x_ref[...]                                   # (B*S, E)
    vec = vec_ref[...]                               # (10, W)

    # fused QKV GEMM (scale already folded into the q columns)
    qkv = jnp.dot(x, w_qkv_ref[...], preferred_element_type=jnp.float32)
    qkv = (qkv + vec[0:1, :3 * E]).reshape(B, S, 3 * E)

    # key-padding mask -> additive bias, broadcast over heads/queries in-kernel
    kpm_bias = jnp.where(kpm_ref[...] > 0.0, _MASK, 0.0)[:, None, :]   # (B,1,S)

    ctx = _mha(qkv[:, :, :E], qkv[:, :, E:2 * E], qkv[:, :, 2 * E:],
               H, Dh, kpm_bias).reshape(B * S, E)

    # out-proj + residual + LayerNorm1
    y = _ln(x + jnp.dot(ctx, w_out_ref[...], preferred_element_type=jnp.float32)
            + vec[1:2, :E], vec[2:3, :E], vec[3:4, :E])

    # FFN (hidden stays in VMEM) + residual + LayerNorm2
    h1 = jnp.maximum(jnp.dot(y, w1_ref[...], preferred_element_type=jnp.float32)
                     + vec[4:5, :nhid], 0.0)
    z = _ln(y + jnp.dot(h1, w2_ref[...], preferred_element_type=jnp.float32)
            + vec[5:6, :E], vec[6:7, :E], vec[7:8, :E])

    if final_norm:   # encoder-stack final LayerNorm fused into the last layer
        z = _ln(z, vec[8:9, :E], vec[9:10, :E])
    o_ref[...] = z


def _decoder_layer_kernel(y_ref, mem_ref, sa_w_qkv_ref, sa_w_out_ref,
                          ca_w_q_ref, ca_w_kv_ref, ca_w_out_ref,
                          w1_ref, w2_ref, vec_ref, o_ref,
                          *, B, T, S, H, E, nhid):
    Dh = E // H
    y = y_ref[...]                                   # (B*T, E)
    mem = mem_ref[...]                               # (B*S, E)
    vec = vec_ref[...]                               # (13, W)

    # masked self-attention (causal mask generated in-kernel)
    qkv = jnp.dot(y, sa_w_qkv_ref[...], preferred_element_type=jnp.float32)
    qkv = (qkv + vec[0:1, :3 * E]).reshape(B, T, 3 * E)
    row = jax.lax.broadcasted_iota(jnp.int32, (T, T), 0)
    col = jax.lax.broadcasted_iota(jnp.int32, (T, T), 1)
    causal = jnp.where(col > row, _MASK, 0.0)[None, :, :]            # (1,T,T)
    ctx = _mha(qkv[:, :, :E], qkv[:, :, E:2 * E], qkv[:, :, 2 * E:],
               H, Dh, causal).reshape(B * T, E)
    y1 = _ln(y + jnp.dot(ctx, sa_w_out_ref[...], preferred_element_type=jnp.float32)
             + vec[1:2, :E], vec[2:3, :E], vec[3:4, :E])

    # cross-attention (no memory key-padding mask in this module)
    qp = (jnp.dot(y1, ca_w_q_ref[...], preferred_element_type=jnp.float32)
          + vec[4:5, :E]).reshape(B, T, E)
    kv = (jnp.dot(mem, ca_w_kv_ref[...], preferred_element_type=jnp.float32)
          + vec[5:6, :2 * E]).reshape(B, S, 2 * E)
    ctx2 = _mha(qp, kv[:, :, :E], kv[:, :, E:], H, Dh, None).reshape(B * T, E)
    y2 = _ln(y1 + jnp.dot(ctx2, ca_w_out_ref[...], preferred_element_type=jnp.float32)
             + vec[6:7, :E], vec[7:8, :E], vec[8:9, :E])

    # FFN + residual + LayerNorm3
    h1 = jnp.maximum(jnp.dot(y2, w1_ref[...], preferred_element_type=jnp.float32)
                     + vec[9:10, :nhid], 0.0)
    y3 = _ln(y2 + jnp.dot(h1, w2_ref[...], preferred_element_type=jnp.float32)
             + vec[10:11, :E], vec[11:12, :E], vec[12:13, :E])
    o_ref[...] = y3


def _final_ln_fc_kernel(y_ref, g_ref, b_ref, w_ref, bias_ref, o_ref):
    # decoder-stack final LayerNorm fused with fc_out (vocab dim padded to 128)
    y = _ln(y_ref[...], g_ref[...], b_ref[...])
    o_ref[...] = jnp.dot(y, w_ref[...], preferred_element_type=jnp.float32) + bias_ref[...]


# --------------------------------------------------------------------------
# Forward pass (XLA glue only for embedding gather + pe + final slice/transpose)
# --------------------------------------------------------------------------

def transformer_seq2seq(params, src, trg, *, nhead, trg_vocab, pad_idx=0):
    S, B = src.shape
    T = trg.shape[0]
    E = params["src_emb"].shape[1]
    H = nhead
    nhid = params["enc_layers"][0]["w1"].shape[1]
    Vp = params["fc_w"].shape[1]

    # embeddings + positional encoding (gather has no good tiny-Pallas form)
    src_x = params["src_emb"][src.T] + params["pe"][:S][None]        # (B, S, E)
    trg_x = params["trg_emb"][trg.T] + params["pe"][:T][None]        # (B, T, E)
    kpm = (src.T == pad_idx).astype(jnp.float32)                     # (B, S)

    # ------- encoder: one fused pallas_call per layer -------
    x = src_x.reshape(B * S, E)
    n_enc = len(params["enc_layers"])
    for li, lp in enumerate(params["enc_layers"]):
        kern = functools.partial(_encoder_layer_kernel, B=B, S=S, H=H, E=E,
                                 nhid=nhid, final_norm=(li == n_enc - 1))
        x = pl.pallas_call(
            kern,
            out_shape=jax.ShapeDtypeStruct((B * S, E), jnp.float32),
            in_specs=[_VMEM_SPEC] * 7,
            out_specs=_VMEM_SPEC,
        )(x, kpm, lp["w_qkv"], lp["w_out"], lp["w1"], lp["w2"], lp["vec"])
    mem = x

    # ------- decoder: one fused pallas_call per layer -------
    y = trg_x.reshape(B * T, E)
    for lp in params["dec_layers"]:
        kern = functools.partial(_decoder_layer_kernel, B=B, T=T, S=S, H=H,
                                 E=E, nhid=nhid)
        y = pl.pallas_call(
            kern,
            out_shape=jax.ShapeDtypeStruct((B * T, E), jnp.float32),
            in_specs=[_VMEM_SPEC] * 10,
            out_specs=_VMEM_SPEC,
        )(y, mem, lp["sa_w_qkv"], lp["sa_w_out"], lp["ca_w_q"], lp["ca_w_kv"],
          lp["ca_w_out"], lp["w1"], lp["w2"], lp["vec"])

    # ------- decoder final norm fused with fc_out (lane-dense padded vocab) -------
    logits_p = pl.pallas_call(
        _final_ln_fc_kernel,
        out_shape=jax.ShapeDtypeStruct((B * T, Vp), jnp.float32),
        in_specs=[_VMEM_SPEC] * 5,
        out_specs=_VMEM_SPEC,
    )(y, params["dec_norm_g"], params["dec_norm_b"], params["fc_w"], params["fc_b"])

    # slice padded vocab and restore PyTorch (T, B, V) layout
    return logits_p.reshape(B, T, Vp)[:, :, :trg_vocab].transpose(1, 0, 2)


# --------------------------------------------------------------------------
# Parameters: PyTorch-layout init + one-time kernel-ready preparation
# --------------------------------------------------------------------------

def init_params(key, src_vocab, trg_vocab, emb_dim, nhead, nhid, nlayers, max_len=64):
    """Synthetic weights with the same shapes/layout as the PyTorch module."""
    kiter = iter(jax.random.split(key, 256))

    def nrm(shape):
        return 0.05 * jax.random.normal(next(kiter), shape, dtype=jnp.float32)

    def attn_p():
        return dict(in_w=nrm((3 * emb_dim, emb_dim)), in_b=nrm((3 * emb_dim,)),
                    out_w=nrm((emb_dim, emb_dim)), out_b=nrm((emb_dim,)))

    def ffn_and_norms(n_ln):
        d = dict(w1=nrm((nhid, emb_dim)), b1=nrm((nhid,)),
                 w2=nrm((emb_dim, nhid)), b2=nrm((emb_dim,)))
        for i in range(1, n_ln + 1):
            d[f"ln{i}_g"] = jnp.ones((emb_dim,), jnp.float32)
            d[f"ln{i}_b"] = jnp.zeros((emb_dim,), jnp.float32)
        return d

    enc_layers = [dict(self_attn=attn_p(), **ffn_and_norms(2)) for _ in range(nlayers)]
    dec_layers = [dict(self_attn=attn_p(), cross_attn=attn_p(), **ffn_and_norms(3))
                  for _ in range(nlayers)]

    # sinusoidal positional encoding (matches PositionalEncoding)
    position = jnp.arange(max_len, dtype=jnp.float32)[:, None]
    div_term = jnp.exp(jnp.arange(0, emb_dim, 2, dtype=jnp.float32)
                       * (-math.log(10000.0) / emb_dim))
    pe = jnp.zeros((max_len, emb_dim), jnp.float32)
    pe = pe.at[:, 0::2].set(jnp.sin(position * div_term))
    pe = pe.at[:, 1::2].set(jnp.cos(position * div_term))

    return dict(
        src_emb=nrm((src_vocab, emb_dim)), trg_emb=nrm((trg_vocab, emb_dim)), pe=pe,
        enc_layers=enc_layers, dec_layers=dec_layers,
        enc_norm_g=jnp.ones((emb_dim,), jnp.float32),
        enc_norm_b=jnp.zeros((emb_dim,), jnp.float32),
        dec_norm_g=jnp.ones((emb_dim,), jnp.float32),
        dec_norm_b=jnp.zeros((emb_dim,), jnp.float32),
        fc_w=nrm((trg_vocab, emb_dim)), fc_b=nrm((trg_vocab,)),
    )


def prepare_params(raw, nhead):
    """One-time conversion of PyTorch-layout weights into kernel-ready layout:
    pre-transposed GEMM weights, fused QKV / KV weights, softmax scale folded
    into the q projections, bias/gamma/beta packed into one lane-dense slab per
    layer, fc_out padded to a lane-dense vocab width."""
    E = raw["src_emb"].shape[1]
    nhid = raw["enc_layers"][0]["w1"].shape[0]
    Dh = E // nhead
    scale = 1.0 / math.sqrt(Dh)
    W = _round_up(max(3 * E, 2 * E, nhid), 128)
    V = raw["fc_w"].shape[0]
    Vp = _round_up(V, 128)

    def pad_row(v):
        return jnp.pad(v, (0, W - v.shape[0]))[None, :]              # (1, W)

    def prescale_qkv(w_t, b):            # w_t: (E, 3E) cols q|k|v, b: (3E,)
        return w_t.at[:, :E].multiply(scale), b.at[:E].multiply(scale)

    def enc_layer(lp):
        sa = lp["self_attn"]
        w_qkv, b_qkv = prescale_qkv(sa["in_w"].T, sa["in_b"])
        vec = jnp.concatenate([
            pad_row(b_qkv), pad_row(sa["out_b"]),
            pad_row(lp["ln1_g"]), pad_row(lp["ln1_b"]),
            pad_row(lp["b1"]), pad_row(lp["b2"]),
            pad_row(lp["ln2_g"]), pad_row(lp["ln2_b"]),
            pad_row(raw["enc_norm_g"]), pad_row(raw["enc_norm_b"]),
        ], axis=0)                                                    # (10, W)
        return dict(w_qkv=w_qkv, w_out=sa["out_w"].T,
                    w1=lp["w1"].T, w2=lp["w2"].T, vec=vec)

    def dec_layer(lp):
        sa, ca = lp["self_attn"], lp["cross_attn"]
        sa_w_qkv, sa_b_qkv = prescale_qkv(sa["in_w"].T, sa["in_b"])
        vec = jnp.concatenate([
            pad_row(sa_b_qkv), pad_row(sa["out_b"]),
            pad_row(lp["ln1_g"]), pad_row(lp["ln1_b"]),
            pad_row(ca["in_b"][:E] * scale), pad_row(ca["in_b"][E:]),
            pad_row(ca["out_b"]),
            pad_row(lp["ln2_g"]), pad_row(lp["ln2_b"]),
            pad_row(lp["b1"]), pad_row(lp["b2"]),
            pad_row(lp["ln3_g"]), pad_row(lp["ln3_b"]),
        ], axis=0)                                                    # (13, W)
        return dict(sa_w_qkv=sa_w_qkv, sa_w_out=sa["out_w"].T,
                    ca_w_q=ca["in_w"][:E].T * scale, ca_w_kv=ca["in_w"][E:].T,
                    ca_w_out=ca["out_w"].T,
                    w1=lp["w1"].T, w2=lp["w2"].T, vec=vec)

    fc_w = jnp.zeros((E, Vp), jnp.float32).at[:, :V].set(raw["fc_w"].T)
    fc_b = jnp.zeros((Vp,), jnp.float32).at[:V].set(raw["fc_b"])

    return dict(
        src_emb=raw["src_emb"], trg_emb=raw["trg_emb"], pe=raw["pe"],
        enc_layers=[enc_layer(lp) for lp in raw["enc_layers"]],
        dec_layers=[dec_layer(lp) for lp in raw["dec_layers"]],
        dec_norm_g=raw["dec_norm_g"].reshape(1, E),
        dec_norm_b=raw["dec_norm_b"].reshape(1, E),
        fc_w=fc_w, fc_b=fc_b.reshape(1, Vp),
    )


# --------------------------------------------------------------------------

if __name__ == "__main__":
    src_vocab, trg_vocab = 48, 40
    emb_dim, nhead, nhid, nlayers = 32, 4, 64, 2
    S, T, B = 8, 8, 2

    key = jax.random.PRNGKey(0)
    pkey, skey, tkey = jax.random.split(key, 3)
    raw_params = init_params(pkey, src_vocab, trg_vocab, emb_dim, nhead, nhid, nlayers)
    params = prepare_params(raw_params, nhead)       # one-time weight prep (outside jit)

    src = jax.random.randint(skey, (S, B), 1, src_vocab, dtype=jnp.int32)
    src = src.at[-1, 0].set(0)   # one pad token -> exercises src_key_padding_mask
    trg = jax.random.randint(tkey, (T, B), 1, trg_vocab, dtype=jnp.int32)

    fwd = jax.jit(functools.partial(transformer_seq2seq, nhead=nhead,
                                    trg_vocab=trg_vocab))
    out = fwd(params, src, trg)
    jax.block_until_ready(out)

    assert out.shape == (T, B, trg_vocab), out.shape
    assert bool(jnp.all(jnp.isfinite(out)))
    print("KERNEL_OK")
</pallas_src>

<mosaic_0001>
module attributes {stable_mosaic.version = 11 : i64} {
  func.func @_final_ln_fc_kernel(%arg0: memref<16x32xf32, #tpu.memory_space<vmem>>, %arg1: memref<1x32xf32, #tpu.memory_space<vmem>>, %arg2: memref<1x32xf32, #tpu.memory_space<vmem>>, %arg3: memref<32x128xf32, #tpu.memory_space<vmem>>, %arg4: memref<1x128xf32, #tpu.memory_space<vmem>>, %arg5: memref<16x128xf32, #tpu.memory_space<vmem>>) attributes {dimension_semantics = [], scalar_prefetch = 0 : i64, scratch_operands = 0 : i64, tpu.core_type = #tpu.core_type<tc>} {
    %c0 = arith.constant 0 : index
    %c0_0 = arith.constant 0 : index
    %0 = vector.load %arg0[%c0, %c0_0] : memref<16x32xf32, #tpu.memory_space<vmem>>, vector<16x32xf32>
    %c0_1 = arith.constant 0 : index
    %c0_2 = arith.constant 0 : index
    %1 = vector.load %arg1[%c0_1, %c0_2] : memref<1x32xf32, #tpu.memory_space<vmem>>, vector<1x32xf32>
    %c0_3 = arith.constant 0 : index
    %c0_4 = arith.constant 0 : index
    %2 = vector.load %arg2[%c0_3, %c0_4] : memref<1x32xf32, #tpu.memory_space<vmem>>, vector<1x32xf32>
    %cst = arith.constant dense<0.000000e+00> : vector<16xf32>
    %3 = vector.multi_reduction <add>, %0, %cst [1] : vector<16x32xf32> to vector<16xf32>
    %4 = vector.shape_cast %3 : vector<16xf32> to vector<16x1xf32>
    %cst_5 = arith.constant 3.200000e+01 : f32
    %5 = vector.broadcast %cst_5 : f32 to vector<16x1xf32>
    %6 = arith.divf %4, %5 : vector<16x1xf32>
    %7 = vector.broadcast %6 : vector<16x1xf32> to vector<16x32xf32>
    %8 = arith.subf %0, %7 : vector<16x32xf32>
    %9 = arith.mulf %8, %8 : vector<16x32xf32>
    %cst_6 = arith.constant dense<0.000000e+00> : vector<16xf32>
    %10 = vector.multi_reduction <add>, %9, %cst_6 [1] : vector<16x32xf32> to vector<16xf32>
    %11 = vector.shape_cast %10 : vector<16xf32> to vector<16x1xf32>
    %cst_7 = arith.constant 3.200000e+01 : f32
    %12 = vector.broadcast %cst_7 : f32 to vector<16x1xf32>
    %13 = arith.divf %11, %12 : vector<16x1xf32>
    %14 = vector.broadcast %6 : vector<16x1xf32> to vector<16x32xf32>
    %15 = arith.subf %0, %14 : vector<16x32xf32>
    %cst_8 = arith.constant 9.99999974E-6 : f32
    %16 = vector.broadcast %cst_8 : f32 to vector<16x1xf32>
    %17 = arith.addf %13, %16 : vector<16x1xf32>
    %18 = math.rsqrt %17 : vector<16x1xf32>
    %19 = vector.broadcast %18 : vector<16x1xf32> to vector<16x32xf32>
    %20 = arith.mulf %15, %19 : vector<16x32xf32>
    %21 = vector.broadcast %1 : vector<1x32xf32> to vector<16x32xf32>
    %22 = arith.mulf %20, %21 : vector<16x32xf32>
    %23 = vector.broadcast %2 : vector<1x32xf32> to vector<16x32xf32>
    %24 = arith.addf %22, %23 : vector<16x32xf32>
    %c0_9 = arith.constant 0 : index
    %c0_10 = arith.constant 0 : index
    %25 = vector.load %arg3[%c0_9, %c0_10] : memref<32x128xf32, #tpu.memory_space<vmem>>, vector<32x128xf32>
    %cst_11 = arith.constant dense<0.000000e+00> : vector<16x128xf32>
    %26 = tpu.matmul %24, %25, %cst_11 {dimension_numbers = #tpu.dot_dimension_numbers<[1], [0], [0], [1], [0, 0, 1, 1], [], []>} : vector<16x32xf32>, vector<32x128xf32>, vector<16x128xf32> -> vector<16x128xf32>
    %c0_12 = arith.constant 0 : index
    %c0_13 = arith.constant 0 : index
    %27 = vector.load %arg4[%c0_12, %c0_13] : memref<1x128xf32, #tpu.memory_space<vmem>>, vector<1x128xf32>
    %28 = vector.broadcast %27 : vector<1x128xf32> to vector<16x128xf32>
    %29 = arith.addf %26, %28 : vector<16x128xf32>
    %c0_14 = arith.constant 0 : index
    %c0_15 = arith.constant 0 : index
    %30 = vector.load %arg5[%c0_14, %c0_15] : memref<16x128xf32, #tpu.memory_space<vmem>>, vector<16x128xf32>
    tpu.vector_store %arg5[%c0_14, %c0_15], %29 {strides = array<i32>} : memref<16x128xf32, #tpu.memory_space<vmem>>, vector<16x128xf32>,
    return
  }
}

module attributes {stable_mosaic.version = 11 : i64} {
  func.func @_encoder_layer_kernel(%arg0: memref<16x32xf32, #tpu.memory_space<vmem>>, %arg1: memref<2x8xf32, #tpu.memory_space<vmem>>, %arg2: memref<32x96xf32, #tpu.memory_space<vmem>>, %arg3: memref<32x32xf32, #tpu.memory_space<vmem>>, %arg4: memref<32x64xf32, #tpu.memory_space<vmem>>, %arg5: memref<64x32xf32, #tpu.memory_space<vmem>>, %arg6: memref<10x128xf32, #tpu.memory_space<vmem>>, %arg7: memref<16x32xf32, #tpu.memory_space<vmem>>) attributes {dimension_semantics = [], scalar_prefetch = 0 : i64, scratch_operands = 0 : i64, tpu.core_type = #tpu.core_type<tc>} {
    %c0 = arith.constant 0 : index
    %c0_0 = arith.constant 0 : index
    %0 = vector.load %arg0[%c0, %c0_0] : memref<16x32xf32, #tpu.memory_space<vmem>>, vector<16x32xf32>
    %c0_1 = arith.constant 0 : index
    %c0_2 = arith.constant 0 : index
    %1 = vector.load %arg6[%c0_1, %c0_2] : memref<10x128xf32, #tpu.memory_space<vmem>>, vector<10x128xf32>
    %c0_3 = arith.constant 0 : index
    %c0_4 = arith.constant 0 : index
    %2 = vector.load %arg2[%c0_3, %c0_4] : memref<32x96xf32, #tpu.memory_space<vmem>>, vector<32x96xf32>
    %cst = arith.constant dense<0.000000e+00> : vector<16x96xf32>
    %3 = tpu.matmul %0, %2, %cst {dimension_numbers = #tpu.dot_dimension_numbers<[1], [0], [0], [1], [0, 0, 1, 1], [], []>} : vector<16x32xf32>, vector<32x96xf32>, vector<16x96xf32> -> vector<16x96xf32>
    %4 = vector.extract_strided_slice %1 {offsets = [0, 0], sizes = [1, 96], strides = [1, 1]} : vector<10x128xf32> to vector<1x96xf32>
    %5 = vector.broadcast %4 : vector<1x96xf32> to vector<16x96xf32>
    %6 = arith.addf %3, %5 : vector<16x96xf32>
    %7 = vector.shape_cast %6 : vector<16x96xf32> to vector<2x8x96xf32>
    %c0_5 = arith.constant 0 : index
    %c0_6 = arith.constant 0 : index
    %8 = vector.load %arg1[%c0_5, %c0_6] : memref<2x8xf32, #tpu.memory_space<vmem>>, vector<2x8xf32>
    %cst_7 = arith.constant 0.000000e+00 : f32
    %9 = vector.broadcast %cst_7 : f32 to vector<2x8xf32>
    %10 = arith.cmpf ogt, %8, %9 : vector<2x8xf32>
    %cst_8 = arith.constant -1.000000e+30 : f32
    %cst_9 = arith.constant 0.000000e+00 : f32
    %11 = vector.broadcast %cst_8 : f32 to vector<2x8xf32>
    %12 = vector.broadcast %cst_9 : f32 to vector<2x8xf32>
    %13 = arith.select %10, %11, %12 : vector<2x8xi1>, vector<2x8xf32>
    %14 = vector.shape_cast %13 : vector<2x8xf32> to vector<2x1x8xf32>
    %15 = vector.extract_strided_slice %7 {offsets = [0, 0, 0], sizes = [2, 8, 32], strides = [1, 1, 1]} : vector<2x8x96xf32> to vector<2x8x32xf32>
    %16 = vector.extract_strided_slice %7 {offsets = [0, 0, 32], sizes = [2, 8, 32], strides = [1, 1, 1]} : vector<2x8x96xf32> to vector<2x8x32xf32>
    %17 = vector.extract_strided_slice %7 {offsets = [0, 0, 64], sizes = [2, 8, 32], strides = [1, 1, 1]} : vector<2x8x96xf32> to vector<2x8x32xf32>
    %18 = vector.extract_strided_slice %15 {offsets = [0, 0, 0], sizes = [2, 8, 8], strides = [1, 1, 1]} : vector<2x8x32xf32> to vector<2x8x8xf32>
    %19 = vector.extract_strided_slice %16 {offsets = [0, 0, 0], sizes = [2, 8, 8], strides = [1, 1, 1]} : vector<2x8x32xf32> to vector<2x8x8xf32>
    %20 = vector.extract_strided_slice %17 {offsets = [0, 0, 0], sizes = [2, 8, 8], strides = [1, 1, 1]} : vector<2x8x32xf32> to vector<2x8x8xf32>
    "tpu.trace_start"() <{level = 10 : i32, message = "bqd,bkd->bqk"}> : () -> ()
    %cst_10 = arith.constant dense<0.000000e+00> : vector<2x8x8xf32>
    %21 = tpu.matmul %18, %19, %cst_10 {dimension_numbers = #tpu.dot_dimension_numbers<[2], [2], [1], [1], [0, 0, 0, 1, 1, 1], [0], [0]>} : vector<2x8x8xf32>, vector<2x8x8xf32>, vector<2x8x8xf32> -> vector<2x8x8xf32>
    "tpu.trace_stop"() : () -> ()
    %22 = vector.broadcast %14 : vector<2x1x8xf32> to vector<2x8x8xf32>
    %23 = arith.addf %21, %22 : vector<2x8x8xf32>
    %cst_11 = arith.constant dense<0xFF800000> : vector<2x8xf32>
    %24 = vector.multi_reduction <maximumf>, %23, %cst_11 [2] : vector<2x8x8xf32> to vector<2x8xf32>
    %25 = vector.shape_cast %24 : vector<2x8xf32> to vector<2x8x1xf32>
    %26 = vector.broadcast %25 : vector<2x8x1xf32> to vector<2x8x8xf32>
    %27 = arith.subf %23, %26 : vector<2x8x8xf32>
    %28 = math.exp %27 : vector<2x8x8xf32>
    %cst_12 = arith.constant dense<0.000000e+00> : vector<2x8xf32>
    %29 = vector.multi_reduction <add>, %28, %cst_12 [2] : vector<2x8x8xf32> to vector<2x8xf32>
    %30 = vector.shape_cast %29 : vector<2x8xf32> to vector<2x8x1xf32>
    "tpu.trace_start"() <{level = 10 : i32, message = "bqk,bkd->bqd"}> : () -> ()
    %cst_13 = arith.constant dense<0.000000e+00> : vector<2x8x8xf32>
    %31 = tpu.matmul %28, %20, %cst_13 {dimension_numbers = #tpu.dot_dimension_numbers<[2], [1], [1], [2], [0, 0, 0, 1, 1, 2], [0], [0]>} : vector<2x8x8xf32>, vector<2x8x8xf32>, vector<2x8x8xf32> -> vector<2x8x8xf32>
    "tpu.trace_stop"() : () -> ()
    %32 = vector.broadcast %30 : vector<2x8x1xf32> to vector<2x8x8xf32>
    %33 = arith.divf %31, %32 : vector<2x8x8xf32>
    %34 = vector.extract_strided_slice %15 {offsets = [0, 0, 8], sizes = [2, 8, 8], strides = [1, 1, 1]} : vector<2x8x32xf32> to vector<2x8x8xf32>
    %35 = vector.extract_strided_slice %16 {offsets = [0, 0, 8], sizes = [2, 8, 8], strides = [1, 1, 1]} : vector<2x8x32xf32> to vector<2x8x8xf32>
    %36 = vector.extract_strided_slice %17 {offsets = [0, 0, 8], sizes = [2, 8, 8], strides = [1, 1, 1]} : vector<2x8x32xf32> to vector<2x8x8xf32>
    "tpu.trace_start"() <{level = 10 : i32, message = "bqd,bkd->bqk"}> : () -> ()
    %cst_14 = arith.constant dense<0.000000e+00> : vector<2x8x8xf32>
    %37 = tpu.matmul %34, %35, %cst_14 {dimension_numbers = #tpu.dot_dimension_numbers<[2], [2], [1], [1], [0, 0, 0, 1, 1, 1], [0], [0]>} : vector<2x8x8xf32>, vector<2x8x8xf32>, vector<2x8x8xf32> -> vector<2x8x8xf32>
    "tpu.trace_stop"() : () -> ()
    %38 = vector.broadcast %14 : vector<2x1x8xf32> to vector<2x8x8xf32>
    %39 = arith.addf %37, %38 : vector<2x8x8xf32>
    %cst_15 = arith.constant dense<0xFF800000> : vector<2x8xf32>
    %40 = vector.multi_reduction <maximumf>, %39, %cst_15 [2] : vector<2x8x8xf32> to vector<2x8xf32>
    %41 = vector.shape_cast %40 : vector<2x8xf32> to vector<2x8x1xf32>
    %42 = vector.broadcast %41 : vector<2x8x1xf32> to vector<2x8x8xf32>
    %43 = arith.subf %39, %42 : vector<2x8x8xf32>
    %44 = math.exp %43 : vector<2x8x8xf32>
    %cst_16 = arith.constant dense<0.000000e+00> : vector<2x8xf32>
    %45 = vector.multi_reduction <add>, %44, %cst_16 [2] : vector<2x8x8xf32> to vector<2x8xf32>
    %46 = vector.shape_cast %45 : vector<2x8xf32> to vector<2x8x1xf32>
    "tpu.trace_start"() <{level = 10 : i32, message = "bqk,bkd->bqd"}> : () -> ()
    %cst_17 = arith.constant dense<0.000000e+00> : vector<2x8x8xf32>
    %47 = tpu.matmul %44, %36, %cst_17 {dimension_numbers = #tpu.dot_dimension_numbers<[2], [1], [1], [2], [0, 0, 0, 1, 1, 2], [0], [0]>} : vector<2x8x8xf32>, vector<2x8x8xf32>, vector<2x8x8xf32> -> vector<2x8x8xf32>
    "tpu.trace_stop"() : () -> ()
    %48 = vector.broadcast %46 : vector<2x8x1xf32> to vector<2x8x8xf32>
    %49 = arith.divf %47, %48 : vector<2x8x8xf32>
    %50 = vector.extract_strided_slice %15 {offsets = [0, 0, 16], sizes = [2, 8, 8], strides = [1, 1, 1]} : vector<2x8x32xf32> to vector<2x8x8xf32>
    %51 = vector.extract_strided_slice %16 {offsets = [0, 0, 16], sizes = [2, 8, 8], strides = [1, 1, 1]} : vector<2x8x32xf32> to vector<2x8x8xf32>
    %52 = vector.extract_strided_slice %17 {offsets = [0, 0, 16], sizes = [2, 8, 8], strides = [1, 1, 1]} : vector<2x8x32xf32> to vector<2x8x8xf32>
    "tpu.trace_start"() <{level = 10 : i32, message = "bqd,bkd->bqk"}> : () -> ()
    %cst_18 = arith.constant dense<0.000000e+00> : vector<2x8x8xf32>
    %53 = tpu.matmul %50, %51, %cst_18 {dimension_numbers = #tpu.dot_dimension_numbers<[2], [2], [1], [1], [0, 0, 0, 1, 1, 1], [0], [0]>} : vector<2x8x8xf32>, vector<2x8x8xf32>, vector<2x8x8xf32> -> vector<2x8x8xf32>
    "tpu.trace_stop"() : () -> ()
    %54 = vector.broadcast %14 : vector<2x1x8xf32> to vector<2x8x8xf32>
    %55 = arith.addf %53, %54 : vector<2x8x8xf32>
    %cst_19 = arith.constant dense<0xFF800000> : vector<2x8xf32>
    %56 = vector.multi_reduction <maximumf>, %55, %cst_19 [2] : vector<2x8x8xf32> to vector<2x8xf32>
    %57 = vector.shape_cast %56 : vector<2x8xf32> to vector<2x8x1xf32>
    %58 = vector.broadcast %57 : vector<2x8x1xf32> to vector<2x8x8xf32>
    %59 = arith.subf %55, %58 : vector<2x8x8xf32>
    %60 = math.exp %59 : vector<2x8x8xf32>
    %cst_20 = arith.constant dense<0.000000e+00> : vector<2x8xf32>
    %61 = vector.multi_reduction <add>, %60, %cst_20 [2] : vector<2x8x8xf32> to vector<2x8xf32>
    %62 = vector.shape_cast %61 : vector<2x8xf32> to vector<2x8x1xf32>
    "tpu.trace_start"() <{level = 10 : i32, message = "bqk,bkd->bqd"}> : () -> ()
    %cst_21 = arith.constant dense<0.000000e+00> : vector<2x8x8xf32>
    %63 = tpu.matmul %60, %52, %cst_21 {dimension_numbers = #tpu.dot_dimension_numbers<[2], [1], [1], [2], [0, 0, 0, 1, 1, 2], [0], [0]>} : vector<2x8x8xf32>, vector<2x8x8xf32>, vector<2x8x8xf32> -> vector<2x8x8xf32>
    "tpu.trace_stop"() : () -> ()
    %64 = vector.broadcast %62 : vector<2x8x1xf32> to vector<2x8x8xf32>
    %65 = arith.divf %63, %64 : vector<2x8x8xf32>
    %66 = vector.extract_strided_slice %15 {offsets = [0, 0, 24], sizes = [2, 8, 8], strides = [1, 1, 1]} : vector<2x8x32xf32> to vector<2x8x8xf32>
    %67 = vector.extract_strided_slice %16 {offsets = [0, 0, 24], sizes = [2, 8, 8], strides = [1, 1, 1]} : vector<2x8x32xf32> to vector<2x8x8xf32>
    %68 = vector.extract_strided_slice %17 {offsets = [0, 0, 24], sizes = [2, 8, 8], strides = [1, 1, 1]} : vector<2x8x32xf32> to vector<2x8x8xf32>
    "tpu.trace_start"() <{level = 10 : i32, message = "bqd,bkd->bqk"}> : () -> ()
    %cst_22 = arith.constant dense<0.000000e+00> : vector<2x8x8xf32>
    %69 = tpu.matmul %66, %67, %cst_22 {dimension_numbers = #tpu.dot_dimension_numbers<[2], [2], [1], [1], [0, 0, 0, 1, 1, 1], [0], [0]>} : vector<2x8x8xf32>, vector<2x8x8xf32>, vector<2x8x8xf32> -> vector<2x8x8xf32>
    "tpu.trace_stop"() : () -> ()
    %70 = vector.broadcast %14 : vector<2x1x8xf32> to vector<2x8x8xf32>
    %71 = arith.addf %69, %70 : vector<2x8x8xf32>
    %cst_23 = arith.constant dense<0xFF800000> : vector<2x8xf32>
    %72 = vector.multi_reduction <maximumf>, %71, %cst_23 [2] : vector<2x8x8xf32> to vector<2x8xf32>
    %73 = vector.shape_cast %72 : vector<2x8xf32> to vector<2x8x1xf32>
    %74 = vector.broadcast %73 : vector<2x8x1xf32> to vector<2x8x8xf32>
    %75 = arith.subf %71, %74 : vector<2x8x8xf32>
    %76 = math.exp %75 : vector<2x8x8xf32>
    %cst_24 = arith.constant dense<0.000000e+00> : vector<2x8xf32>
    %77 = vector.multi_reduction <add>, %76, %cst_24 [2] : vector<2x8x8xf32> to vector<2x8xf32>
    %78 = vector.shape_cast %77 : vector<2x8xf32> to vector<2x8x1xf32>
    "tpu.trace_start"() <{level = 10 : i32, message = "bqk,bkd->bqd"}> : () -> ()
    %cst_25 = arith.constant dense<0.000000e+00> : vector<2x8x8xf32>
    %79 = tpu.matmul %76, %68, %cst_25 {dimension_numbers = #tpu.dot_dimension_numbers<[2], [1], [1], [2], [0, 0, 0, 1, 1, 2], [0], [0]>} : vector<2x8x8xf32>, vector<2x8x8xf32>, vector<2x8x8xf32> -> vector<2x8x8xf32>
    "tpu.trace_stop"() : () -> ()
    %80 = vector.broadcast %78 : vector<2x8x1xf32> to vector<2x8x8xf32>
    %81 = arith.divf %79, %80 : vector<2x8x8xf32>
    %82 = tpu.concatenate %33, %49, %65, %81 in 2 : vector<2x8x8xf32>, vector<2x8x8xf32>, vector<2x8x8xf32>, vector<2x8x8xf32> -> vector<2x8x32xf32>
    %83 = vector.shape_cast %82 : vector<2x8x32xf32> to vector<16x32xf32>
    %c0_26 = arith.constant 0 : index
    %c0_27 = arith.constant 0 : index
    %84 = vector.load %arg3[%c0_26, %c0_27] : memref<32x32xf32, #tpu.memory_space<vmem>>, vector<32x32xf32>
    %cst_28 = arith.constant dense<0.000000e+00> : vector<16x32xf32>
    %85 = tpu.matmul %83, %84, %cst_28 {dimension_numbers = #tpu.dot_dimension_numbers<[1], [0], [0], [1], [0, 0, 1, 1], [], []>} : vector<16x32xf32>, vector<32x32xf32>, vector<16x32xf32> -> vector<16x32xf32>
    %86 = arith.addf %0, %85 : vector<16x32xf32>
    %87 = vector.extract_strided_slice %1 {offsets = [1, 0], sizes = [1, 32], strides = [1, 1]} : vector<10x128xf32> to vector<1x32xf32>
    %88 = vector.broadcast %87 : vector<1x32xf32> to vector<16x32xf32>
    %89 = arith.addf %86, %88 : vector<16x32xf32>
    %90 = vector.extract_strided_slice %1 {offsets = [2, 0], sizes = [1, 32], strides = [1, 1]} : vector<10x128xf32> to vector<1x32xf32>
    %91 = vector.extract_strided_slice %1 {offsets = [3, 0], sizes = [1, 32], strides = [1, 1]} : vector<10x128xf32> to vector<1x32xf32>
    %cst_29 = arith.constant dense<0.000000e+00> : vector<16xf32>
    %92 = vector.multi_reduction <add>, %89, %cst_29 [1] : vector<16x32xf32> to vector<16xf32>
    %93 = vector.shape_cast %92 : vector<16xf32> to vector<16x1xf32>
    %cst_30 = arith.constant 3.200000e+01 : f32
    %94 = vector.broadcast %cst_30 : f32 to vector<16x1xf32>
    %95 = arith.divf %93, %94 : vector<16x1xf32>
    %96 = vector.broadcast %95 : vector<16x1xf32> to vector<16x32xf32>
    %97 = arith.subf %89, %96 : vector<16x32xf32>
    %98 = arith.mulf %97, %97 : vector<16x32xf32>
    %cst_31 = arith.constant dense<0.000000e+00> : vector<16xf32>
    %99 = vector.multi_reduction <add>, %98, %cst_31 [1] : vector<16x32xf32> to vector<16xf32>
    %100 = vector.shape_cast %99 : vector<16xf32> to vector<16x1xf32>
    %cst_32 = arith.constant 3.200000e+01 : f32
    %101 = vector.broadcast %cst_32 : f32 to vector<16x1xf32>
    %102 = arith.divf %100, %101 : vector<16x1xf32>
    %103 = vector.broadcast %95 : vector<16x1xf32> to vector<16x32xf32>
    %104 = arith.subf %89, %103 : vector<16x32xf32>
    %cst_33 = arith.constant 9.99999974E-6 : f32
    %105 = vector.broadcast %cst_33 : f32 to vector<16x1xf32>
    %106 = arith.addf %102, %105 : vector<16x1xf32>
    %107 = math.rsqrt %106 : vector<16x1xf32>
    %108 = vector.broadcast %107 : vector<16x1xf32> to vector<16x32xf32>
    %109 = arith.mulf %104, %108 : vector<16x32xf32>
    %110 = vector.broadcast %90 : vector<1x32xf32> to vector<16x32xf32>
    %111 = arith.mulf %109, %110 : vector<16x32xf32>
    %112 = vector.broadcast %91 : vector<1x32xf32> to vector<16x32xf32>
    %113 = arith.addf %111, %112 : vector<16x32xf32>
    %c0_34 = arith.constant 0 : index
    %c0_35 = arith.constant 0 : index
    %114 = vector.load %arg4[%c0_34, %c0_35] : memref<32x64xf32, #tpu.memory_space<vmem>>, vector<32x64xf32>
    %cst_36 = arith.constant dense<0.000000e+00> : vector<16x64xf32>
    %115 = tpu.matmul %113, %114, %cst_36 {dimension_numbers = #tpu.dot_dimension_numbers<[1], [0], [0], [1], [0, 0, 1, 1], [], []>} : vector<16x32xf32>, vector<32x64xf32>, vector<16x64xf32> -> vector<16x64xf32>
    %116 = vector.extract_strided_slice %1 {offsets = [4, 0], sizes = [1, 64], strides = [1, 1]} : vector<10x128xf32> to vector<1x64xf32>
    %117 = vector.broadcast %116 : vector<1x64xf32> to vector<16x64xf32>
    %118 = arith.addf %115, %117 : vector<16x64xf32>
    %cst_37 = arith.constant 0.000000e+00 : f32
    %119 = vector.broadcast %cst_37 : f32 to vector<16x64xf32>
    %120 = arith.maximumf %118, %119 : vector<16x64xf32>
    %c0_38 = arith.constant 0 : index
    %c0_39 = arith.constant 0 : index
    %121 = vector.load %arg5[%c0_38, %c0_39] : memref<64x32xf32, #tpu.memory_space<vmem>>, vector<64x32xf32>
    %cst_40 = arith.constant dense<0.000000e+00> : vector<16x32xf32>
    %122 = tpu.matmul %120, %121, %cst_40 {dimension_numbers = #tpu.dot_dimension_numbers<[1], [0], [0], [1], [0, 0, 1, 1], [], []>} : vector<16x64xf32>, vector<64x32xf32>, vector<16x32xf32> -> vector<16x32xf32>
    %123 = arith.addf %113, %122 : vector<16x32xf32>
    %124 = vector.extract_strided_slice %1 {offsets = [5, 0], sizes = [1, 32], strides = [1, 1]} : vector<10x128xf32> to vector<1x32xf32>
    %125 = vector.broadcast %124 : vector<1x32xf32> to vector<16x32xf32>
    %126 = arith.addf %123, %125 : vector<16x32xf32>
    %127 = vector.extract_strided_slice %1 {offsets = [6, 0], sizes = [1, 32], strides = [1, 1]} : vector<10x128xf32> to vector<1x32xf32>
    %128 = vector.extract_strided_slice %1 {offsets = [7, 0], sizes = [1, 32], strides = [1, 1]} : vector<10x128xf32> to vector<1x32xf32>
    %cst_41 = arith.constant dense<0.000000e+00> : vector<16xf32>
    %129 = vector.multi_reduction <add>, %126, %cst_41 [1] : vector<16x32xf32> to vector<16xf32>
    %130 = vector.shape_cast %129 : vector<16xf32> to vector<16x1xf32>
    %cst_42 = arith.constant 3.200000e+01 : f32
    %131 = vector.broadcast %cst_42 : f32 to vector<16x1xf32>
    %132 = arith.divf %130, %131 : vector<16x1xf32>
    %133 = vector.broadcast %132 : vector<16x1xf32> to vector<16x32xf32>
    %134 = arith.subf %126, %133 : vector<16x32xf32>
    %135 = arith.mulf %134, %134 : vector<16x32xf32>
    %cst_43 = arith.constant dense<0.000000e+00> : vector<16xf32>
    %136 = vector.multi_reduction <add>, %135, %cst_43 [1] : vector<16x32xf32> to vector<16xf32>
    %137 = vector.shape_cast %136 : vector<16xf32> to vector<16x1xf32>
    %cst_44 = arith.constant 3.200000e+01 : f32
    %138 = vector.broadcast %cst_44 : f32 to vector<16x1xf32>
    %139 = arith.divf %137, %138 : vector<16x1xf32>
    %140 = vector.broadcast %132 : vector<16x1xf32> to vector<16x32xf32>
    %141 = arith.subf %126, %140 : vector<16x32xf32>
    %cst_45 = arith.constant 9.99999974E-6 : f32
    %142 = vector.broadcast %cst_45 : f32 to vector<16x1xf32>
    %143 = arith.addf %139, %142 : vector<16x1xf32>
    %144 = math.rsqrt %143 : vector<16x1xf32>
    %145 = vector.broadcast %144 : vector<16x1xf32> to vector<16x32xf32>
    %146 = arith.mulf %141, %145 : vector<16x32xf32>
    %147 = vector.broadcast %127 : vector<1x32xf32> to vector<16x32xf32>
    %148 = arith.mulf %146, %147 : vector<16x32xf32>
    %149 = vector.broadcast %128 : vector<1x32xf32> to vector<16x32xf32>
    %150 = arith.addf %148, %149 : vector<16x32xf32>
    %151 = vector.extract_strided_slice %1 {offsets = [8, 0], sizes = [1, 32], strides = [1, 1]} : vector<10x128xf32> to vector<1x32xf32>
    %152 = vector.extract_strided_slice %1 {offsets = [9, 0], sizes = [1, 32], strides = [1, 1]} : vector<10x128xf32> to vector<1x32xf32>
    %cst_46 = arith.constant dense<0.000000e+00> : vector<16xf32>
    %153 = vector.multi_reduction <add>, %150, %cst_46 [1] : vector<16x32xf32> to vector<16xf32>
    %154 = vector.shape_cast %153 : vector<16xf32> to vector<16x1xf32>
    %cst_47 = arith.constant 3.200000e+01 : f32
    %155 = vector.broadcast %cst_47 : f32 to vector<16x1xf32>
    %156 = arith.divf %154, %155 : vector<16x1xf32>
    %157 = vector.broadcast %156 : vector<16x1xf32> to vector<16x32xf32>
    %158 = arith.subf %150, %157 : vector<16x32xf32>
    %159 = arith.mulf %158, %158 : vector<16x32xf32>
    %cst_48 = arith.constant dense<0.000000e+00> : vector<16xf32>
    %160 = vector.multi_reduction <add>, %159, %cst_48 [1] : vector<16x32xf32> to vector<16xf32>
    %161 = vector.shape_cast %160 : vector<16xf32> to vector<16x1xf32>
    %cst_49 = arith.constant 3.200000e+01 : f32
    %162 = vector.broadcast %cst_49 : f32 to vector<16x1xf32>
    %163 = arith.divf %161, %162 : vector<16x1xf32>
    %164 = vector.broadcast %156 : vector<16x1xf32> to vector<16x32xf32>
    %165 = arith.subf %150, %164 : vector<16x32xf32>
    %cst_50 = arith.constant 9.99999974E-6 : f32
    %166 = vector.broadcast %cst_50 : f32 to vector<16x1xf32>
    %167 = arith.addf %163, %166 : vector<16x1xf32>
    %168 = math.rsqrt %167 : vector<16x1xf32>
    %169 = vector.broadcast %168 : vector<16x1xf32> to vector<16x32xf32>
    %170 = arith.mulf %165, %169 : vector<16x32xf32>
    %171 = vector.broadcast %151 : vector<1x32xf32> to vector<16x32xf32>
    %172 = arith.mulf %170, %171 : vector<16x32xf32>
    %173 = vector.broadcast %152 : vector<1x32xf32> to vector<16x32xf32>
    %174 = arith.addf %172, %173 : vector<16x32xf32>
    %c0_51 = arith.constant 0 : index
    %c0_52 = arith.constant 0 : index
    %175 = vector.load %arg7[%c0_51, %c0_52] : memref<16x32xf32, #tpu.memory_space<vmem>>, vector<16x32xf32>
    tpu.vector_store %arg7[%c0_51, %c0_52], %174 {strides = array<i32>} : memref<16x32xf32, #tpu.memory_space<vmem>>, vector<16x32xf32>,
    return
  }
}

module attributes {stable_mosaic.version = 11 : i64} {
  func.func @_encoder_layer_kernel(%arg0: memref<16x32xf32, #tpu.memory_space<vmem>>, %arg1: memref<2x8xf32, #tpu.memory_space<vmem>>, %arg2: memref<32x96xf32, #tpu.memory_space<vmem>>, %arg3: memref<32x32xf32, #tpu.memory_space<vmem>>, %arg4: memref<32x64xf32, #tpu.memory_space<vmem>>, %arg5: memref<64x32xf32, #tpu.memory_space<vmem>>, %arg6: memref<10x128xf32, #tpu.memory_space<vmem>>, %arg7: memref<16x32xf32, #tpu.memory_space<vmem>>) attributes {dimension_semantics = [], scalar_prefetch = 0 : i64, scratch_operands = 0 : i64, tpu.core_type = #tpu.core_type<tc>} {
    %c0 = arith.constant 0 : index
    %c0_0 = arith.constant 0 : index
    %0 = vector.load %arg0[%c0, %c0_0] : memref<16x32xf32, #tpu.memory_space<vmem>>, vector<16x32xf32>
    %c0_1 = arith.constant 0 : index
    %c0_2 = arith.constant 0 : index
    %1 = vector.load %arg6[%c0_1, %c0_2] : memref<10x128xf32, #tpu.memory_space<vmem>>, vector<10x128xf32>
    %c0_3 = arith.constant 0 : index
    %c0_4 = arith.constant 0 : index
    %2 = vector.load %arg2[%c0_3, %c0_4] : memref<32x96xf32, #tpu.memory_space<vmem>>, vector<32x96xf32>
    %cst = arith.constant dense<0.000000e+00> : vector<16x96xf32>
    %3 = tpu.matmul %0, %2, %cst {dimension_numbers = #tpu.dot_dimension_numbers<[1], [0], [0], [1], [0, 0, 1, 1], [], []>} : vector<16x32xf32>, vector<32x96xf32>, vector<16x96xf32> -> vector<16x96xf32>
    %4 = vector.extract_strided_slice %1 {offsets = [0, 0], sizes = [1, 96], strides = [1, 1]} : vector<10x128xf32> to vector<1x96xf32>
    %5 = vector.broadcast %4 : vector<1x96xf32> to vector<16x96xf32>
    %6 = arith.addf %3, %5 : vector<16x96xf32>
    %7 = vector.shape_cast %6 : vector<16x96xf32> to vector<2x8x96xf32>
    %c0_5 = arith.constant 0 : index
    %c0_6 = arith.constant 0 : index
    %8 = vector.load %arg1[%c0_5, %c0_6] : memref<2x8xf32, #tpu.memory_space<vmem>>, vector<2x8xf32>
    %cst_7 = arith.constant 0.000000e+00 : f32
    %9 = vector.broadcast %cst_7 : f32 to vector<2x8xf32>
    %10 = arith.cmpf ogt, %8, %9 : vector<2x8xf32>
    %cst_8 = arith.constant -1.000000e+30 : f32
    %cst_9 = arith.constant 0.000000e+00 : f32
    %11 = vector.broadcast %cst_8 : f32 to vector<2x8xf32>
    %12 = vector.broadcast %cst_9 : f32 to vector<2x8xf32>
    %13 = arith.select %10, %11, %12 : vector<2x8xi1>, vector<2x8xf32>
    %14 = vector.shape_cast %13 : vector<2x8xf32> to vector<2x1x8xf32>
    %15 = vector.extract_strided_slice %7 {offsets = [0, 0, 0], sizes = [2, 8, 32], strides = [1, 1, 1]} : vector<2x8x96xf32> to vector<2x8x32xf32>
    %16 = vector.extract_strided_slice %7 {offsets = [0, 0, 32], sizes = [2, 8, 32], strides = [1, 1, 1]} : vector<2x8x96xf32> to vector<2x8x32xf32>
    %17 = vector.extract_strided_slice %7 {offsets = [0, 0, 64], sizes = [2, 8, 32], strides = [1, 1, 1]} : vector<2x8x96xf32> to vector<2x8x32xf32>
    %18 = vector.extract_strided_slice %15 {offsets = [0, 0, 0], sizes = [2, 8, 8], strides = [1, 1, 1]} : vector<2x8x32xf32> to vector<2x8x8xf32>
    %19 = vector.extract_strided_slice %16 {offsets = [0, 0, 0], sizes = [2, 8, 8], strides = [1, 1, 1]} : vector<2x8x32xf32> to vector<2x8x8xf32>
    %20 = vector.extract_strided_slice %17 {offsets = [0, 0, 0], sizes = [2, 8, 8], strides = [1, 1, 1]} : vector<2x8x32xf32> to vector<2x8x8xf32>
    "tpu.trace_start"() <{level = 10 : i32, message = "bqd,bkd->bqk"}> : () -> ()
    %cst_10 = arith.constant dense<0.000000e+00> : vector<2x8x8xf32>
    %21 = tpu.matmul %18, %19, %cst_10 {dimension_numbers = #tpu.dot_dimension_numbers<[2], [2], [1], [1], [0, 0, 0, 1, 1, 1], [0], [0]>} : vector<2x8x8xf32>, vector<2x8x8xf32>, vector<2x8x8xf32> -> vector<2x8x8xf32>
    "tpu.trace_stop"() : () -> ()
    %22 = vector.broadcast %14 : vector<2x1x8xf32> to vector<2x8x8xf32>
    %23 = arith.addf %21, %22 : vector<2x8x8xf32>
    %cst_11 = arith.constant dense<0xFF800000> : vector<2x8xf32>
    %24 = vector.multi_reduction <maximumf>, %23, %cst_11 [2] : vector<2x8x8xf32> to vector<2x8xf32>
    %25 = vector.shape_cast %24 : vector<2x8xf32> to vector<2x8x1xf32>
    %26 = vector.broadcast %25 : vector<2x8x1xf32> to vector<2x8x8xf32>
    %27 = arith.subf %23, %26 : vector<2x8x8xf32>
    %28 = math.exp %27 : vector<2x8x8xf32>
    %cst_12 = arith.constant dense<0.000000e+00> : vector<2x8xf32>
    %29 = vector.multi_reduction <add>, %28, %cst_12 [2] : vector<2x8x8xf32> to vector<2x8xf32>
    %30 = vector.shape_cast %29 : vector<2x8xf32> to vector<2x8x1xf32>
    "tpu.trace_start"() <{level = 10 : i32, message = "bqk,bkd->bqd"}> : () -> ()
    %cst_13 = arith.constant dense<0.000000e+00> : vector<2x8x8xf32>
    %31 = tpu.matmul %28, %20, %cst_13 {dimension_numbers = #tpu.dot_dimension_numbers<[2], [1], [1], [2], [0, 0, 0, 1, 1, 2], [0], [0]>} : vector<2x8x8xf32>, vector<2x8x8xf32>, vector<2x8x8xf32> -> vector<2x8x8xf32>
    "tpu.trace_stop"() : () -> ()
    %32 = vector.broadcast %30 : vector<2x8x1xf32> to vector<2x8x8xf32>
    %33 = arith.divf %31, %32 : vector<2x8x8xf32>
    %34 = vector.extract_strided_slice %15 {offsets = [0, 0, 8], sizes = [2, 8, 8], strides = [1, 1, 1]} : vector<2x8x32xf32> to vector<2x8x8xf32>
    %35 = vector.extract_strided_slice %16 {offsets = [0, 0, 8], sizes = [2, 8, 8], strides = [1, 1, 1]} : vector<2x8x32xf32> to vector<2x8x8xf32>
    %36 = vector.extract_strided_slice %17 {offsets = [0, 0, 8], sizes = [2, 8, 8], strides = [1, 1, 1]} : vector<2x8x32xf32> to vector<2x8x8xf32>
    "tpu.trace_start"() <{level = 10 : i32, message = "bqd,bkd->bqk"}> : () -> ()
    %cst_14 = arith.constant dense<0.000000e+00> : vector<2x8x8xf32>
    %37 = tpu.matmul %34, %35, %cst_14 {dimension_numbers = #tpu.dot_dimension_numbers<[2], [2], [1], [1], [0, 0, 0, 1, 1, 1], [0], [0]>} : vector<2x8x8xf32>, vector<2x8x8xf32>, vector<2x8x8xf32> -> vector<2x8x8xf32>
    "tpu.trace_stop"() : () -> ()
    %38 = vector.broadcast %14 : vector<2x1x8xf32> to vector<2x8x8xf32>
    %39 = arith.addf %37, %38 : vector<2x8x8xf32>
    %cst_15 = arith.constant dense<0xFF800000> : vector<2x8xf32>
    %40 = vector.multi_reduction <maximumf>, %39, %cst_15 [2] : vector<2x8x8xf32> to vector<2x8xf32>
    %41 = vector.shape_cast %40 : vector<2x8xf32> to vector<2x8x1xf32>
    %42 = vector.broadcast %41 : vector<2x8x1xf32> to vector<2x8x8xf32>
    %43 = arith.subf %39, %42 : vector<2x8x8xf32>
    %44 = math.exp %43 : vector<2x8x8xf32>
    %cst_16 = arith.constant dense<0.000000e+00> : vector<2x8xf32>
    %45 = vector.multi_reduction <add>, %44, %cst_16 [2] : vector<2x8x8xf32> to vector<2x8xf32>
    %46 = vector.shape_cast %45 : vector<2x8xf32> to vector<2x8x1xf32>
    "tpu.trace_start"() <{level = 10 : i32, message = "bqk,bkd->bqd"}> : () -> ()
    %cst_17 = arith.constant dense<0.000000e+00> : vector<2x8x8xf32>
    %47 = tpu.matmul %44, %36, %cst_17 {dimension_numbers = #tpu.dot_dimension_numbers<[2], [1], [1], [2], [0, 0, 0, 1, 1, 2], [0], [0]>} : vector<2x8x8xf32>, vector<2x8x8xf32>, vector<2x8x8xf32> -> vector<2x8x8xf32>
    "tpu.trace_stop"() : () -> ()
    %48 = vector.broadcast %46 : vector<2x8x1xf32> to vector<2x8x8xf32>
    %49 = arith.divf %47, %48 : vector<2x8x8xf32>
    %50 = vector.extract_strided_slice %15 {offsets = [0, 0, 16], sizes = [2, 8, 8], strides = [1, 1, 1]} : vector<2x8x32xf32> to vector<2x8x8xf32>
    %51 = vector.extract_strided_slice %16 {offsets = [0, 0, 16], sizes = [2, 8, 8], strides = [1, 1, 1]} : vector<2x8x32xf32> to vector<2x8x8xf32>
    %52 = vector.extract_strided_slice %17 {offsets = [0, 0, 16], sizes = [2, 8, 8], strides = [1, 1, 1]} : vector<2x8x32xf32> to vector<2x8x8xf32>
    "tpu.trace_start"() <{level = 10 : i32, message = "bqd,bkd->bqk"}> : () -> ()
    %cst_18 = arith.constant dense<0.000000e+00> : vector<2x8x8xf32>
    %53 = tpu.matmul %50, %51, %cst_18 {dimension_numbers = #tpu.dot_dimension_numbers<[2], [2], [1], [1], [0, 0, 0, 1, 1, 1], [0], [0]>} : vector<2x8x8xf32>, vector<2x8x8xf32>, vector<2x8x8xf32> -> vector<2x8x8xf32>
    "tpu.trace_stop"() : () -> ()
    %54 = vector.broadcast %14 : vector<2x1x8xf32> to vector<2x8x8xf32>
    %55 = arith.addf %53, %54 : vector<2x8x8xf32>
    %cst_19 = arith.constant dense<0xFF800000> : vector<2x8xf32>
    %56 = vector.multi_reduction <maximumf>, %55, %cst_19 [2] : vector<2x8x8xf32> to vector<2x8xf32>
    %57 = vector.shape_cast %56 : vector<2x8xf32> to vector<2x8x1xf32>
    %58 = vector.broadcast %57 : vector<2x8x1xf32> to vector<2x8x8xf32>
    %59 = arith.subf %55, %58 : vector<2x8x8xf32>
    %60 = math.exp %59 : vector<2x8x8xf32>
    %cst_20 = arith.constant dense<0.000000e+00> : vector<2x8xf32>
    %61 = vector.multi_reduction <add>, %60, %cst_20 [2] : vector<2x8x8xf32> to vector<2x8xf32>
    %62 = vector.shape_cast %61 : vector<2x8xf32> to vector<2x8x1xf32>
    "tpu.trace_start"() <{level = 10 : i32, message = "bqk,bkd->bqd"}> : () -> ()
    %cst_21 = arith.constant dense<0.000000e+00> : vector<2x8x8xf32>
    %63 = tpu.matmul %60, %52, %cst_21 {dimension_numbers = #tpu.dot_dimension_numbers<[2], [1], [1], [2], [0, 0, 0, 1, 1, 2], [0], [0]>} : vector<2x8x8xf32>, vector<2x8x8xf32>, vector<2x8x8xf32> -> vector<2x8x8xf32>
    "tpu.trace_stop"() : () -> ()
    %64 = vector.broadcast %62 : vector<2x8x1xf32> to vector<2x8x8xf32>
    %65 = arith.divf %63, %64 : vector<2x8x8xf32>
    %66 = vector.extract_strided_slice %15 {offsets = [0, 0, 24], sizes = [2, 8, 8], strides = [1, 1, 1]} : vector<2x8x32xf32> to vector<2x8x8xf32>
    %67 = vector.extract_strided_slice %16 {offsets = [0, 0, 24], sizes = [2, 8, 8], strides = [1, 1, 1]} : vector<2x8x32xf32> to vector<2x8x8xf32>
    %68 = vector.extract_strided_slice %17 {offsets = [0, 0, 24], sizes = [2, 8, 8], strides = [1, 1, 1]} : vector<2x8x32xf32> to vector<2x8x8xf32>
    "tpu.trace_start"() <{level = 10 : i32, message = "bqd,bkd->bqk"}> : () -> ()
    %cst_22 = arith.constant dense<0.000000e+00> : vector<2x8x8xf32>
    %69 = tpu.matmul %66, %67, %cst_22 {dimension_numbers = #tpu.dot_dimension_numbers<[2], [2], [1], [1], [0, 0, 0, 1, 1, 1], [0], [0]>} : vector<2x8x8xf32>, vector<2x8x8xf32>, vector<2x8x8xf32> -> vector<2x8x8xf32>
    "tpu.trace_stop"() : () -> ()
    %70 = vector.broadcast %14 : vector<2x1x8xf32> to vector<2x8x8xf32>
    %71 = arith.addf %69, %70 : vector<2x8x8xf32>
    %cst_23 = arith.constant dense<0xFF800000> : vector<2x8xf32>
    %72 = vector.multi_reduction <maximumf>, %71, %cst_23 [2] : vector<2x8x8xf32> to vector<2x8xf32>
    %73 = vector.shape_cast %72 : vector<2x8xf32> to vector<2x8x1xf32>
    %74 = vector.broadcast %73 : vector<2x8x1xf32> to vector<2x8x8xf32>
    %75 = arith.subf %71, %74 : vector<2x8x8xf32>
    %76 = math.exp %75 : vector<2x8x8xf32>
    %cst_24 = arith.constant dense<0.000000e+00> : vector<2x8xf32>
    %77 = vector.multi_reduction <add>, %76, %cst_24 [2] : vector<2x8x8xf32> to vector<2x8xf32>
    %78 = vector.shape_cast %77 : vector<2x8xf32> to vector<2x8x1xf32>
    "tpu.trace_start"() <{level = 10 : i32, message = "bqk,bkd->bqd"}> : () -> ()
    %cst_25 = arith.constant dense<0.000000e+00> : vector<2x8x8xf32>
    %79 = tpu.matmul %76, %68, %cst_25 {dimension_numbers = #tpu.dot_dimension_numbers<[2], [1], [1], [2], [0, 0, 0, 1, 1, 2], [0], [0]>} : vector<2x8x8xf32>, vector<2x8x8xf32>, vector<2x8x8xf32> -> vector<2x8x8xf32>
    "tpu.trace_stop"() : () -> ()
    %80 = vector.broadcast %78 : vector<2x8x1xf32> to vector<2x8x8xf32>
    %81 = arith.divf %79, %80 : vector<2x8x8xf32>
    %82 = tpu.concatenate %33, %49, %65, %81 in 2 : vector<2x8x8xf32>, vector<2x8x8xf32>, vector<2x8x8xf32>, vector<2x8x8xf32> -> vector<2x8x32xf32>
    %83 = vector.shape_cast %82 : vector<2x8x32xf32> to vector<16x32xf32>
    %c0_26 = arith.constant 0 : index
    %c0_27 = arith.constant 0 : index
    %84 = vector.load %arg3[%c0_26, %c0_27] : memref<32x32xf32, #tpu.memory_space<vmem>>, vector<32x32xf32>
    %cst_28 = arith.constant dense<0.000000e+00> : vector<16x32xf32>
    %85 = tpu.matmul %83, %84, %cst_28 {dimension_numbers = #tpu.dot_dimension_numbers<[1], [0], [0], [1], [0, 0, 1, 1], [], []>} : vector<16x32xf32>, vector<32x32xf32>, vector<16x32xf32> -> vector<16x32xf32>
    %86 = arith.addf %0, %85 : vector<16x32xf32>
    %87 = vector.extract_strided_slice %1 {offsets = [1, 0], sizes = [1, 32], strides = [1, 1]} : vector<10x128xf32> to vector<1x32xf32>
    %88 = vector.broadcast %87 : vector<1x32xf32> to vector<16x32xf32>
    %89 = arith.addf %86, %88 : vector<16x32xf32>
    %90 = vector.extract_strided_slice %1 {offsets = [2, 0], sizes = [1, 32], strides = [1, 1]} : vector<10x128xf32> to vector<1x32xf32>
    %91 = vector.extract_strided_slice %1 {offsets = [3, 0], sizes = [1, 32], strides = [1, 1]} : vector<10x128xf32> to vector<1x32xf32>
    %cst_29 = arith.constant dense<0.000000e+00> : vector<16xf32>
    %92 = vector.multi_reduction <add>, %89, %cst_29 [1] : vector<16x32xf32> to vector<16xf32>
    %93 = vector.shape_cast %92 : vector<16xf32> to vector<16x1xf32>
    %cst_30 = arith.constant 3.200000e+01 : f32
    %94 = vector.broadcast %cst_30 : f32 to vector<16x1xf32>
    %95 = arith.divf %93, %94 : vector<16x1xf32>
    %96 = vector.broadcast %95 : vector<16x1xf32> to vector<16x32xf32>
    %97 = arith.subf %89, %96 : vector<16x32xf32>
    %98 = arith.mulf %97, %97 : vector<16x32xf32>
    %cst_31 = arith.constant dense<0.000000e+00> : vector<16xf32>
    %99 = vector.multi_reduction <add>, %98, %cst_31 [1] : vector<16x32xf32> to vector<16xf32>
    %100 = vector.shape_cast %99 : vector<16xf32> to vector<16x1xf32>
    %cst_32 = arith.constant 3.200000e+01 : f32
    %101 = vector.broadcast %cst_32 : f32 to vector<16x1xf32>
    %102 = arith.divf %100, %101 : vector<16x1xf32>
    %103 = vector.broadcast %95 : vector<16x1xf32> to vector<16x32xf32>
    %104 = arith.subf %89, %103 : vector<16x32xf32>
    %cst_33 = arith.constant 9.99999974E-6 : f32
    %105 = vector.broadcast %cst_33 : f32 to vector<16x1xf32>
    %106 = arith.addf %102, %105 : vector<16x1xf32>
    %107 = math.rsqrt %106 : vector<16x1xf32>
    %108 = vector.broadcast %107 : vector<16x1xf32> to vector<16x32xf32>
    %109 = arith.mulf %104, %108 : vector<16x32xf32>
    %110 = vector.broadcast %90 : vector<1x32xf32> to vector<16x32xf32>
    %111 = arith.mulf %109, %110 : vector<16x32xf32>
    %112 = vector.broadcast %91 : vector<1x32xf32> to vector<16x32xf32>
    %113 = arith.addf %111, %112 : vector<16x32xf32>
    %c0_34 = arith.constant 0 : index
    %c0_35 = arith.constant 0 : index
    %114 = vector.load %arg4[%c0_34, %c0_35] : memref<32x64xf32, #tpu.memory_space<vmem>>, vector<32x64xf32>
    %cst_36 = arith.constant dense<0.000000e+00> : vector<16x64xf32>
    %115 = tpu.matmul %113, %114, %cst_36 {dimension_numbers = #tpu.dot_dimension_numbers<[1], [0], [0], [1], [0, 0, 1, 1], [], []>} : vector<16x32xf32>, vector<32x64xf32>, vector<16x64xf32> -> vector<16x64xf32>
    %116 = vector.extract_strided_slice %1 {offsets = [4, 0], sizes = [1, 64], strides = [1, 1]} : vector<10x128xf32> to vector<1x64xf32>
    %117 = vector.broadcast %116 : vector<1x64xf32> to vector<16x64xf32>
    %118 = arith.addf %115, %117 : vector<16x64xf32>
    %cst_37 = arith.constant 0.000000e+00 : f32
    %119 = vector.broadcast %cst_37 : f32 to vector<16x64xf32>
    %120 = arith.maximumf %118, %119 : vector<16x64xf32>
    %c0_38 = arith.constant 0 : index
    %c0_39 = arith.constant 0 : index
    %121 = vector.load %arg5[%c0_38, %c0_39] : memref<64x32xf32, #tpu.memory_space<vmem>>, vector<64x32xf32>
    %cst_40 = arith.constant dense<0.000000e+00> : vector<16x32xf32>
    %122 = tpu.matmul %120, %121, %cst_40 {dimension_numbers = #tpu.dot_dimension_numbers<[1], [0], [0], [1], [0, 0, 1, 1], [], []>} : vector<16x64xf32>, vector<64x32xf32>, vector<16x32xf32> -> vector<16x32xf32>
    %123 = arith.addf %113, %122 : vector<16x32xf32>
    %124 = vector.extract_strided_slice %1 {offsets = [5, 0], sizes = [1, 32], strides = [1, 1]} : vector<10x128xf32> to vector<1x32xf32>
    %125 = vector.broadcast %124 : vector<1x32xf32> to vector<16x32xf32>
    %126 = arith.addf %123, %125 : vector<16x32xf32>
    %127 = vector.extract_strided_slice %1 {offsets = [6, 0], sizes = [1, 32], strides = [1, 1]} : vector<10x128xf32> to vector<1x32xf32>
    %128 = vector.extract_strided_slice %1 {offsets = [7, 0], sizes = [1, 32], strides = [1, 1]} : vector<10x128xf32> to vector<1x32xf32>
    %cst_41 = arith.constant dense<0.000000e+00> : vector<16xf32>
    %129 = vector.multi_reduction <add>, %126, %cst_41 [1] : vector<16x32xf32> to vector<16xf32>
    %130 = vector.shape_cast %129 : vector<16xf32> to vector<16x1xf32>
    %cst_42 = arith.constant 3.200000e+01 : f32
    %131 = vector.broadcast %cst_42 : f32 to vector<16x1xf32>
    %132 = arith.divf %130, %131 : vector<16x1xf32>
    %133 = vector.broadcast %132 : vector<16x1xf32> to vector<16x32xf32>
    %134 = arith.subf %126, %133 : vector<16x32xf32>
    %135 = arith.mulf %134, %134 : vector<16x32xf32>
    %cst_43 = arith.constant dense<0.000000e+00> : vector<16xf32>
    %136 = vector.multi_reduction <add>, %135, %cst_43 [1] : vector<16x32xf32> to vector<16xf32>
    %137 = vector.shape_cast %136 : vector<16xf32> to vector<16x1xf32>
    %cst_44 = arith.constant 3.200000e+01 : f32
    %138 = vector.broadcast %cst_44 : f32 to vector<16x1xf32>
    %139 = arith.divf %137, %138 : vector<16x1xf32>
    %140 = vector.broadcast %132 : vector<16x1xf32> to vector<16x32xf32>
    %141 = arith.subf %126, %140 : vector<16x32xf32>
    %cst_45 = arith.constant 9.99999974E-6 : f32
    %142 = vector.broadcast %cst_45 : f32 to vector<16x1xf32>
    %143 = arith.addf %139, %142 : vector<16x1xf32>
    %144 = math.rsqrt %143 : vector<16x1xf32>
    %145 = vector.broadcast %144 : vector<16x1xf32> to vector<16x32xf32>
    %146 = arith.mulf %141, %145 : vector<16x32xf32>
    %147 = vector.broadcast %127 : vector<1x32xf32> to vector<16x32xf32>
    %148 = arith.mulf %146, %147 : vector<16x32xf32>
    %149 = vector.broadcast %128 : vector<1x32xf32> to vector<16x32xf32>
    %150 = arith.addf %148, %149 : vector<16x32xf32>
    %c0_46 = arith.constant 0 : index
    %c0_47 = arith.constant 0 : index
    %151 = vector.load %arg7[%c0_46, %c0_47] : memref<16x32xf32, #tpu.memory_space<vmem>>, vector<16x32xf32>
    tpu.vector_store %arg7[%c0_46, %c0_47], %150 {strides = array<i32>} : memref<16x32xf32, #tpu.memory_space<vmem>>, vector<16x32xf32>,
    return
  }
}

module attributes {stable_mosaic.version = 11 : i64} {
  func.func @_decoder_layer_kernel(%arg0: memref<16x32xf32, #tpu.memory_space<vmem>>, %arg1: memref<16x32xf32, #tpu.memory_space<vmem>>, %arg2: memref<32x96xf32, #tpu.memory_space<vmem>>, %arg3: memref<32x32xf32, #tpu.memory_space<vmem>>, %arg4: memref<32x32xf32, #tpu.memory_space<vmem>>, %arg5: memref<32x64xf32, #tpu.memory_space<vmem>>, %arg6: memref<32x32xf32, #tpu.memory_space<vmem>>, %arg7: memref<32x64xf32, #tpu.memory_space<vmem>>, %arg8: memref<64x32xf32, #tpu.memory_space<vmem>>, %arg9: memref<13x128xf32, #tpu.memory_space<vmem>>, %arg10: memref<16x32xf32, #tpu.memory_space<vmem>>) attributes {dimension_semantics = [], scalar_prefetch = 0 : i64, scratch_operands = 0 : i64, tpu.core_type = #tpu.core_type<tc>} {
    %c0 = arith.constant 0 : index
    %c0_0 = arith.constant 0 : index
    %0 = vector.load %arg0[%c0, %c0_0] : memref<16x32xf32, #tpu.memory_space<vmem>>, vector<16x32xf32>
    %c0_1 = arith.constant 0 : index
    %c0_2 = arith.constant 0 : index
    %1 = vector.load %arg1[%c0_1, %c0_2] : memref<16x32xf32, #tpu.memory_space<vmem>>, vector<16x32xf32>
    %c0_3 = arith.constant 0 : index
    %c0_4 = arith.constant 0 : index
    %2 = vector.load %arg9[%c0_3, %c0_4] : memref<13x128xf32, #tpu.memory_space<vmem>>, vector<13x128xf32>
    %c0_5 = arith.constant 0 : index
    %c0_6 = arith.constant 0 : index
    %3 = vector.load %arg2[%c0_5, %c0_6] : memref<32x96xf32, #tpu.memory_space<vmem>>, vector<32x96xf32>
    %cst = arith.constant dense<0.000000e+00> : vector<16x96xf32>
    %4 = tpu.matmul %0, %3, %cst {dimension_numbers = #tpu.dot_dimension_numbers<[1], [0], [0], [1], [0, 0, 1, 1], [], []>} : vector<16x32xf32>, vector<32x96xf32>, vector<16x96xf32> -> vector<16x96xf32>
    %5 = vector.extract_strided_slice %2 {offsets = [0, 0], sizes = [1, 96], strides = [1, 1]} : vector<13x128xf32> to vector<1x96xf32>
    %6 = vector.broadcast %5 : vector<1x96xf32> to vector<16x96xf32>
    %7 = arith.addf %4, %6 : vector<16x96xf32>
    %8 = vector.shape_cast %7 : vector<16x96xf32> to vector<2x8x96xf32>
    %9 = tpu.iota {dimensions = array<i32: 0>} : vector<8x8xi32>
    %10 = tpu.iota {dimensions = array<i32: 1>} : vector<8x8xi32>
    %11 = arith.cmpi sgt, %10, %9 : vector<8x8xi32>
    %cst_7 = arith.constant -1.000000e+30 : f32
    %cst_8 = arith.constant 0.000000e+00 : f32
    %12 = vector.broadcast %cst_7 : f32 to vector<8x8xf32>
    %13 = vector.broadcast %cst_8 : f32 to vector<8x8xf32>
    %14 = arith.select %11, %12, %13 : vector<8x8xi1>, vector<8x8xf32>
    %15 = vector.shape_cast %14 : vector<8x8xf32> to vector<1x8x8xf32>
    %16 = vector.extract_strided_slice %8 {offsets = [0, 0, 0], sizes = [2, 8, 32], strides = [1, 1, 1]} : vector<2x8x96xf32> to vector<2x8x32xf32>
    %17 = vector.extract_strided_slice %8 {offsets = [0, 0, 32], sizes = [2, 8, 32], strides = [1, 1, 1]} : vector<2x8x96xf32> to vector<2x8x32xf32>
    %18 = vector.extract_strided_slice %8 {offsets = [0, 0, 64], sizes = [2, 8, 32], strides = [1, 1, 1]} : vector<2x8x96xf32> to vector<2x8x32xf32>
    %19 = vector.extract_strided_slice %16 {offsets = [0, 0, 0], sizes = [2, 8, 8], strides = [1, 1, 1]} : vector<2x8x32xf32> to vector<2x8x8xf32>
    %20 = vector.extract_strided_slice %17 {offsets = [0, 0, 0], sizes = [2, 8, 8], strides = [1, 1, 1]} : vector<2x8x32xf32> to vector<2x8x8xf32>
    %21 = vector.extract_strided_slice %18 {offsets = [0, 0, 0], sizes = [2, 8, 8], strides = [1, 1, 1]} : vector<2x8x32xf32> to vector<2x8x8xf32>
    "tpu.trace_start"() <{level = 10 : i32, message = "bqd,bkd->bqk"}> : () -> ()
    %cst_9 = arith.constant dense<0.000000e+00> : vector<2x8x8xf32>
    %22 = tpu.matmul %19, %20, %cst_9 {dimension_numbers = #tpu.dot_dimension_numbers<[2], [2], [1], [1], [0, 0, 0, 1, 1, 1], [0], [0]>} : vector<2x8x8xf32>, vector<2x8x8xf32>, vector<2x8x8xf32> -> vector<2x8x8xf32>
    "tpu.trace_stop"() : () -> ()
    %23 = vector.broadcast %15 : vector<1x8x8xf32> to vector<2x8x8xf32>
    %24 = arith.addf %22, %23 : vector<2x8x8xf32>
    %cst_10 = arith.constant dense<0xFF800000> : vector<2x8xf32>
    %25 = vector.multi_reduction <maximumf>, %24, %cst_10 [2] : vector<2x8x8xf32> to vector<2x8xf32>
    %26 = vector.shape_cast %25 : vector<2x8xf32> to vector<2x8x1xf32>
    %27 = vector.broadcast %26 : vector<2x8x1xf32> to vector<2x8x8xf32>
    %28 = arith.subf %24, %27 : vector<2x8x8xf32>
    %29 = math.exp %28 : vector<2x8x8xf32>
    %cst_11 = arith.constant dense<0.000000e+00> : vector<2x8xf32>
    %30 = vector.multi_reduction <add>, %29, %cst_11 [2] : vector<2x8x8xf32> to vector<2x8xf32>
    %31 = vector.shape_cast %30 : vector<2x8xf32> to vector<2x8x1xf32>
    "tpu.trace_start"() <{level = 10 : i32, message = "bqk,bkd->bqd"}> : () -> ()
    %cst_12 = arith.constant dense<0.000000e+00> : vector<2x8x8xf32>
    %32 = tpu.matmul %29, %21, %cst_12 {dimension_numbers = #tpu.dot_dimension_numbers<[2], [1], [1], [2], [0, 0, 0, 1, 1, 2], [0], [0]>} : vector<2x8x8xf32>, vector<2x8x8xf32>, vector<2x8x8xf32> -> vector<2x8x8xf32>
    "tpu.trace_stop"() : () -> ()
    %33 = vector.broadcast %31 : vector<2x8x1xf32> to vector<2x8x8xf32>
    %34 = arith.divf %32, %33 : vector<2x8x8xf32>
    %35 = vector.extract_strided_slice %16 {offsets = [0, 0, 8], sizes = [2, 8, 8], strides = [1, 1, 1]} : vector<2x8x32xf32> to vector<2x8x8xf32>
    %36 = vector.extract_strided_slice %17 {offsets = [0, 0, 8], sizes = [2, 8, 8], strides = [1, 1, 1]} : vector<2x8x32xf32> to vector<2x8x8xf32>
    %37 = vector.extract_strided_slice %18 {offsets = [0, 0, 8], sizes = [2, 8, 8], strides = [1, 1, 1]} : vector<2x8x32xf32> to vector<2x8x8xf32>
    "tpu.trace_start"() <{level = 10 : i32, message = "bqd,bkd->bqk"}> : () -> ()
    %cst_13 = arith.constant dense<0.000000e+00> : vector<2x8x8xf32>
    %38 = tpu.matmul %35, %36, %cst_13 {dimension_numbers = #tpu.dot_dimension_numbers<[2], [2], [1], [1], [0, 0, 0, 1, 1, 1], [0], [0]>} : vector<2x8x8xf32>, vector<2x8x8xf32>, vector<2x8x8xf32> -> vector<2x8x8xf32>
    "tpu.trace_stop"() : () -> ()
    %39 = vector.broadcast %15 : vector<1x8x8xf32> to vector<2x8x8xf32>
    %40 = arith.addf %38, %39 : vector<2x8x8xf32>
    %cst_14 = arith.constant dense<0xFF800000> : vector<2x8xf32>
    %41 = vector.multi_reduction <maximumf>, %40, %cst_14 [2] : vector<2x8x8xf32> to vector<2x8xf32>
    %42 = vector.shape_cast %41 : vector<2x8xf32> to vector<2x8x1xf32>
    %43 = vector.broadcast %42 : vector<2x8x1xf32> to vector<2x8x8xf32>
    %44 = arith.subf %40, %43 : vector<2x8x8xf32>
    %45 = math.exp %44 : vector<2x8x8xf32>
    %cst_15 = arith.constant dense<0.000000e+00> : vector<2x8xf32>
    %46 = vector.multi_reduction <add>, %45, %cst_15 [2] : vector<2x8x8xf32> to vector<2x8xf32>
    %47 = vector.shape_cast %46 : vector<2x8xf32> to vector<2x8x1xf32>
    "tpu.trace_start"() <{level = 10 : i32, message = "bqk,bkd->bqd"}> : () -> ()
    %cst_16 = arith.constant dense<0.000000e+00> : vector<2x8x8xf32>
    %48 = tpu.matmul %45, %37, %cst_16 {dimension_numbers = #tpu.dot_dimension_numbers<[2], [1], [1], [2], [0, 0, 0, 1, 1, 2], [0], [0]>} : vector<2x8x8xf32>, vector<2x8x8xf32>, vector<2x8x8xf32> -> vector<2x8x8xf32>
    "tpu.trace_stop"() : () -> ()
    %49 = vector.broadcast %47 : vector<2x8x1xf32> to vector<2x8x8xf32>
    %50 = arith.divf %48, %49 : vector<2x8x8xf32>
    %51 = vector.extract_strided_slice %16 {offsets = [0, 0, 16], sizes = [2, 8, 8], strides = [1, 1, 1]} : vector<2x8x32xf32> to vector<2x8x8xf32>
    %52 = vector.extract_strided_slice %17 {offsets = [0, 0, 16], sizes = [2, 8, 8], strides = [1, 1, 1]} : vector<2x8x32xf32> to vector<2x8x8xf32>
    %53 = vector.extract_strided_slice %18 {offsets = [0, 0, 16], sizes = [2, 8, 8], strides = [1, 1, 1]} : vector<2x8x32xf32> to vector<2x8x8xf32>
    "tpu.trace_start"() <{level = 10 : i32, message = "bqd,bkd->bqk"}> : () -> ()
    %cst_17 = arith.constant dense<0.000000e+00> : vector<2x8x8xf32>
    %54 = tpu.matmul %51, %52, %cst_17 {dimension_numbers = #tpu.dot_dimension_numbers<[2], [2], [1], [1], [0, 0, 0, 1, 1, 1], [0], [0]>} : vector<2x8x8xf32>, vector<2x8x8xf32>, vector<2x8x8xf32> -> vector<2x8x8xf32>
    "tpu.trace_stop"() : () -> ()
    %55 = vector.broadcast %15 : vector<1x8x8xf32> to vector<2x8x8xf32>
    %56 = arith.addf %54, %55 : vector<2x8x8xf32>
    %cst_18 = arith.constant dense<0xFF800000> : vector<2x8xf32>
    %57 = vector.multi_reduction <maximumf>, %56, %cst_18 [2] : vector<2x8x8xf32> to vector<2x8xf32>
    %58 = vector.shape_cast %57 : vector<2x8xf32> to vector<2x8x1xf32>
    %59 = vector.broadcast %58 : vector<2x8x1xf32> to vector<2x8x8xf32>
    %60 = arith.subf %56, %59 : vector<2x8x8xf32>
    %61 = math.exp %60 : vector<2x8x8xf32>
    %cst_19 = arith.constant dense<0.000000e+00> : vector<2x8xf32>
    %62 = vector.multi_reduction <add>, %61, %cst_19 [2] : vector<2x8x8xf32> to vector<2x8xf32>
    %63 = vector.shape_cast %62 : vector<2x8xf32> to vector<2x8x1xf32>
    "tpu.trace_start"() <{level = 10 : i32, message = "bqk,bkd->bqd"}> : () -> ()
    %cst_20 = arith.constant dense<0.000000e+00> : vector<2x8x8xf32>
    %64 = tpu.matmul %61, %53, %cst_20 {dimension_numbers = #tpu.dot_dimension_numbers<[2], [1], [1], [2], [0, 0, 0, 1, 1, 2], [0], [0]>} : vector<2x8x8xf32>, vector<2x8x8xf32>, vector<2x8x8xf32> -> vector<2x8x8xf32>
    "tpu.trace_stop"() : () -> ()
    %65 = vector.broadcast %63 : vector<2x8x1xf32> to vector<2x8x8xf32>
    %66 = arith.divf %64, %65 : vector<2x8x8xf32>
    %67 = vector.extract_strided_slice %16 {offsets = [0, 0, 24], sizes = [2, 8, 8], strides = [1, 1, 1]} : vector<2x8x32xf32> to vector<2x8x8xf32>
    %68 = vector.extract_strided_slice %17 {offsets = [0, 0, 24], sizes = [2, 8, 8], strides = [1, 1, 1]} : vector<2x8x32xf32> to vector<2x8x8xf32>
    %69 = vector.extract_strided_slice %18 {offsets = [0, 0, 24], sizes = [2, 8, 8], strides = [1, 1, 1]} : vector<2x8x32xf32> to vector<2x8x8xf32>
    "tpu.trace_start"() <{level = 10 : i32, message = "bqd,bkd->bqk"}> : () -> ()
    %cst_21 = arith.constant dense<0.000000e+00> : vector<2x8x8xf32>
    %70 = tpu.matmul %67, %68, %cst_21 {dimension_numbers = #tpu.dot_dimension_numbers<[2], [2], [1], [1], [0, 0, 0, 1, 1, 1], [0], [0]>} : vector<2x8x8xf32>, vector<2x8x8xf32>, vector<2x8x8xf32> -> vector<2x8x8xf32>
    "tpu.trace_stop"() : () -> ()
    %71 = vector.broadcast %15 : vector<1x8x8xf32> to vector<2x8x8xf32>
    %72 = arith.addf %70, %71 : vector<2x8x8xf32>
    %cst_22 = arith.constant dense<0xFF800000> : vector<2x8xf32>
    %73 = vector.multi_reduction <maximumf>, %72, %cst_22 [2] : vector<2x8x8xf32> to vector<2x8xf32>
    %74 = vector.shape_cast %73 : vector<2x8xf32> to vector<2x8x1xf32>
    %75 = vector.broadcast %74 : vector<2x8x1xf32> to vector<2x8x8xf32>
    %76 = arith.subf %72, %75 : vector<2x8x8xf32>
    %77 = math.exp %76 : vector<2x8x8xf32>
    %cst_23 = arith.constant dense<0.000000e+00> : vector<2x8xf32>
    %78 = vector.multi_reduction <add>, %77, %cst_23 [2] : vector<2x8x8xf32> to vector<2x8xf32>
    %79 = vector.shape_cast %78 : vector<2x8xf32> to vector<2x8x1xf32>
    "tpu.trace_start"() <{level = 10 : i32, message = "bqk,bkd->bqd"}> : () -> ()
    %cst_24 = arith.constant dense<0.000000e+00> : vector<2x8x8xf32>
    %80 = tpu.matmul %77, %69, %cst_24 {dimension_numbers = #tpu.dot_dimension_numbers<[2], [1], [1], [2], [0, 0, 0, 1, 1, 2], [0], [0]>} : vector<2x8x8xf32>, vector<2x8x8xf32>, vector<2x8x8xf32> -> vector<2x8x8xf32>
    "tpu.trace_stop"() : () -> ()
    %81 = vector.broadcast %79 : vector<2x8x1xf32> to vector<2x8x8xf32>
    %82 = arith.divf %80, %81 : vector<2x8x8xf32>
    %83 = tpu.concatenate %34, %50, %66, %82 in 2 : vector<2x8x8xf32>, vector<2x8x8xf32>, vector<2x8x8xf32>, vector<2x8x8xf32> -> vector<2x8x32xf32>
    %84 = vector.shape_cast %83 : vector<2x8x32xf32> to vector<16x32xf32>
    %c0_25 = arith.constant 0 : index
    %c0_26 = arith.constant 0 : index
    %85 = vector.load %arg3[%c0_25, %c0_26] : memref<32x32xf32, #tpu.memory_space<vmem>>, vector<32x32xf32>
    %cst_27 = arith.constant dense<0.000000e+00> : vector<16x32xf32>
    %86 = tpu.matmul %84, %85, %cst_27 {dimension_numbers = #tpu.dot_dimension_numbers<[1], [0], [0], [1], [0, 0, 1, 1], [], []>} : vector<16x32xf32>, vector<32x32xf32>, vector<16x32xf32> -> vector<16x32xf32>
    %87 = arith.addf %0, %86 : vector<16x32xf32>
    %88 = vector.extract_strided_slice %2 {offsets = [1, 0], sizes = [1, 32], strides = [1, 1]} : vector<13x128xf32> to vector<1x32xf32>
    %89 = vector.broadcast %88 : vector<1x32xf32> to vector<16x32xf32>
    %90 = arith.addf %87, %89 : vector<16x32xf32>
    %91 = vector.extract_strided_slice %2 {offsets = [2, 0], sizes = [1, 32], strides = [1, 1]} : vector<13x128xf32> to vector<1x32xf32>
    %92 = vector.extract_strided_slice %2 {offsets = [3, 0], sizes = [1, 32], strides = [1, 1]} : vector<13x128xf32> to vector<1x32xf32>
    %cst_28 = arith.constant dense<0.000000e+00> : vector<16xf32>
    %93 = vector.multi_reduction <add>, %90, %cst_28 [1] : vector<16x32xf32> to vector<16xf32>
    %94 = vector.shape_cast %93 : vector<16xf32> to vector<16x1xf32>
    %cst_29 = arith.constant 3.200000e+01 : f32
    %95 = vector.broadcast %cst_29 : f32 to vector<16x1xf32>
    %96 = arith.divf %94, %95 : vector<16x1xf32>
    %97 = vector.broadcast %96 : vector<16x1xf32> to vector<16x32xf32>
    %98 = arith.subf %90, %97 : vector<16x32xf32>
    %99 = arith.mulf %98, %98 : vector<16x32xf32>
    %cst_30 = arith.constant dense<0.000000e+00> : vector<16xf32>
    %100 = vector.multi_reduction <add>, %99, %cst_30 [1] : vector<16x32xf32> to vector<16xf32>
    %101 = vector.shape_cast %100 : vector<16xf32> to vector<16x1xf32>
    %cst_31 = arith.constant 3.200000e+01 : f32
    %102 = vector.broadcast %cst_31 : f32 to vector<16x1xf32>
    %103 = arith.divf %101, %102 : vector<16x1xf32>
    %104 = vector.broadcast %96 : vector<16x1xf32> to vector<16x32xf32>
    %105 = arith.subf %90, %104 : vector<16x32xf32>
    %cst_32 = arith.constant 9.99999974E-6 : f32
    %106 = vector.broadcast %cst_32 : f32 to vector<16x1xf32>
    %107 = arith.addf %103, %106 : vector<16x1xf32>
    %108 = math.rsqrt %107 : vector<16x1xf32>
    %109 = vector.broadcast %108 : vector<16x1xf32> to vector<16x32xf32>
    %110 = arith.mulf %105, %109 : vector<16x32xf32>
    %111 = vector.broadcast %91 : vector<1x32xf32> to vector<16x32xf32>
    %112 = arith.mulf %110, %111 : vector<16x32xf32>
    %113 = vector.broadcast %92 : vector<1x32xf32> to vector<16x32xf32>
    %114 = arith.addf %112, %113 : vector<16x32xf32>
    %c0_33 = arith.constant 0 : index
    %c0_34 = arith.constant 0 : index
    %115 = vector.load %arg4[%c0_33, %c0_34] : memref<32x32xf32, #tpu.memory_space<vmem>>, vector<32x32xf32>
    %cst_35 = arith.constant dense<0.000000e+00> : vector<16x32xf32>
    %116 = tpu.matmul %114, %115, %cst_35 {dimension_numbers = #tpu.dot_dimension_numbers<[1], [0], [0], [1], [0, 0, 1, 1], [], []>} : vector<16x32xf32>, vector<32x32xf32>, vector<16x32xf32> -> vector<16x32xf32>
    %117 = vector.extract_strided_slice %2 {offsets = [4, 0], sizes = [1, 32], strides = [1, 1]} : vector<13x128xf32> to vector<1x32xf32>
    %118 = vector.broadcast %117 : vector<1x32xf32> to vector<16x32xf32>
    %119 = arith.addf %116, %118 : vector<16x32xf32>
    %120 = vector.shape_cast %119 : vector<16x32xf32> to vector<2x8x32xf32>
    %c0_36 = arith.constant 0 : index
    %c0_37 = arith.constant 0 : index
    %121 = vector.load %arg5[%c0_36, %c0_37] : memref<32x64xf32, #tpu.memory_space<vmem>>, vector<32x64xf32>
    %cst_38 = arith.constant dense<0.000000e+00> : vector<16x64xf32>
    %122 = tpu.matmul %1, %121, %cst_38 {dimension_numbers = #tpu.dot_dimension_numbers<[1], [0], [0], [1], [0, 0, 1, 1], [], []>} : vector<16x32xf32>, vector<32x64xf32>, vector<16x64xf32> -> vector<16x64xf32>
    %123 = vector.extract_strided_slice %2 {offsets = [5, 0], sizes = [1, 64], strides = [1, 1]} : vector<13x128xf32> to vector<1x64xf32>
    %124 = vector.broadcast %123 : vector<1x64xf32> to vector<16x64xf32>
    %125 = arith.addf %122, %124 : vector<16x64xf32>
    %126 = vector.shape_cast %125 : vector<16x64xf32> to vector<2x8x64xf32>
    %127 = vector.extract_strided_slice %126 {offsets = [0, 0, 0], sizes = [2, 8, 32], strides = [1, 1, 1]} : vector<2x8x64xf32> to vector<2x8x32xf32>
    %128 = vector.extract_strided_slice %126 {offsets = [0, 0, 32], sizes = [2, 8, 32], strides = [1, 1, 1]} : vector<2x8x64xf32> to vector<2x8x32xf32>
    %129 = vector.extract_strided_slice %120 {offsets = [0, 0, 0], sizes = [2, 8, 8], strides = [1, 1, 1]} : vector<2x8x32xf32> to vector<2x8x8xf32>
    %130 = vector.extract_strided_slice %127 {offsets = [0, 0, 0], sizes = [2, 8, 8], strides = [1, 1, 1]} : vector<2x8x32xf32> to vector<2x8x8xf32>
    %131 = vector.extract_strided_slice %128 {offsets = [0, 0, 0], sizes = [2, 8, 8], strides = [1, 1, 1]} : vector<2x8x32xf32> to vector<2x8x8xf32>
    "tpu.trace_start"() <{level = 10 : i32, message = "bqd,bkd->bqk"}> : () -> ()
    %cst_39 = arith.constant dense<0.000000e+00> : vector<2x8x8xf32>
    %132 = tpu.matmul %129, %130, %cst_39 {dimension_numbers = #tpu.dot_dimension_numbers<[2], [2], [1], [1], [0, 0, 0, 1, 1, 1], [0], [0]>} : vector<2x8x8xf32>, vector<2x8x8xf32>, vector<2x8x8xf32> -> vector<2x8x8xf32>
    "tpu.trace_stop"() : () -> ()
    %cst_40 = arith.constant dense<0xFF800000> : vector<2x8xf32>
    %133 = vector.multi_reduction <maximumf>, %132, %cst_40 [2] : vector<2x8x8xf32> to vector<2x8xf32>
    %134 = vector.shape_cast %133 : vector<2x8xf32> to vector<2x8x1xf32>
    %135 = vector.broadcast %134 : vector<2x8x1xf32> to vector<2x8x8xf32>
    %136 = arith.subf %132, %135 : vector<2x8x8xf32>
    %137 = math.exp %136 : vector<2x8x8xf32>
    %cst_41 = arith.constant dense<0.000000e+00> : vector<2x8xf32>
    %138 = vector.multi_reduction <add>, %137, %cst_41 [2] : vector<2x8x8xf32> to vector<2x8xf32>
    %139 = vector.shape_cast %138 : vector<2x8xf32> to vector<2x8x1xf32>
    "tpu.trace_start"() <{level = 10 : i32, message = "bqk,bkd->bqd"}> : () -> ()
    %cst_42 = arith.constant dense<0.000000e+00> : vector<2x8x8xf32>
    %140 = tpu.matmul %137, %131, %cst_42 {dimension_numbers = #tpu.dot_dimension_numbers<[2], [1], [1], [2], [0, 0, 0, 1, 1, 2], [0], [0]>} : vector<2x8x8xf32>, vector<2x8x8xf32>, vector<2x8x8xf32> -> vector<2x8x8xf32>
    "tpu.trace_stop"() : () -> ()
    %141 = vector.broadcast %139 : vector<2x8x1xf32> to vector<2x8x8xf32>
    %142 = arith.divf %140, %141 : vector<2x8x8xf32>
    %143 = vector.extract_strided_slice %120 {offsets = [0, 0, 8], sizes = [2, 8, 8], strides = [1, 1, 1]} : vector<2x8x32xf32> to vector<2x8x8xf32>
    %144 = vector.extract_strided_slice %127 {offsets = [0, 0, 8], sizes = [2, 8, 8], strides = [1, 1, 1]} : vector<2x8x32xf32> to vector<2x8x8xf32>
    %145 = vector.extract_strided_slice %128 {offsets = [0, 0, 8], sizes = [2, 8, 8], strides = [1, 1, 1]} : vector<2x8x32xf32> to vector<2x8x8xf32>
    "tpu.trace_start"() <{level = 10 : i32, message = "bqd,bkd->bqk"}> : () -> ()
    %cst_43 = arith.constant dense<0.000000e+00> : vector<2x8x8xf32>
    %146 = tpu.matmul %143, %144, %cst_43 {dimension_numbers = #tpu.dot_dimension_numbers<[2], [2], [1], [1], [0, 0, 0, 1, 1, 1], [0], [0]>} : vector<2x8x8xf32>, vector<2x8x8xf32>, vector<2x8x8xf32> -> vector<2x8x8xf32>
    "tpu.trace_stop"() : () -> ()
    %cst_44 = arith.constant dense<0xFF800000> : vector<2x8xf32>
    %147 = vector.multi_reduction <maximumf>, %146, %cst_44 [2] : vector<2x8x8xf32> to vector<2x8xf32>
    %148 = vector.shape_cast %147 : vector<2x8xf32> to vector<2x8x1xf32>
    %149 = vector.broadcast %148 : vector<2x8x1xf32> to vector<2x8x8xf32>
    %150 = arith.subf %146, %149 : vector<2x8x8xf32>
    %151 = math.exp %150 : vector<2x8x8xf32>
    %cst_45 = arith.constant dense<0.000000e+00> : vector<2x8xf32>
    %152 = vector.multi_reduction <add>, %151, %cst_45 [2] : vector<2x8x8xf32> to vector<2x8xf32>
    %153 = vector.shape_cast %152 : vector<2x8xf32> to vector<2x8x1xf32>
    "tpu.trace_start"() <{level = 10 : i32, message = "bqk,bkd->bqd"}> : () -> ()
    %cst_46 = arith.constant dense<0.000000e+00> : vector<2x8x8xf32>
    %154 = tpu.matmul %151, %145, %cst_46 {dimension_numbers = #tpu.dot_dimension_numbers<[2], [1], [1], [2], [0, 0, 0, 1, 1, 2], [0], [0]>} : vector<2x8x8xf32>, vector<2x8x8xf32>, vector<2x8x8xf32> -> vector<2x8x8xf32>
    "tpu.trace_stop"() : () -> ()
    %155 = vector.broadcast %153 : vector<2x8x1xf32> to vector<2x8x8xf32>
    %156 = arith.divf %154, %155 : vector<2x8x8xf32>
    %157 = vector.extract_strided_slice %120 {offsets = [0, 0, 16], sizes = [2, 8, 8], strides = [1, 1, 1]} : vector<2x8x32xf32> to vector<2x8x8xf32>
    %158 = vector.extract_strided_slice %127 {offsets = [0, 0, 16], sizes = [2, 8, 8], strides = [1, 1, 1]} : vector<2x8x32xf32> to vector<2x8x8xf32>
    %159 = vector.extract_strided_slice %128 {offsets = [0, 0, 16], sizes = [2, 8, 8], strides = [1, 1, 1]} : vector<2x8x32xf32> to vector<2x8x8xf32>
    "tpu.trace_start"() <{level = 10 : i32, message = "bqd,bkd->bqk"}> : () -> ()
    %cst_47 = arith.constant dense<0.000000e+00> : vector<2x8x8xf32>
    %160 = tpu.matmul %157, %158, %cst_47 {dimension_numbers = #tpu.dot_dimension_numbers<[2], [2], [1], [1], [0, 0, 0, 1, 1, 1], [0], [0]>} : vector<2x8x8xf32>, vector<2x8x8xf32>, vector<2x8x8xf32> -> vector<2x8x8xf32>
    "tpu.trace_stop"() : () -> ()
    %cst_48 = arith.constant dense<0xFF800000> : vector<2x8xf32>
    %161 = vector.multi_reduction <maximumf>, %160, %cst_48 [2] : vector<2x8x8xf32> to vector<2x8xf32>
    %162 = vector.shape_cast %161 : vector<2x8xf32> to vector<2x8x1xf32>
    %163 = vector.broadcast %162 : vector<2x8x1xf32> to vector<2x8x8xf32>
    %164 = arith.subf %160, %163 : vector<2x8x8xf32>
    %165 = math.exp %164 : vector<2x8x8xf32>
    %cst_49 = arith.constant dense<0.000000e+00> : vector<2x8xf32>
    %166 = vector.multi_reduction <add>, %165, %cst_49 [2] : vector<2x8x8xf32> to vector<2x8xf32>
    %167 = vector.shape_cast %166 : vector<2x8xf32> to vector<2x8x1xf32>
    "tpu.trace_start"() <{level = 10 : i32, message = "bqk,bkd->bqd"}> : () -> ()
    %cst_50 = arith.constant dense<0.000000e+00> : vector<2x8x8xf32>
    %168 = tpu.matmul %165, %159, %cst_50 {dimension_numbers = #tpu.dot_dimension_numbers<[2], [1], [1], [2], [0, 0, 0, 1, 1, 2], [0], [0]>} : vector<2x8x8xf32>, vector<2x8x8xf32>, vector<2x8x8xf32> -> vector<2x8x8xf32>
    "tpu.trace_stop"() : () -> ()
    %169 = vector.broadcast %167 : vector<2x8x1xf32> to vector<2x8x8xf32>
    %170 = arith.divf %168, %169 : vector<2x8x8xf32>
    %171 = vector.extract_strided_slice %120 {offsets = [0, 0, 24], sizes = [2, 8, 8], strides = [1, 1, 1]} : vector<2x8x32xf32> to vector<2x8x8xf32>
    %172 = vector.extract_strided_slice %127 {offsets = [0, 0, 24], sizes = [2, 8, 8], strides = [1, 1, 1]} : vector<2x8x32xf32> to vector<2x8x8xf32>
    %173 = vector.extract_strided_slice %128 {offsets = [0, 0, 24], sizes = [2, 8, 8], strides = [1, 1, 1]} : vector<2x8x32xf32> to vector<2x8x8xf32>
    "tpu.trace_start"() <{level = 10 : i32, message = "bqd,bkd->bqk"}> : () -> ()
    %cst_51 = arith.constant dense<0.000000e+00> : vector<2x8x8xf32>
    %174 = tpu.matmul %171, %172, %cst_51 {dimension_numbers = #tpu.dot_dimension_numbers<[2], [2], [1], [1], [0, 0, 0, 1, 1, 1], [0], [0]>} : vector<2x8x8xf32>, vector<2x8x8xf32>, vector<2x8x8xf32> -> vector<2x8x8xf32>
    "tpu.trace_stop"() : () -> ()
    %cst_52 = arith.constant dense<0xFF800000> : vector<2x8xf32>
    %175 = vector.multi_reduction <maximumf>, %174, %cst_52 [2] : vector<2x8x8xf32> to vector<2x8xf32>
    %176 = vector.shape_cast %175 : vector<2x8xf32> to vector<2x8x1xf32>
    %177 = vector.broadcast %176 : vector<2x8x1xf32> to vector<2x8x8xf32>
    %178 = arith.subf %174, %177 : vector<2x8x8xf32>
    %179 = math.exp %178 : vector<2x8x8xf32>
    %cst_53 = arith.constant dense<0.000000e+00> : vector<2x8xf32>
    %180 = vector.multi_reduction <add>, %179, %cst_53 [2] : vector<2x8x8xf32> to vector<2x8xf32>
    %181 = vector.shape_cast %180 : vector<2x8xf32> to vector<2x8x1xf32>
    "tpu.trace_start"() <{level = 10 : i32, message = "bqk,bkd->bqd"}> : () -> ()
    %cst_54 = arith.constant dense<0.000000e+00> : vector<2x8x8xf32>
    %182 = tpu.matmul %179, %173, %cst_54 {dimension_numbers = #tpu.dot_dimension_numbers<[2], [1], [1], [2], [0, 0, 0, 1, 1, 2], [0], [0]>} : vector<2x8x8xf32>, vector<2x8x8xf32>, vector<2x8x8xf32> -> vector<2x8x8xf32>
    "tpu.trace_stop"() : () -> ()
    %183 = vector.broadcast %181 : vector<2x8x1xf32> to vector<2x8x8xf32>
    %184 = arith.divf %182, %183 : vector<2x8x8xf32>
    %185 = tpu.concatenate %142, %156, %170, %184 in 2 : vector<2x8x8xf32>, vector<2x8x8xf32>, vector<2x8x8xf32>, vector<2x8x8xf32> -> vector<2x8x32xf32>
    %186 = vector.shape_cast %185 : vector<2x8x32xf32> to vector<16x32xf32>
    %c0_55 = arith.constant 0 : index
    %c0_56 = arith.constant 0 : index
    %187 = vector.load %arg6[%c0_55, %c0_56] : memref<32x32xf32, #tpu.memory_space<vmem>>, vector<32x32xf32>
    %cst_57 = arith.constant dense<0.000000e+00> : vector<16x32xf32>
    %188 = tpu.matmul %186, %187, %cst_57 {dimension_numbers = #tpu.dot_dimension_numbers<[1], [0], [0], [1], [0, 0, 1, 1], [], []>} : vector<16x32xf32>, vector<32x32xf32>, vector<16x32xf32> -> vector<16x32xf32>
    %189 = arith.addf %114, %188 : vector<16x32xf32>
    %190 = vector.extract_strided_slice %2 {offsets = [6, 0], sizes = [1, 32], strides = [1, 1]} : vector<13x128xf32> to vector<1x32xf32>
    %191 = vector.broadcast %190 : vector<1x32xf32> to vector<16x32xf32>
    %192 = arith.addf %189, %191 : vector<16x32xf32>
    %193 = vector.extract_strided_slice %2 {offsets = [7, 0], sizes = [1, 32], strides = [1, 1]} : vector<13x128xf32> to vector<1x32xf32>
    %194 = vector.extract_strided_slice %2 {offsets = [8, 0], sizes = [1, 32], strides = [1, 1]} : vector<13x128xf32> to vector<1x32xf32>
    %cst_58 = arith.constant dense<0.000000e+00> : vector<16xf32>
    %195 = vector.multi_reduction <add>, %192, %cst_58 [1] : vector<16x32xf32> to vector<16xf32>
    %196 = vector.shape_cast %195 : vector<16xf32> to vector<16x1xf32>
    %cst_59 = arith.constant 3.200000e+01 : f32
    %197 = vector.broadcast %cst_59 : f32 to vector<16x1xf32>
    %198 = arith.divf %196, %197 : vector<16x1xf32>
    %199 = vector.broadcast %198 : vector<16x1xf32> to vector<16x32xf32>
    %200 = arith.subf %192, %199 : vector<16x32xf32>
    %201 = arith.mulf %200, %200 : vector<16x32xf32>
    %cst_60 = arith.constant dense<0.000000e+00> : vector<16xf32>
    %202 = vector.multi_reduction <add>, %201, %cst_60 [1] : vector<16x32xf32> to vector<16xf32>
    %203 = vector.shape_cast %202 : vector<16xf32> to vector<16x1xf32>
    %cst_61 = arith.constant 3.200000e+01 : f32
    %204 = vector.broadcast %cst_61 : f32 to vector<16x1xf32>
    %205 = arith.divf %203, %204 : vector<16x1xf32>
    %206 = vector.broadcast %198 : vector<16x1xf32> to vector<16x32xf32>
    %207 = arith.subf %192, %206 : vector<16x32xf32>
    %cst_62 = arith.constant 9.99999974E-6 : f32
    %208 = vector.broadcast %cst_62 : f32 to vector<16x1xf32>
    %209 = arith.addf %205, %208 : vector<16x1xf32>
    %210 = math.rsqrt %209 : vector<16x1xf32>
    %211 = vector.broadcast %210 : vector<16x1xf32> to vector<16x32xf32>
    %212 = arith.mulf %207, %211 : vector<16x32xf32>
    %213 = vector.broadcast %193 : vector<1x32xf32> to vector<16x32xf32>
    %214 = arith.mulf %212, %213 : vector<16x32xf32>
    %215 = vector.broadcast %194 : vector<1x32xf32> to vector<16x32xf32>
    %216 = arith.addf %214, %215 : vector<16x32xf32>
    %c0_63 = arith.constant 0 : index
    %c0_64 = arith.constant 0 : index
    %217 = vector.load %arg7[%c0_63, %c0_64] : memref<32x64xf32, #tpu.memory_space<vmem>>, vector<32x64xf32>
    %cst_65 = arith.constant dense<0.000000e+00> : vector<16x64xf32>
    %218 = tpu.matmul %216, %217, %cst_65 {dimension_numbers = #tpu.dot_dimension_numbers<[1], [0], [0], [1], [0, 0, 1, 1], [], []>} : vector<16x32xf32>, vector<32x64xf32>, vector<16x64xf32> -> vector<16x64xf32>
    %219 = vector.extract_strided_slice %2 {offsets = [9, 0], sizes = [1, 64], strides = [1, 1]} : vector<13x128xf32> to vector<1x64xf32>
    %220 = vector.broadcast %219 : vector<1x64xf32> to vector<16x64xf32>
    %221 = arith.addf %218, %220 : vector<16x64xf32>
    %cst_66 = arith.constant 0.000000e+00 : f32
    %222 = vector.broadcast %cst_66 : f32 to vector<16x64xf32>
    %223 = arith.maximumf %221, %222 : vector<16x64xf32>
    %c0_67 = arith.constant 0 : index
    %c0_68 = arith.constant 0 : index
    %224 = vector.load %arg8[%c0_67, %c0_68] : memref<64x32xf32, #tpu.memory_space<vmem>>, vector<64x32xf32>
    %cst_69 = arith.constant dense<0.000000e+00> : vector<16x32xf32>
    %225 = tpu.matmul %223, %224, %cst_69 {dimension_numbers = #tpu.dot_dimension_numbers<[1], [0], [0], [1], [0, 0, 1, 1], [], []>} : vector<16x64xf32>, vector<64x32xf32>, vector<16x32xf32> -> vector<16x32xf32>
    %226 = arith.addf %216, %225 : vector<16x32xf32>
    %227 = vector.extract_strided_slice %2 {offsets = [10, 0], sizes = [1, 32], strides = [1, 1]} : vector<13x128xf32> to vector<1x32xf32>
    %228 = vector.broadcast %227 : vector<1x32xf32> to vector<16x32xf32>
    %229 = arith.addf %226, %228 : vector<16x32xf32>
    %230 = vector.extract_strided_slice %2 {offsets = [11, 0], sizes = [1, 32], strides = [1, 1]} : vector<13x128xf32> to vector<1x32xf32>
    %231 = vector.extract_strided_slice %2 {offsets = [12, 0], sizes = [1, 32], strides = [1, 1]} : vector<13x128xf32> to vector<1x32xf32>
    %cst_70 = arith.constant dense<0.000000e+00> : vector<16xf32>
    %232 = vector.multi_reduction <add>, %229, %cst_70 [1] : vector<16x32xf32> to vector<16xf32>
    %233 = vector.shape_cast %232 : vector<16xf32> to vector<16x1xf32>
    %cst_71 = arith.constant 3.200000e+01 : f32
    %234 = vector.broadcast %cst_71 : f32 to vector<16x1xf32>
    %235 = arith.divf %233, %234 : vector<16x1xf32>
    %236 = vector.broadcast %235 : vector<16x1xf32> to vector<16x32xf32>
    %237 = arith.subf %229, %236 : vector<16x32xf32>
    %238 = arith.mulf %237, %237 : vector<16x32xf32>
    %cst_72 = arith.constant dense<0.000000e+00> : vector<16xf32>
    %239 = vector.multi_reduction <add>, %238, %cst_72 [1] : vector<16x32xf32> to vector<16xf32>
    %240 = vector.shape_cast %239 : vector<16xf32> to vector<16x1xf32>
    %cst_73 = arith.constant 3.200000e+01 : f32
    %241 = vector.broadcast %cst_73 : f32 to vector<16x1xf32>
    %242 = arith.divf %240, %241 : vector<16x1xf32>
    %243 = vector.broadcast %235 : vector<16x1xf32> to vector<16x32xf32>
    %244 = arith.subf %229, %243 : vector<16x32xf32>
    %cst_74 = arith.constant 9.99999974E-6 : f32
    %245 = vector.broadcast %cst_74 : f32 to vector<16x1xf32>
    %246 = arith.addf %242, %245 : vector<16x1xf32>
    %247 = math.rsqrt %246 : vector<16x1xf32>
    %248 = vector.broadcast %247 : vector<16x1xf32> to vector<16x32xf32>
    %249 = arith.mulf %244, %248 : vector<16x32xf32>
    %250 = vector.broadcast %230 : vector<1x32xf32> to vector<16x32xf32>
    %251 = arith.mulf %249, %250 : vector<16x32xf32>
    %252 = vector.broadcast %231 : vector<1x32xf32> to vector<16x32xf32>
    %253 = arith.addf %251, %252 : vector<16x32xf32>
    %c0_75 = arith.constant 0 : index
    %c0_76 = arith.constant 0 : index
    %254 = vector.load %arg10[%c0_75, %c0_76] : memref<16x32xf32, #tpu.memory_space<vmem>>, vector<16x32xf32>
    tpu.vector_store %arg10[%c0_75, %c0_76], %253 {strides = array<i32>} : memref<16x32xf32, #tpu.memory_space<vmem>>, vector<16x32xf32>,
    return
  }
}

</mosaic_0001>

<bundles_post_ra>
// kernel: transformer_seq2seq.9
= control target key start
LH: loop header
LB: loop body
LE: loop exit
PB: predicated region body
PF: predicated region fallthrough
CT: control target
= control target key end

     0   :  { %vm24_vm0 = vcmask 261120   ;;  %s269_s0 = inlined_call_operand.vmem [shape: f32[16,32], index: 0, kind: input, shape index: {}]   ;;  %s270_s3 = inlined_call_operand.vmem [shape: f32[32,128], index: 3, kind: input, shape index: {}]   ;;  %s271_s1 = inlined_call_operand.vmem [shape: f32[1,32], index: 1, kind: input, shape index: {}]   ;;  %s272_s2 = inlined_call_operand.vmem [shape: f32[1,32], index: 2, kind: input, shape index: {}]   ;;  %s273_s4 = inlined_call_operand.vmem [shape: f32[1,128], index: 4, kind: input, shape index: {}]   ;;  %s274_s5 = inlined_call_operand.vmem [shape: f32[16,128], index: 5, kind: output, shape index: {}]  }
   0x1   :  { %v20_v0 = vld [vmem:[%s269_s0] sm:$0xff]  ;;  %v21_v1 = vld [vmem:[%s269_s0 + $0x8] sm:$0xff]  ;;  %v70_v16 = vld [vmem:[%s270_s3 + $0x10] sm:$0xff] }
   0x2   :  { %v25_v2 = vsel %vm24_vm0, %v20_v0, 0.0  ;;  %v28_v3 = vsel %vm24_vm0, %v21_v1, 0.0  ;;  %v68_v14 = vld [vmem:[%s270_s3] sm:$0xff]  ;;  %v69_v15 = vld [vmem:[%s270_s3 + $0x8] sm:$0xff]  ;;  %v71_v18 = vld [vmem:[%s270_s3 + $0x18] sm:$0xff] }
   0x3   :  { %26 = vadd.xlane.f32.xlu0 %v25_v2  ;;  %v188_v17 = vpack.c.bf16 %v69_v15, %v68_v14  ;;  %v192_v19 = vpack.c.bf16 %v71_v18, %v70_v16  ;;  %v166_v27 = vld [vmem:[%s271_s1] ss:$0 sm:$0xff] }
   0x4   :  { %v167_v29 = vld [vmem:[%s272_s2] ss:$0 sm:$0xff] }
   0x5   :  { %189 = vmatprep.subr.bf16.mxu0 %v188_v17  ;;  %v168_v36 = vld [vmem:[%s273_s4] ss:$0 sm:$0xff] }
   0x6   :  { %191 = vmatpush3.bf16.msra.mxu0 %v188_v17 }
   0x7   :  { %29 = vadd.xlane.f32.xlu0 %v28_v3  ;;  %193 = vmatprep.subr.bf16.mxu0 %v192_v19 }
   0xa   :  { %195 = vmatpush3.bf16.msra.mxu0 %v192_v19 }
  0x90   :  { %v27_v4 = vpop.xlane.xlu0 %26 }
  0x91   :  { %v32_v5 = vmul.f32 0.03125, %v27_v4 }
  0x93   :  { %v34_v6 = vsub.f32 %v20_v0, %v32_v5 }
  0x94   :  { %v30_v7 = vpop.xlane.xlu0 %29 }
  0x95   :  { %v33_v8 = vmul.f32 0.03125, %v30_v7  ;;  %v36_v9 = vmul.f32 %v34_v6, %v34_v6 }
  0x97   :  { %v35_v10 = vsub.f32 %v21_v1, %v33_v8  ;;  %v38_v11 = vsel %vm24_vm0, %v36_v9, 0.0 }
  0x98   :  { %39 = vadd.xlane.f32.xlu1 %v38_v11 }
  0x99   :  { %v37_v12 = vmul.f32 %v35_v10, %v35_v10 }
  0x9b   :  { %v41_v13 = vsel %vm24_vm0, %v37_v12, 0.0 }
  0x9c   :  { %42 = vadd.xlane.f32.xlu1 %v41_v13 }
 0x125   :  { %v40_v20 = vpop.xlane.xlu1 %39 }
 0x126   :  { %v44_v21 = vmul.f32 0.03125, %v40_v20 }
 0x128   :  { %v46_v22 = vadd.f32 1e-05, %v44_v21 }
 0x129   :  { %v43_v23 = vpop.xlane.xlu1 %42 }
 0x12a   :  { %196 = vrsqrt.f32 %v46_v22  ;;  %v45_v24 = vmul.f32 0.03125, %v43_v23 }
 0x12c   :  { %v47_v25 = vadd.f32 1e-05, %v45_v24 }
 0x12e   :  { %198 = vrsqrt.f32 %v47_v25 }
 0x134   :  { %v197_v26 = vpop.eup %196 }
 0x135   :  { %v50_v28 = vmul.f32 %v197_v26, %v34_v6 }
 0x137   :  { %v58_v30 = vmul.f32 %v166_v27, %v50_v28 }
 0x138   :  { %v199_v31 = vpop.eup %198 }
 0x139   :  { %v51_v32 = vmul.f32 %v199_v31, %v35_v10  ;;  %v66_v33 = vadd.f32 %v167_v29, %v58_v30 }
 0x13b   :  { %v59_v34 = vmul.f32 %v166_v27, %v51_v32  ;;  %185 = vmatprep.mubr.msk.f32.mxu0 %vm24_vm0, %v66_v33 }
 0x13d   :  { %v67_v35 = vadd.f32 %v167_v29, %v59_v34 }
 0x13f   :  { %186 = vmatmul.mubr.msk.f32.vlgmr.msra.gmra.mrb[0].mxu0 %vm24_vm0, %v67_v35 }
 0x212   :  { %v187_v37 = vpop.f32.mrb[0].mxu0 }
 0x213   :  { %v157_v38 = vadd.f32 %v187_v37, %v168_v36  ;;  %v151_v39 = vpop.f32.mrb[1].mxu0 }
 0x214   :  { %v152_v40 = vadd.f32 %v168_v36, %v151_v39 }
 0x215   :  { %161 = vst [vmem:[%s274_s5 + $0x8] sm:$0xff] %v157_v38 }
 0x216   :  { %160 = vst [vmem:[%s274_s5] sm:$0xff] %v152_v40 }

// kernel: transformer_seq2seq.5
= control target key start
LH: loop header
LB: loop body
LE: loop exit
PB: predicated region body
PF: predicated region fallthrough
CT: control target
= control target key end

     0   :  { %vm37_vm0 = vcmask 261120   ;;  %v2192_v8 = vmov 0.0   ;;  %v33_v9 = vlaneseq  ;;  %vm2193_vm1 = vmmov 0   ;;  %s2194_s13 = smov 96   ;;  %s2195_s14 = smov 64   ;;  %s2542_s2 = inlined_call_operand.vmem [shape: f32[32,96], index: 2, kind: input, shape index: {}]   ;;  %s2543_s0 = inlined_call_operand.vmem [shape: f32[16,32], index: 0, kind: input, shape index: {}]   ;;  %s2544_s6 = inlined_call_operand.vmem [shape: f32[10,128], index: 6, kind: input, shape index: {}]   ;;  %s2545_s1 = inlined_call_operand.vmem [shape: f32[2,8], index: 1, kind: input, shape index: {}]   ;;  %s2546_s3 = inlined_call_operand.vmem [shape: f32[32,32], index: 3, kind: input, shape index: {}]   ;;  %s2547_s4 = inlined_call_operand.vmem [shape: f32[32,64], index: 4, kind: input, shape index: {}]   ;;  %s2548_s5 = inlined_call_operand.vmem [shape: f32[64,32], index: 5, kind: input, shape index: {}]   ;;  %s2549_s7 = inlined_call_operand.vmem [shape: f32[16,32], index: 7, kind: output, shape index: {}]  }
   0x1   :  { %v29_v0 = vld [vmem:[%s2542_s2] sm:$0xff]  ;;  %v30_v1 = vld [vmem:[%s2542_s2 + $0x8] sm:$0xff]  ;;  %v31_v2 = vld [vmem:[%s2542_s2 + $0x10] sm:$0xff]  ;;  %1984 = vmatprep.subr.mxu0 %v2192_v8  ;;  %1986 = vmatprep.mubr.msk.f32.mxu0 %vm2193_vm1, %v2192_v8  ;;  %s2196_s15 = smov 88   ;;  %s2198_s16 = smov 56   ;;  %vm158_vm2 = vcmask 64512  }
   0x2   :  { %v2095_v3 = vpack.c.bf16 %v30_v1, %v29_v0  ;;  %v32_v4 = vld [vmem:[%s2542_s2 + $0x18] sm:$0xff]  ;;  %v2264_v5 = vld [vmem:[%s2543_s0] sm:$0xff]  ;;  %v2271_v7 = vld [vmem:[%s2543_s0 + $0x8] sm:$0xff]  ;;  %v2277_v10 = vshrl.u32 %v33_v9, 7  ;;  %v2199_v21 = vmov 1966171168  }
   0x3   :  { %v2099_v6 = vpack.c.bf16 %v32_v4, %v31_v2  ;;  %1971 = vmatprep.mubr.msk.f32.mxu1 %vm37_vm0, %v2264_v5  ;;  %v2287_v12 = vld [vmem:[%s2544_s6] sm:$0xff]  ;;  %s2197_s6 = smov 120   ;;  %v124_v22 = vunpack.c.l.s4 %v2199_v21  ;;  %s2201_s19 = smov 112   ;;  %vm1503_vm4 = vcmask 195584   ;;  %vm1500_vm5 = vcmask 130048  }
   0x4   :  { %2096 = vmatprep.subr.bf16.mxu1 %v2095_v3  ;;  %v35_v11 = vsub.s32 0, %v2277_v10  ;;  %v119_v23 = vld [vmem:[%s2545_s1] sm:$0x3]  ;;  %s2200_s1 = smov 80   ;;  %s2202_s20 = smov 48   ;;  %vm1737_vm6 = vcmask 523264  }
   0x5   :  { %2098 = vmatpush3.bf16.msra.mxu1 %v2095_v3  ;;  %v125_v24 = vunpack.c.0.s8 %v124_v22  ;;  %vm120_vm3 = vcmp.gt.f32.partialorder %v119_v23, 0.0  ;;  %s2203_s21 = smov 72   ;;  %s2204_s22 = smov 104  }
   0x6   :  { %2100 = vmatprep.subr.bf16.mxu1 %v2099_v6  ;;  %v36_v13 = vrot.slane %v2287_v12, %v35_v11  ;;  %v121_v26 = vsel %vm120_vm3, -1e+30, %v2192_v8  ;;  %s2205_s23 = smov 40   ;;  %s2206_s24 = smov 8  }
   0x7   :  { %v128_v25 = vsub.s32 %v125_v24, %v2277_v10  ;;  %s2207_s25 = smov 16   ;;  %s2208_s11 = smov 24  }
   0x9   :  { %2102 = vmatpush3.bf16.msra.mxu1 %v2099_v6  ;;  %v129_v27 = vrot.slane %v121_v26, %v128_v25 }
   0xa   :  { %1974 = vmatprep.subr.mxu1 %v2192_v8 }
   0xb   :  { %v137_v28 = vrot.slane %v129_v27, %v128_v25  ;;  %v130_v29 = vcombine.high %v129_v27, %v129_v27 }
   0xc   :  { %1972 = vmatmul.mubr.msk.f32.vlgmr.msra.gmra.mrb[0].mxu1 %vm37_vm0, %v2271_v7 }
   0xd   :  { %1976 = vmatprep.mubr.msk.f32.mxu1 %vm2193_vm1, %v2192_v8  ;;  %v2322_v30 = vrot.slane %v137_v28, %v35_v11  ;;  %v144_v31 = vrot.slane %v130_v29, %v128_v25 }
   0xf   :  { %v2325_v35 = vrot.slane %v144_v31, %v35_v11 }
  0xdf   :  { %v1973_v14 = vpop.f32.mrb[0].mxu1 }
  0xe0   :  { %v110_v15 = vpop.f32.mrb[1].mxu1  ;;  %v2293_v17 = vadd.f32 %v1973_v14, %v36_v13 }
  0xe1   :  { %v2290_v16 = vadd.f32 %v110_v15, %v36_v13 }
  0xe3   :  { %156 = vrot.lane.b32.xlu0 %v2290_v16, %s2194_s13 }
  0xe7   :  { %234 = vrot.lane.b32.xlu0 %v2293_v17, %s2194_s13 }
  0xeb   :  { %328 = vrot.lane.b32.xlu0 %v2290_v16, %s2195_s14 }
  0xef   :  { %486 = vrot.lane.b32.xlu0 %v2290_v16, %s2196_s15 }
  0xf3   :  { %564 = vrot.lane.b32.xlu0 %v2293_v17, %s2196_s15 }
  0xf7   :  { %484 = vrot.lane.b32.xlu0 %v2290_v16, %s2197_s6 }
  0xfb   :  { %562 = vrot.lane.b32.xlu0 %v2293_v17, %s2197_s6 }
  0xff   :  { %658 = vrot.lane.b32.xlu0 %v2290_v16, %s2198_s16 }
 0x155   :  { %v157_v18 = vpop.permute.xlu0 %156 }
 0x156   :  { %1975 = vmatpush3.xpose.msk.msra.mxu1 %vm158_vm2, %v157_v18 }
 0x157   :  { %1979 = vmatprep.subr.mxu1 %v2192_v8 }
 0x159   :  { %1977 = vmatmul.mubr.msk.f32.vlgmr.msra.gmra.mrb[2].mxu1 %vm158_vm2, %v2290_v16  ;;  %v235_v19 = vpop.permute.xlu0 %234 }
 0x15a   :  { %1980 = vmatpush3.xpose.msk.msra.mxu1 %vm158_vm2, %v235_v19  ;;  %1981 = vmatprep.mubr.msk.f32.mxu1 %vm2193_vm1, %v2192_v8 }
 0x15b   :  { %1989 = vmatprep.subr.mxu1 %v2192_v8 }
 0x15d   :  { %1982 = vmatmul.mubr.msk.f32.vlgmr.msra.gmra.mrb[4].mxu1 %vm158_vm2, %v2293_v17  ;;  %v329_v20 = vpop.permute.xlu0 %328 }
 0x15e   :  { %1985 = vmatpush3.msra.mxu0 %v329_v20  ;;  %1991 = vmatprep.mubr.msk.f32.mxu1 %vm2193_vm1, %v2192_v8 }
 0x15f   :  { %1994 = vmatprep.subr.mxu0 %v2192_v8 }
 0x161   :  { %v487_v41 = vpop.permute.xlu0 %486 }
 0x165   :  { %v565_v44 = vpop.permute.xlu0 %564 }
 0x169   :  { %v485_v49 = vpop.permute.xlu0 %484 }
 0x16d   :  { %v563_v51 = vpop.permute.xlu0 %562 }
 0x171   :  { %v659_v54 = vpop.permute.xlu0 %658 }
 0x22c   :  { %v229_v32 = vpop.f32.mrb[2].mxu1 }
 0x22d   :  { %v230_v33 = vadd.f32 %v229_v32, %v2322_v30  ;;  %v1978_v34 = vpop.f32.mrb[3].mxu1 }
 0x22f   :  { %v310_v36 = vsel %vm158_vm2, %v230_v33, -inf }
 0x230   :  { %311 = vmax.xlane.f32.xlu1 %v310_v36  ;;  %v306_v37 = vpop.f32.mrb[4].mxu1 }
 0x231   :  { %v307_v38 = vadd.f32 %v306_v37, %v2325_v35  ;;  %v1983_v39 = vpop.f32.mrb[5].mxu1 }
 0x233   :  { %v313_v40 = vsel %vm158_vm2, %v307_v38, -inf }
 0x234   :  { %314 = vmax.xlane.f32.xlu1 %v313_v40 }
 0x245   :  { %404 = vrot.lane.b32.xlu1 %v2293_v17, %s2195_s14 }
 0x249   :  { %734 = vrot.lane.b32.xlu1 %v2293_v17, %s2198_s16 }
 0x24d   :  { %816 = vrot.lane.b32.xlu1 %v2290_v16, %s2200_s1 }
 0x2bd   :  { %v312_v42 = vpop.xlane.xlu1 %311 }
 0x2be   :  { %v316_v43 = vsub.f32 %v230_v33, %v312_v42 }
 0x2c0   :  { %v318_v45 = vmul.f32 1.442695, %v316_v43 }
 0x2c1   :  { %v315_v46 = vpop.xlane.xlu1 %314 }
 0x2c2   :  { %2152 = vpow2.f32 %v318_v45  ;;  %v317_v47 = vsub.f32 %v307_v38, %v315_v46 }
 0x2c4   :  { %v320_v48 = vmul.f32 1.442695, %v317_v47 }
 0x2c5   :  { %v405_v50 = vpop.permute.xlu1 %404 }
 0x2c6   :  { %2154 = vpow2.f32 %v320_v48  ;;  %1990 = vmatpush3.msra.mxu1 %v405_v50 }
 0x2c7   :  { %1999 = vmatprep.subr.mxu1 %v2192_v8 }
 0x2c9   :  { %v735_v55 = vpop.permute.xlu1 %734 }
 0x2cc   :  { %v2337_v52 = vpop.eup %2152 }
 0x2cd   :  { %1987 = vmatmul.mubr.msk.f32.vlgmr.msra.gmra.mrb[0].mxu0 %vm158_vm2, %v2337_v52  ;;  %v817_v4 = vpop.permute.xlu1 %816 }
 0x2ce   :  { %1995 = vmatpush3.xpose.msk.msra.mxu0 %vm158_vm2, %v487_v41  ;;  %1996 = vmatprep.mubr.msk.f32.mxu0 %vm2193_vm1, %v2192_v8 }
 0x2cf   :  { %2004 = vmatprep.subr.mxu0 %v2192_v8 }
 0x2d0   :  { %v2345_v53 = vpop.eup %2154 }
 0x2d1   :  { %1992 = vmatmul.mubr.msk.f32.vlgmr.msra.gmra.mrb[6].mxu1 %vm158_vm2, %v2345_v53  ;;  %1997 = vmatmul.mubr.msk.f32.vlgmr.msra.gmra.mrb[2].mxu0 %vm158_vm2, %v485_v49 }
 0x2d2   :  { %2000 = vmatpush3.xpose.msk.msra.mxu1 %vm158_vm2, %v565_v44  ;;  %2005 = vmatpush3.msra.mxu0 %v659_v54 }
 0x2d3   :  { %2001 = vmatprep.mubr.msk.f32.mxu1 %vm2193_vm1, %v2192_v8  ;;  %2009 = vmatprep.subr.mxu1 %v2192_v8 }
 0x2d4   :  { %2006 = vmatprep.mubr.msk.f32.mxu0 %vm2193_vm1, %v2192_v8  ;;  %2014 = vmatprep.subr.mxu0 %v2192_v8 }
 0x2d5   :  { %2002 = vmatmul.mubr.msk.f32.vlgmr.msra.gmra.mrb[8].mxu1 %vm158_vm2, %v563_v51 }
 0x2d6   :  { %2010 = vmatpush3.msra.mxu1 %v735_v55  ;;  %2011 = vmatprep.mubr.msk.f32.mxu1 %vm2193_vm1, %v2192_v8 }
 0x2d7   :  { %2019 = vmatprep.subr.mxu1 %v2192_v8 }
 0x3a0   :  { %v2361_v56 = vpop.f32.mrb[0].mxu0 }
 0x3a1   :  { %v1988_v57 = vpop.f32.mrb[1].mxu0 }
 0x3a4   :  { %v2363_v58 = vpop.f32.mrb[6].mxu1  ;;  %v558_v59 = vpop.f32.mrb[2].mxu0 }
 0x3a5   :  { %v559_v60 = vadd.f32 %v558_v59, %v2322_v30  ;;  %v1993_v61 = vpop.f32.mrb[7].mxu1  ;;  %v1998_v62 = vpop.f32.mrb[3].mxu0 }
 0x3a7   :  { %v640_v63 = vsel %vm158_vm2, %v559_v60, -inf }
 0x3a8   :  { %641 = vmax.xlane.f32.xlu1 %v640_v63  ;;  %v636_v0 = vpop.f32.mrb[8].mxu1 }
 0x3a9   :  { %v637_v1 = vadd.f32 %v636_v0, %v2325_v35  ;;  %v2003_v2 = vpop.f32.mrb[9].mxu1 }
 0x3ab   :  { %v643_v3 = vsel %vm158_vm2, %v637_v1, -inf }
 0x3ac   :  { %644 = vmax.xlane.f32.xlu0 %v643_v3 }
 0x3b9   :  { %814 = vrot.lane.b32.xlu1 %v2290_v16, %s2201_s19 }
 0x3bd   :  { %1064 = vrot.lane.b32.xlu1 %v2293_v17, %s2202_s20 }
 0x3c1   :  { %1146 = vrot.lane.b32.xlu1 %v2290_v16, %s2203_s21 }
 0x3c2   :  { %894 = vrot.lane.b32.xlu0 %v2293_v17, %s2200_s1 }
 0x3c6   :  { %892 = vrot.lane.b32.xlu0 %v2293_v17, %s2201_s19 }
 0x3ca   :  { %988 = vrot.lane.b32.xlu0 %v2290_v16, %s2202_s20 }
 0x435   :  { %v642_v6 = vpop.xlane.xlu1 %641 }
 0x436   :  { %v646_v9 = vsub.f32 %v559_v60, %v642_v6 }
 0x438   :  { %v648_v11 = vmul.f32 1.442695, %v646_v9 }
 0x439   :  { %v645_v13 = vpop.xlane.xlu0 %644  ;;  %v815_v21 = vpop.permute.xlu1 %814 }
 0x43a   :  { %2156 = vpow2.f32 %v648_v11  ;;  %v647_v14 = vsub.f32 %v637_v1, %v645_v13 }
 0x43c   :  { %v650_v15 = vmul.f32 1.442695, %v647_v14 }
 0x43d   :  { %v895_v18 = vpop.permute.xlu0 %894  ;;  %v1065_v24 = vpop.permute.xlu1 %1064 }
 0x43e   :  { %2158 = vpow2.f32 %v650_v15 }
 0x441   :  { %v893_v19 = vpop.permute.xlu0 %892  ;;  %v1147_v39 = vpop.permute.xlu1 %1146 }
 0x444   :  { %v2377_v20 = vpop.eup %2156 }
 0x445   :  { %2007 = vmatmul.mubr.msk.f32.vlgmr.msra.gmra.mrb[4].mxu0 %vm158_vm2, %v2377_v20  ;;  %v989_v23 = vpop.permute.xlu0 %988 }
 0x446   :  { %2015 = vmatpush3.xpose.msk.msra.mxu0 %vm158_vm2, %v817_v4  ;;  %2016 = vmatprep.mubr.msk.f32.mxu0 %vm2193_vm1, %v2192_v8 }
 0x447   :  { %2024 = vmatprep.subr.mxu0 %v2192_v8 }
 0x448   :  { %v2385_v22 = vpop.eup %2158 }
 0x449   :  { %2012 = vmatmul.mubr.msk.f32.vlgmr.msra.gmra.mrb[10].mxu1 %vm158_vm2, %v2385_v22  ;;  %2017 = vmatmul.mubr.msk.f32.vlgmr.msra.gmra.mrb[6].mxu0 %vm158_vm2, %v815_v21  ;;  %v655_v3 = vsel %vm158_vm2, %v2385_v22, 0.0  ;;  %v325_v22 = vsel %vm158_vm2, %v2345_v53, 0.0 }
 0x44a   :  { %2020 = vmatpush3.xpose.msk.msra.mxu1 %vm158_vm2, %v895_v18  ;;  %2025 = vmatpush3.msra.mxu0 %v989_v23 }
 0x44b   :  { %2021 = vmatprep.mubr.msk.f32.mxu1 %vm2193_vm1, %v2192_v8  ;;  %2029 = vmatprep.subr.mxu1 %v2192_v8 }
 0x44c   :  { %2026 = vmatprep.mubr.msk.f32.mxu0 %vm2193_vm1, %v2192_v8  ;;  %2034 = vmatprep.subr.mxu0 %v2192_v8 }
 0x44d   :  { %2022 = vmatmul.mubr.msk.f32.vlgmr.msra.gmra.mrb[12].mxu1 %vm158_vm2, %v893_v19 }
 0x44e   :  { %2030 = vmatpush3.msra.mxu1 %v1065_v24  ;;  %2031 = vmatprep.mubr.msk.f32.mxu1 %vm2193_vm1, %v2192_v8 }
 0x44f   :  { %2039 = vmatprep.subr.mxu1 %v2192_v8 }
 0x518   :  { %v2401_v25 = vpop.f32.mrb[4].mxu0 }
 0x519   :  { %v2008_v26 = vpop.f32.mrb[5].mxu0 }
 0x51c   :  { %v2403_v27 = vpop.f32.mrb[10].mxu1  ;;  %v888_v28 = vpop.f32.mrb[6].mxu0 }
 0x51d   :  { %v889_v29 = vadd.f32 %v888_v28, %v2322_v30  ;;  %v2013_v31 = vpop.f32.mrb[11].mxu1  ;;  %v2018_v32 = vpop.f32.mrb[7].mxu0 }
 0x51f   :  { %v970_v33 = vsel %vm158_vm2, %v889_v29, -inf }
 0x520   :  { %971 = vmax.xlane.f32.xlu1 %v970_v33  ;;  %v966_v34 = vpop.f32.mrb[12].mxu1 }
 0x521   :  { %v967_v36 = vadd.f32 %v966_v34, %v2325_v35  ;;  %v2023_v37 = vpop.f32.mrb[13].mxu1 }
 0x522   :  { %v1506_v37 = vld [vmem:[%s2546_s3] sm:$0xff] }
 0x523   :  { %v973_v38 = vsel %vm158_vm2, %v967_v36, -inf }
 0x524   :  { %974 = vmax.xlane.f32.xlu0 %v973_v38 }
 0x531   :  { %1144 = vrot.lane.b32.xlu1 %v2290_v16, %s2204_s22 }
 0x53a   :  { %1224 = vrot.lane.b32.xlu0 %v2293_v17, %s2203_s21 }
 0x53e   :  { %1222 = vrot.lane.b32.xlu0 %v2293_v17, %s2204_s22 }
 0x5ad   :  { %v972_v40 = vpop.xlane.xlu1 %971 }
 0x5ae   :  { %v976_v41 = vsub.f32 %v889_v29, %v972_v40  ;;  %v1509_v40 = vld [vmem:[%s2546_s3 + $0x18] sm:$0xff] }
 0x5b0   :  { %v978_v42 = vmul.f32 1.442695, %v976_v41 }
 0x5b1   :  { %v975_v43 = vpop.xlane.xlu0 %974  ;;  %v1145_v49 = vpop.permute.xlu1 %1144 }
 0x5b2   :  { %2160 = vpow2.f32 %v978_v42  ;;  %v977_v44 = vsub.f32 %v967_v36, %v975_v43 }
 0x5b4   :  { %v980_v45 = vmul.f32 1.442695, %v977_v44 }
 0x5b5   :  { %v1225_v47 = vpop.permute.xlu0 %1224 }
 0x5b6   :  { %2162 = vpow2.f32 %v980_v45 }
 0x5b9   :  { %v1223_v50 = vpop.permute.xlu0 %1222 }
 0x5bc   :  { %v2161_v46 = vpop.eup %2160 }
 0x5bd   :  { %2027 = vmatmul.mubr.msk.f32.vlgmr.msra.gmra.mrb[8].mxu0 %vm158_vm2, %v2161_v46 }
 0x5be   :  { %2035 = vmatpush3.xpose.msk.msra.mxu0 %vm158_vm2, %v1147_v39  ;;  %2036 = vmatprep.mubr.msk.f32.mxu0 %vm2193_vm1, %v2192_v8 }
 0x5bf   :  { %2044 = vmatprep.subr.mxu0 %v2192_v8 }
 0x5c0   :  { %v2163_v48 = vpop.eup %2162 }
 0x5c1   :  { %2032 = vmatmul.mubr.msk.f32.vlgmr.msra.gmra.mrb[14].mxu1 %vm158_vm2, %v2163_v48  ;;  %2037 = vmatmul.mubr.msk.f32.vlgmr.msra.gmra.mrb[10].mxu0 %vm158_vm2, %v1145_v49 }
 0x5c2   :  { %2040 = vmatpush3.xpose.msk.msra.mxu1 %vm158_vm2, %v1225_v47  ;;  %2041 = vmatprep.mubr.msk.f32.mxu1 %vm2193_vm1, %v2192_v8 }
 0x5c3   :  { %2049 = vmatprep.subr.mxu1 %v2192_v8  ;;  %2046 = vmatprep.mubr.msk.f32.mxu0 %vm2193_vm1, %v2192_v8 }
 0x5c5   :  { %2042 = vmatmul.mubr.msk.f32.vlgmr.msra.gmra.mrb[16].mxu1 %vm158_vm2, %v1223_v50 }
 0x5c6   :  { %2051 = vmatprep.mubr.msk.f32.mxu1 %vm2193_vm1, %v2192_v8  ;;  %v652_v8 = vsel %vm158_vm2, %v2377_v20, 0.0  ;;  %v322_v20 = vsel %vm158_vm2, %v2337_v52, 0.0 }
 0x690   :  { %v2429_v51 = vpop.f32.mrb[8].mxu0 }
 0x691   :  { %v2028_v54 = vpop.f32.mrb[9].mxu0 }
 0x694   :  { %v1136_v55 = vpop.f32.mrb[14].mxu1  ;;  %v1218_v57 = vpop.f32.mrb[10].mxu0 }
 0x695   :  { %v1219_v59 = vadd.f32 %v1218_v57, %v2322_v30  ;;  %v2033_v60 = vpop.f32.mrb[15].mxu1  ;;  %v2038_v61 = vpop.f32.mrb[11].mxu0  ;;  %v985_v30 = vsel %vm158_vm2, %v2163_v48, 0.0 }
 0x697   :  { %v1300_v62 = vsel %vm158_vm2, %v1219_v59, -inf }
 0x698   :  { %1301 = vmax.xlane.f32.xlu1 %v1300_v62  ;;  %v1296_v63 = vpop.f32.mrb[16].mxu1 }
 0x699   :  { %v1297_v0 = vadd.f32 %v1296_v63, %v2325_v35  ;;  %v2043_v1 = vpop.f32.mrb[17].mxu1  ;;  %v982_v35 = vsel %vm158_vm2, %v2161_v46, 0.0 }
 0x69b   :  { %v1303_v2 = vsel %vm158_vm2, %v1297_v0, -inf }
 0x69c   :  { %1304 = vmax.xlane.f32.xlu0 %v1303_v2 }
 0x6a9   :  { %1394 = vrot.lane.b32.xlu1 %v2293_v17, %s2205_s23 }
 0x6b2   :  { %1318 = vrot.lane.b32.xlu0 %v2290_v16, %s2205_s23 }
 0x6cd   :  { %653 = vadd.xlane.f32.xlu1 %v652_v8 }
 0x6d1   :  { %986 = vadd.xlane.f32.xlu1 %v985_v30  ;;  %656 = vadd.xlane.f32.xlu0 %v655_v3 }
 0x6d5   :  { %983 = vadd.xlane.f32.xlu0 %v982_v35 }
 0x725   :  { %v1302_v4 = vpop.xlane.xlu1 %1301 }
 0x726   :  { %v1306_v6 = vsub.f32 %v1219_v59, %v1302_v4 }
 0x728   :  { %v1308_v9 = vmul.f32 1.442695, %v1306_v6 }
 0x729   :  { %v1395_v17 = vpop.permute.xlu1 %1394  ;;  %v1305_v11 = vpop.xlane.xlu0 %1304 }
 0x72a   :  { %2164 = vpow2.f32 %v1308_v9  ;;  %v1307_v16 = vsub.f32 %v1297_v0, %v1305_v11  ;;  %2050 = vmatpush3.msra.mxu1 %v1395_v17 }
 0x72c   :  { %v1310_v13 = vmul.f32 1.442695, %v1307_v16 }
 0x72d   :  { %v1319_v14 = vpop.permute.xlu0 %1318 }
 0x72e   :  { %2166 = vpow2.f32 %v1310_v13  ;;  %2045 = vmatpush3.msra.mxu0 %v1319_v14 }
 0x734   :  { %v2165_v15 = vpop.eup %2164 }
 0x735   :  { %2047 = vmatmul.mubr.msk.f32.vlgmr.msra.gmra.mrb[12].mxu0 %vm158_vm2, %v2165_v15  ;;  %v1312_v18 = vsel %vm158_vm2, %v2165_v15, 0.0 }
 0x736   :  { %1313 = vadd.xlane.f32.xlu0 %v1312_v18 }
 0x738   :  { %v2167_v19 = vpop.eup %2166 }
 0x739   :  { %2052 = vmatmul.mubr.msk.f32.vlgmr.msra.gmra.mrb[18].mxu1 %vm158_vm2, %v2167_v19  ;;  %v1315_v21 = vsel %vm158_vm2, %v2167_v19, 0.0 }
 0x73a   :  { %323 = vadd.xlane.f32.xlu0 %v322_v20  ;;  %1316 = vadd.xlane.f32.xlu1 %v1315_v21 }
 0x73e   :  { %326 = vadd.xlane.f32.xlu1 %v325_v22 }
 0x75a   :  { %v654_v23 = vpop.xlane.xlu1 %653 }
 0x75b   :  { %2168 = vrcp.f32 %v654_v23 }
 0x75e   :  { %v987_v24 = vpop.xlane.xlu1 %986  ;;  %v657_v26 = vpop.xlane.xlu0 %656 }
 0x75f   :  { %2170 = vrcp.f32 %v987_v24 }
 0x760   :  { %2172 = vrcp.f32 %v657_v26 }
 0x762   :  { %v984_v28 = vpop.xlane.xlu0 %983 }
 0x763   :  { %2174 = vrcp.f32 %v984_v28 }
 0x765   :  { %v2169_v29 = vpop.eup %2168 }
 0x766   :  { %v811_v31 = vmul.f32 %v2169_v29, %v2401_v25  ;;  %v1507_v25 = vld [vmem:[%s2546_s3 + $0x8] sm:$0xff]  ;;  %v1638_v29 = vld [vmem:[%s2547_s4] sm:$0xff] }
 0x767   :  { %v2103_v38 = vpack.c.bf16 %v1507_v25, %v1506_v37  ;;  %v1731_v37 = vld [vmem:[%s2548_s5 + $0x10] sm:$0xff] }
 0x768   :  { %1476 = vrot.lane.b32.xlu0 %v811_v31, %s2206_s24  ;;  %v1639_v31 = vld [vmem:[%s2547_s4 + $0x8] sm:$0xff] }
 0x769   :  { %v2171_v52 = vpop.eup %2170  ;;  %2104 = vmatprep.subr.bf16.mxu0 %v2103_v38 }
 0x76a   :  { %v2173_v32 = vpop.eup %2172  ;;  %v1143_v33 = vmul.f32 %v2171_v52, %v1136_v55  ;;  %2106 = vmatpush3.bf16.msra.mxu0 %v2103_v38  ;;  %v2111_v52 = vpack.c.bf16 %v1639_v31, %v1638_v29  ;;  %v1732_v38 = vld [vmem:[%s2548_s5 + $0x18] sm:$0xff] }
 0x76b   :  { %v813_v34 = vmul.f32 %v2173_v32, %v2403_v27  ;;  %v1508_v27 = vld [vmem:[%s2546_s3 + $0x10] sm:$0xff] }
 0x76c   :  { %1486 = vrot.lane.b32.xlu0 %v1143_v33, %s2207_s25  ;;  %v2107_v41 = vpack.c.bf16 %v1509_v40, %v1508_v27  ;;  %v1640_v32 = vld [vmem:[%s2547_s4 + $0x10] sm:$0xff]  ;;  %v1641_v33 = vld [vmem:[%s2547_s4 + $0x18] sm:$0xff]  ;;  %2112 = vmatprep.subr.bf16.mxu1 %v2111_v52  ;;  %v1733_v27 = vld [vmem:[%s2548_s5 + $0x20] sm:$0xff] }
 0x76d   :  { %v2175_v53 = vpop.eup %2174  ;;  %1478 = vrot.lane.b32.xlu1 %v813_v34, %s2206_s24  ;;  %v2115_v34 = vpack.c.bf16 %v1641_v33, %v1640_v32  ;;  %2114 = vmatpush3.bf16.msra.mxu1 %v2111_v52  ;;  %v1734_v40 = vld [vmem:[%s2548_s5 + $0x28] sm:$0xff] }
 0x76e   :  { %v1141_v36 = vmul.f32 %v2175_v53, %v2429_v51  ;;  %2108 = vmatprep.subr.bf16.mxu0 %v2107_v41  ;;  %v1729_v53 = vld [vmem:[%s2548_s5] sm:$0xff] }
 0x76f   :  { %2110 = vmatpush3.bf16.msra.mxu0 %v2107_v41  ;;  %2116 = vmatprep.subr.bf16.mxu1 %v2115_v34  ;;  %v2127_v41 = vpack.c.bf16 %v1734_v40, %v1733_v27 }
 0x771   :  { %1484 = vrot.lane.b32.xlu1 %v1141_v36, %s2207_s25  ;;  %2118 = vmatpush3.bf16.msra.mxu1 %v2115_v34  ;;  %v1730_v36 = vld [vmem:[%s2548_s5 + $0x8] sm:$0xff] }
 0x772   :  { %v2119_v25 = vpack.c.bf16 %v1730_v36, %v1729_v53 }
 0x774   :  { %2120 = vmatprep.subr.bf16.mxu0 %v2119_v25 }
 0x7c3   :  { %v1314_v39 = vpop.xlane.xlu0 %1313 }
 0x7c4   :  { %2176 = vrcp.f32 %v1314_v39  ;;  %v2123_v39 = vpack.c.bf16 %v1732_v38, %v1731_v37  ;;  %v1855_v37 = vsub.s32 6, %v2277_v10 }
 0x7c6   :  { %v1856_v38 = vrot.slane %v2287_v12, %v1855_v37 }
 0x7c7   :  { %v1317_v42 = vpop.xlane.xlu1 %1316  ;;  %v324_v51 = vpop.xlane.xlu0 %323 }
 0x7c8   :  { %2178 = vrcp.f32 %v1317_v42 }
 0x7c9   :  { %2180 = vrcp.f32 %v324_v51 }
 0x7cb   :  { %v327_v54 = vpop.xlane.xlu1 %326 }
 0x7cc   :  { %2182 = vrcp.f32 %v327_v54 }
 0x7ce   :  { %v2177_v43 = vpop.eup %2176 }
 0x7d2   :  { %v2179_v47 = vpop.eup %2178 }
 0x7d3   :  { %v2181_v57 = vpop.eup %2180 }
 0x7d4   :  { %v481_v62 = vmul.f32 %v2181_v57, %v2361_v56  ;;  %v1595_v56 = vsub.s32 1, %v2277_v10 }
 0x7d6   :  { %v2183_v60 = vpop.eup %2182  ;;  %v1596_v9 = vrot.slane %v2287_v12, %v1595_v56 }
 0x7d7   :  { %v483_v0 = vmul.f32 %v2183_v60, %v2363_v58 }
 0x7da   :  { %v1477_v59 = vpop.permute.xlu0 %1476 }
 0x7db   :  { %v1498_v63 = vsel %vm158_vm2, %v481_v62, %v1477_v59 }
 0x7de   :  { %v1487_v1 = vpop.permute.xlu0 %1486 }
 0x7df   :  { %v1479_v55 = vpop.permute.xlu1 %1478 }
 0x7e0   :  { %v1499_v30 = vsel %vm158_vm2, %v483_v0, %v1479_v55  ;;  %v1735_v0 = vld [vmem:[%s2548_s5 + $0x30] sm:$0xff] }
 0x7e1   :  { %v1502_v35 = vsel %vm1500_vm5, %v1499_v30, %v1487_v1  ;;  %v1736_v1 = vld [vmem:[%s2548_s5 + $0x38] sm:$0xff] }
 0x7e3   :  { %v1485_v61 = vpop.permute.xlu1 %1484 }
 0x7e4   :  { %v1501_v2 = vsel %vm1500_vm5, %v1498_v63, %v1485_v61 }
 0x808   :  { %v1390_v44 = vpop.f32.mrb[12].mxu0 }
 0x809   :  { %v1471_v45 = vmul.f32 %v2177_v43, %v1390_v44  ;;  %v2048_v46 = vpop.f32.mrb[13].mxu0 }
 0x80b   :  { %1492 = vrot.lane.b32.xlu1 %v1471_v45, %s2208_s11 }
 0x80c   :  { %v1466_v48 = vpop.f32.mrb[18].mxu1 }
 0x80d   :  { %v1473_v49 = vmul.f32 %v2179_v47, %v1466_v48  ;;  %v2053_v50 = vpop.f32.mrb[19].mxu1  ;;  %v1628_v48 = vsub.s32 2, %v2277_v10 }
 0x80f   :  { %1494 = vrot.lane.b32.xlu0 %v1473_v49, %s2208_s11  ;;  %v1634_v49 = vsub.s32 3, %v2277_v10  ;;  %v1629_v50 = vrot.slane %v2287_v12, %v1628_v48 }
 0x811   :  { %v1635_v59 = vrot.slane %v2287_v12, %v1634_v49 }
 0x87d   :  { %v1493_v8 = vpop.permute.xlu1 %1492 }
 0x87e   :  { %v1504_v3 = vsel %vm1503_vm4, %v1501_v2, %v1493_v8  ;;  %v2131_v2 = vpack.c.bf16 %v1736_v1, %v1735_v0  ;;  %v1644_v8 = vsub.s32 4, %v2277_v10 }
 0x87f   :  { %2062 = vmatprep.mubr.msk.f32.mxu0 %vm37_vm0, %v1504_v3 }
 0x880   :  { %v1645_v30 = vrot.slane %v2287_v12, %v1644_v8 }
 0x881   :  { %v1495_v4 = vpop.permute.xlu0 %1494 }
 0x882   :  { %v1505_v6 = vsel %vm1503_vm4, %v1502_v35, %v1495_v4 }
 0x883   :  { %2063 = vmatmul.mubr.msk.f32.vlgmr.msra.gmra.mrb[14].mxu0 %vm37_vm0, %v1505_v6 }
 0x884   :  { %2122 = vmatpush3.bf16.msra.mxu0 %v2119_v25  ;;  %v1861_v25 = vsub.s32 7, %v2277_v10 }
 0x885   :  { %2124 = vmatprep.subr.bf16.mxu0 %v2123_v39 }
 0x886   :  { %v1862_v40 = vrot.slane %v2287_v12, %v1861_v25 }
 0x888   :  { %2126 = vmatpush3.bf16.msra.mxu0 %v2123_v39 }
 0x889   :  { %2128 = vmatprep.subr.bf16.mxu0 %v2127_v41 }
 0x88c   :  { %2130 = vmatpush3.bf16.msra.mxu0 %v2127_v41 }
 0x88d   :  { %2132 = vmatprep.subr.bf16.mxu0 %v2131_v2 }
 0x890   :  { %2134 = vmatpush3.bf16.msra.mxu0 %v2131_v2 }
 0x956   :  { %v2064_v17 = vpop.f32.mrb[14].mxu0 }
 0x957   :  { %v1592_v58 = vadd.f32 %v2064_v17, %v2271_v7  ;;  %v1582_v11 = vpop.f32.mrb[15].mxu0  ;;  %v1823_v17 = vsub.s32 5, %v2277_v10 }
 0x958   :  { %v1591_v16 = vadd.f32 %v1582_v11, %v2264_v5 }
 0x959   :  { %v1598_v13 = vadd.f32 %v1596_v9, %v1592_v58  ;;  %v1824_v58 = vrot.slane %v2287_v12, %v1823_v17 }
 0x95a   :  { %v1597_v14 = vadd.f32 %v1596_v9, %v1591_v16 }
 0x95b   :  { %v1602_v15 = vsel %vm37_vm0, %v1598_v13, 0.0 }
 0x95c   :  { %1603 = vadd.xlane.f32.xlu0 %v1602_v15  ;;  %v1599_v18 = vsel %vm37_vm0, %v1597_v14, 0.0 }
 0x95d   :  { %1600 = vadd.xlane.f32.xlu1 %v1599_v18 }
 0x9e9   :  { %v1604_v19 = vpop.xlane.xlu0 %1603 }
 0x9ea   :  { %v1607_v20 = vmul.f32 0.03125, %v1604_v19  ;;  %v1601_v21 = vpop.xlane.xlu1 %1600 }
 0x9eb   :  { %v1606_v22 = vmul.f32 0.03125, %v1601_v21 }
 0x9ec   :  { %v1609_v23 = vsub.f32 %v1598_v13, %v1607_v20 }
 0x9ed   :  { %v1608_v24 = vsub.f32 %v1597_v14, %v1606_v22 }
 0x9ee   :  { %v1611_v26 = vmul.f32 %v1609_v23, %v1609_v23 }
 0x9ef   :  { %v1610_v28 = vmul.f32 %v1608_v24, %v1608_v24 }
 0x9f0   :  { %v1615_v7 = vsel %vm37_vm0, %v1611_v26, 0.0 }
 0x9f1   :  { %1616 = vadd.xlane.f32.xlu1 %v1615_v7  ;;  %v1612_v5 = vsel %vm37_vm0, %v1610_v28, 0.0 }
 0x9f2   :  { %1613 = vadd.xlane.f32.xlu0 %v1612_v5 }
 0xa7e   :  { %v1617_v42 = vpop.xlane.xlu1 %1616 }
 0xa7f   :  { %v1619_v43 = vmul.f32 0.03125, %v1617_v42  ;;  %v1614_v44 = vpop.xlane.xlu0 %1613 }
 0xa80   :  { %v1618_v45 = vmul.f32 0.03125, %v1614_v44 }
 0xa81   :  { %v1621_v46 = vadd.f32 1e-05, %v1619_v43 }
 0xa82   :  { %v1620_v47 = vadd.f32 1e-05, %v1618_v45 }
 0xa83   :  { %2184 = vrsqrt.f32 %v1621_v46 }
 0xa84   :  { %2186 = vrsqrt.f32 %v1620_v47 }
 0xa8d   :  { %v2185_v51 = vpop.eup %2184 }
 0xa8e   :  { %v2187_v54 = vpop.eup %2186  ;;  %v1625_v55 = vmul.f32 %v2185_v51, %v1609_v23 }
 0xa8f   :  { %v1624_v57 = vmul.f32 %v2187_v54, %v1608_v24 }
 0xa90   :  { %v1631_v60 = vmul.f32 %v1629_v50, %v1625_v55 }
 0xa91   :  { %v1630_v61 = vmul.f32 %v1629_v50, %v1624_v57 }
 0xa92   :  { %v1637_v63 = vadd.f32 %v1635_v59, %v1631_v60 }
 0xa93   :  { %v1636_v62 = vadd.f32 %v1635_v59, %v1630_v61 }
 0xa95   :  { %2073 = vmatprep.mubr.msk.f32.mxu1 %vm37_vm0, %v1636_v62 }
 0xa96   :  { %2074 = vmatmul.mubr.msk.f32.vlgmr.msra.gmra.mrb[20].mxu1 %vm37_vm0, %v1637_v63 }
 0xb69   :  { %v2075_v3 = vpop.f32.mrb[20].mxu1 }
 0xb6a   :  { %v1724_v35 = vadd.f32 %v2075_v3, %v1645_v30  ;;  %v1718_v4 = vpop.f32.mrb[21].mxu1 }
 0xb6b   :  { %v1719_v6 = vadd.f32 %v1718_v4, %v1645_v30 }
 0xb6c   :  { %v1728_v9 = vmax.f32 %v1724_v35, 0.0 }
 0xb6d   :  { %v1727_v56 = vmax.f32 %v1719_v6, 0.0 }
 0xb6f   :  { %2092 = vmatprep.mubr.msk.f32.mxu0 %vm1737_vm6, %v1727_v56 }
 0xb70   :  { %2093 = vmatmul.mubr.msk.f32.vlgmr.msra.gmra.mrb[16].mxu0 %vm1737_vm6, %v1728_v9 }
 0xc43   :  { %v2094_v11 = vpop.f32.mrb[16].mxu0 }
 0xc44   :  { %v1820_v16 = vadd.f32 %v2094_v11, %v1637_v63  ;;  %v1810_v13 = vpop.f32.mrb[17].mxu0 }
 0xc45   :  { %v1819_v14 = vadd.f32 %v1810_v13, %v1636_v62 }
 0xc46   :  { %v1826_v15 = vadd.f32 %v1824_v58, %v1820_v16 }
 0xc47   :  { %v1825_v18 = vadd.f32 %v1824_v58, %v1819_v14 }
 0xc48   :  { %v1830_v19 = vsel %vm37_vm0, %v1826_v15, 0.0 }
 0xc49   :  { %1831 = vadd.xlane.f32.xlu1 %v1830_v19  ;;  %v1827_v20 = vsel %vm37_vm0, %v1825_v18, 0.0 }
 0xc4a   :  { %1828 = vadd.xlane.f32.xlu0 %v1827_v20 }
 0xcd6   :  { %v1832_v21 = vpop.xlane.xlu1 %1831 }
 0xcd7   :  { %v1834_v22 = vmul.f32 0.03125, %v1832_v21  ;;  %v1829_v23 = vpop.xlane.xlu0 %1828 }
 0xcd8   :  { %v1833_v24 = vmul.f32 0.03125, %v1829_v23 }
 0xcd9   :  { %v1836_v26 = vsub.f32 %v1826_v15, %v1834_v22 }
 0xcda   :  { %v1835_v28 = vsub.f32 %v1825_v18, %v1833_v24 }
 0xcdb   :  { %v1838_v7 = vmul.f32 %v1836_v26, %v1836_v26 }
 0xcdc   :  { %v1837_v5 = vmul.f32 %v1835_v28, %v1835_v28 }
 0xcdd   :  { %v1842_v29 = vsel %vm37_vm0, %v1838_v7, 0.0 }
 0xcde   :  { %1843 = vadd.xlane.f32.xlu1 %v1842_v29  ;;  %v1839_v31 = vsel %vm37_vm0, %v1837_v5, 0.0 }
 0xcdf   :  { %1840 = vadd.xlane.f32.xlu0 %v1839_v31 }
 0xd6b   :  { %v1844_v52 = vpop.xlane.xlu1 %1843 }
 0xd6c   :  { %v1846_v32 = vmul.f32 0.03125, %v1844_v52  ;;  %v1841_v33 = vpop.xlane.xlu0 %1840 }
 0xd6d   :  { %v1845_v34 = vmul.f32 0.03125, %v1841_v33 }
 0xd6e   :  { %v1848_v53 = vadd.f32 1e-05, %v1846_v32 }
 0xd6f   :  { %v1847_v36 = vadd.f32 1e-05, %v1845_v34 }
 0xd70   :  { %2188 = vrsqrt.f32 %v1848_v53 }
 0xd71   :  { %2190 = vrsqrt.f32 %v1847_v36 }
 0xd7a   :  { %v2189_v39 = vpop.eup %2188 }
 0xd7b   :  { %v2191_v27 = vpop.eup %2190  ;;  %v1852_v41 = vmul.f32 %v2189_v39, %v1836_v26 }
 0xd7c   :  { %v1851_v42 = vmul.f32 %v2191_v27, %v1835_v28 }
 0xd7d   :  { %v1858_v43 = vmul.f32 %v1856_v38, %v1852_v41 }
 0xd7e   :  { %v1857_v44 = vmul.f32 %v1856_v38, %v1851_v42 }
 0xd7f   :  { %v1864_v45 = vadd.f32 %v1862_v40, %v1858_v43 }
 0xd80   :  { %v1863_v46 = vadd.f32 %v1862_v40, %v1857_v44 }
 0xd81   :  { %1866 = vst.msk [vmem:[%s2549_s7 + $0x8] sm:$0xff] %vm37_vm0, %v1864_v45 }
 0xd82   :  { %1865 = vst.msk [vmem:[%s2549_s7] sm:$0xff] %vm37_vm0, %v1863_v46 }

// kernel: transformer_seq2seq.6
= control target key start
LH: loop header
LB: loop body
LE: loop exit
PB: predicated region body
PF: predicated region fallthrough
CT: control target
= control target key end

     0   :  { %vm38_vm0 = vcmask 261120   ;;  %v2235_v8 = vmov 0.0   ;;  %v34_v9 = vlaneseq  ;;  %vm2236_vm1 = vmmov 0   ;;  %s2237_s13 = smov 96   ;;  %s2238_s14 = smov 64   ;;  %s2602_s2 = inlined_call_operand.vmem [shape: f32[32,96], index: 2, kind: input, shape index: {}]   ;;  %s2603_s0 = inlined_call_operand.vmem [shape: f32[16,32], index: 0, kind: input, shape index: {}]   ;;  %s2604_s6 = inlined_call_operand.vmem [shape: f32[10,128], index: 6, kind: input, shape index: {}]   ;;  %s2605_s1 = inlined_call_operand.vmem [shape: f32[2,8], index: 1, kind: input, shape index: {}]   ;;  %s2606_s3 = inlined_call_operand.vmem [shape: f32[32,32], index: 3, kind: input, shape index: {}]   ;;  %s2607_s4 = inlined_call_operand.vmem [shape: f32[32,64], index: 4, kind: input, shape index: {}]   ;;  %s2608_s5 = inlined_call_operand.vmem [shape: f32[64,32], index: 5, kind: input, shape index: {}]   ;;  %s2609_s7 = inlined_call_operand.vmem [shape: f32[16,32], index: 7, kind: output, shape index: {}]  }
   0x1   :  { %v30_v0 = vld [vmem:[%s2602_s2] sm:$0xff]  ;;  %v31_v1 = vld [vmem:[%s2602_s2 + $0x8] sm:$0xff]  ;;  %v32_v2 = vld [vmem:[%s2602_s2 + $0x10] sm:$0xff]  ;;  %2023 = vmatprep.subr.mxu0 %v2235_v8  ;;  %2025 = vmatprep.mubr.msk.f32.mxu0 %vm2236_vm1, %v2235_v8  ;;  %s2239_s15 = smov 88   ;;  %s2240_s16 = smov 120   ;;  %vm159_vm2 = vcmask 64512  }
   0x2   :  { %v2134_v3 = vpack.c.bf16 %v31_v1, %v30_v0  ;;  %v33_v4 = vld [vmem:[%s2602_s2 + $0x18] sm:$0xff]  ;;  %v2307_v5 = vld [vmem:[%s2603_s0] sm:$0xff]  ;;  %v2314_v7 = vld [vmem:[%s2603_s0 + $0x8] sm:$0xff]  ;;  %v2320_v10 = vshrl.u32 %v34_v9, 7  ;;  %s2241_s17 = smov 56   ;;  %s2244_s20 = smov 112  }
   0x3   :  { %v2138_v6 = vpack.c.bf16 %v33_v4, %v32_v2  ;;  %2010 = vmatprep.mubr.msk.f32.mxu1 %vm38_vm0, %v2307_v5  ;;  %v2332_v12 = vld [vmem:[%s2604_s6] sm:$0xff]  ;;  %v2242_v21 = vmov 1966171168   ;;  %s2245_s21 = smov 48   ;;  %s2246_s22 = smov 72   ;;  %vm1504_vm4 = vcmask 195584  }
   0x4   :  { %2135 = vmatprep.subr.bf16.mxu1 %v2134_v3  ;;  %v2327_v11 = vsub.s32 0, %v2320_v10  ;;  %v125_v22 = vunpack.c.l.s4 %v2242_v21  ;;  %v120_v23 = vld [vmem:[%s2605_s1] sm:$0x3]  ;;  %s2243_s1 = smov 80   ;;  %s2247_s23 = smov 104   ;;  %vm1501_vm5 = vcmask 130048  }
   0x5   :  { %2137 = vmatpush3.bf16.msra.mxu1 %v2134_v3  ;;  %vm121_vm3 = vcmp.gt.f32.partialorder %v120_v23, 0.0  ;;  %s2248_s24 = smov 40   ;;  %s2249_s25 = smov 8   ;;  %vm1738_vm6 = vcmask 523264  }
   0x6   :  { %2139 = vmatprep.subr.bf16.mxu1 %v2138_v6  ;;  %v37_v13 = vrot.slane %v2332_v12, %v2327_v11  ;;  %v126_v24 = vunpack.c.0.s8 %v125_v22  ;;  %v122_v26 = vsel %vm121_vm3, -1e+30, %v2235_v8  ;;  %s2250_s26 = smov 16   ;;  %s2251_s12 = smov 24  }
   0x8   :  { %v129_v25 = vsub.s32 %v126_v24, %v2320_v10 }
   0x9   :  { %2141 = vmatpush3.bf16.msra.mxu1 %v2138_v6 }
   0xa   :  { %2013 = vmatprep.subr.mxu1 %v2235_v8  ;;  %v130_v27 = vrot.slane %v122_v26, %v129_v25 }
   0xc   :  { %2011 = vmatmul.mubr.msk.f32.vlgmr.msra.gmra.mrb[0].mxu1 %vm38_vm0, %v2314_v7  ;;  %v138_v28 = vrot.slane %v130_v27, %v129_v25  ;;  %v131_v29 = vcombine.high %v130_v27, %v130_v27 }
   0xd   :  { %2015 = vmatprep.mubr.msk.f32.mxu1 %vm2236_vm1, %v2235_v8 }
   0xe   :  { %v2369_v30 = vrot.slane %v138_v28, %v2327_v11  ;;  %v145_v31 = vrot.slane %v131_v29, %v129_v25 }
  0x10   :  { %v2373_v35 = vrot.slane %v145_v31, %v2327_v11 }
  0xdf   :  { %v2012_v14 = vpop.f32.mrb[0].mxu1 }
  0xe0   :  { %v111_v15 = vpop.f32.mrb[1].mxu1  ;;  %v2339_v17 = vadd.f32 %v2012_v14, %v37_v13 }
  0xe1   :  { %v2336_v16 = vadd.f32 %v111_v15, %v37_v13 }
  0xe3   :  { %157 = vrot.lane.b32.xlu0 %v2336_v16, %s2237_s13 }
  0xe7   :  { %235 = vrot.lane.b32.xlu0 %v2339_v17, %s2237_s13 }
  0xeb   :  { %329 = vrot.lane.b32.xlu0 %v2336_v16, %s2238_s14 }
  0xef   :  { %487 = vrot.lane.b32.xlu0 %v2336_v16, %s2239_s15 }
  0xf3   :  { %565 = vrot.lane.b32.xlu0 %v2339_v17, %s2239_s15 }
  0xf7   :  { %485 = vrot.lane.b32.xlu0 %v2336_v16, %s2240_s16 }
  0xfb   :  { %563 = vrot.lane.b32.xlu0 %v2339_v17, %s2240_s16 }
  0xff   :  { %659 = vrot.lane.b32.xlu0 %v2336_v16, %s2241_s17 }
 0x155   :  { %v158_v18 = vpop.permute.xlu0 %157 }
 0x156   :  { %2014 = vmatpush3.xpose.msk.msra.mxu1 %vm159_vm2, %v158_v18 }
 0x157   :  { %2018 = vmatprep.subr.mxu1 %v2235_v8 }
 0x159   :  { %2016 = vmatmul.mubr.msk.f32.vlgmr.msra.gmra.mrb[2].mxu1 %vm159_vm2, %v2336_v16  ;;  %v236_v19 = vpop.permute.xlu0 %235 }
 0x15a   :  { %2019 = vmatpush3.xpose.msk.msra.mxu1 %vm159_vm2, %v236_v19  ;;  %2020 = vmatprep.mubr.msk.f32.mxu1 %vm2236_vm1, %v2235_v8 }
 0x15b   :  { %2028 = vmatprep.subr.mxu1 %v2235_v8 }
 0x15d   :  { %2021 = vmatmul.mubr.msk.f32.vlgmr.msra.gmra.mrb[4].mxu1 %vm159_vm2, %v2339_v17  ;;  %v330_v20 = vpop.permute.xlu0 %329 }
 0x15e   :  { %2024 = vmatpush3.msra.mxu0 %v330_v20  ;;  %2030 = vmatprep.mubr.msk.f32.mxu1 %vm2236_vm1, %v2235_v8 }
 0x15f   :  { %2033 = vmatprep.subr.mxu0 %v2235_v8 }
 0x161   :  { %v488_v41 = vpop.permute.xlu0 %487 }
 0x165   :  { %v566_v44 = vpop.permute.xlu0 %565 }
 0x169   :  { %v486_v49 = vpop.permute.xlu0 %485 }
 0x16d   :  { %v564_v51 = vpop.permute.xlu0 %563 }
 0x171   :  { %v660_v54 = vpop.permute.xlu0 %659 }
 0x22c   :  { %v230_v32 = vpop.f32.mrb[2].mxu1 }
 0x22d   :  { %v231_v33 = vadd.f32 %v230_v32, %v2369_v30  ;;  %v2017_v34 = vpop.f32.mrb[3].mxu1 }
 0x22f   :  { %v311_v36 = vsel %vm159_vm2, %v231_v33, -inf }
 0x230   :  { %312 = vmax.xlane.f32.xlu1 %v311_v36  ;;  %v307_v37 = vpop.f32.mrb[4].mxu1 }
 0x231   :  { %v308_v38 = vadd.f32 %v307_v37, %v2373_v35  ;;  %v2022_v39 = vpop.f32.mrb[5].mxu1 }
 0x233   :  { %v314_v40 = vsel %vm159_vm2, %v308_v38, -inf }
 0x234   :  { %315 = vmax.xlane.f32.xlu1 %v314_v40 }
 0x245   :  { %405 = vrot.lane.b32.xlu1 %v2339_v17, %s2238_s14 }
 0x249   :  { %735 = vrot.lane.b32.xlu1 %v2339_v17, %s2241_s17 }
 0x24d   :  { %817 = vrot.lane.b32.xlu1 %v2336_v16, %s2243_s1 }
 0x2bd   :  { %v313_v42 = vpop.xlane.xlu1 %312 }
 0x2be   :  { %v317_v43 = vsub.f32 %v231_v33, %v313_v42 }
 0x2c0   :  { %v319_v45 = vmul.f32 1.442695, %v317_v43 }
 0x2c1   :  { %v316_v46 = vpop.xlane.xlu1 %315 }
 0x2c2   :  { %2191 = vpow2.f32 %v319_v45  ;;  %v318_v47 = vsub.f32 %v308_v38, %v316_v46 }
 0x2c4   :  { %v321_v48 = vmul.f32 1.442695, %v318_v47 }
 0x2c5   :  { %v406_v50 = vpop.permute.xlu1 %405 }
 0x2c6   :  { %2193 = vpow2.f32 %v321_v48  ;;  %2029 = vmatpush3.msra.mxu1 %v406_v50 }
 0x2c7   :  { %2038 = vmatprep.subr.mxu1 %v2235_v8 }
 0x2c9   :  { %v736_v55 = vpop.permute.xlu1 %735 }
 0x2cc   :  { %v2385_v52 = vpop.eup %2191 }
 0x2cd   :  { %2026 = vmatmul.mubr.msk.f32.vlgmr.msra.gmra.mrb[0].mxu0 %vm159_vm2, %v2385_v52  ;;  %v818_v4 = vpop.permute.xlu1 %817 }
 0x2ce   :  { %2034 = vmatpush3.xpose.msk.msra.mxu0 %vm159_vm2, %v488_v41  ;;  %2035 = vmatprep.mubr.msk.f32.mxu0 %vm2236_vm1, %v2235_v8 }
 0x2cf   :  { %2043 = vmatprep.subr.mxu0 %v2235_v8 }
 0x2d0   :  { %v2393_v53 = vpop.eup %2193 }
 0x2d1   :  { %2031 = vmatmul.mubr.msk.f32.vlgmr.msra.gmra.mrb[6].mxu1 %vm159_vm2, %v2393_v53  ;;  %2036 = vmatmul.mubr.msk.f32.vlgmr.msra.gmra.mrb[2].mxu0 %vm159_vm2, %v486_v49 }
 0x2d2   :  { %2039 = vmatpush3.xpose.msk.msra.mxu1 %vm159_vm2, %v566_v44  ;;  %2044 = vmatpush3.msra.mxu0 %v660_v54 }
 0x2d3   :  { %2040 = vmatprep.mubr.msk.f32.mxu1 %vm2236_vm1, %v2235_v8  ;;  %2048 = vmatprep.subr.mxu1 %v2235_v8 }
 0x2d4   :  { %2045 = vmatprep.mubr.msk.f32.mxu0 %vm2236_vm1, %v2235_v8  ;;  %2053 = vmatprep.subr.mxu0 %v2235_v8 }
 0x2d5   :  { %2041 = vmatmul.mubr.msk.f32.vlgmr.msra.gmra.mrb[8].mxu1 %vm159_vm2, %v564_v51 }
 0x2d6   :  { %2049 = vmatpush3.msra.mxu1 %v736_v55  ;;  %2050 = vmatprep.mubr.msk.f32.mxu1 %vm2236_vm1, %v2235_v8 }
 0x2d7   :  { %2058 = vmatprep.subr.mxu1 %v2235_v8 }
 0x3a0   :  { %v2409_v56 = vpop.f32.mrb[0].mxu0 }
 0x3a1   :  { %v2027_v57 = vpop.f32.mrb[1].mxu0 }
 0x3a4   :  { %v2411_v58 = vpop.f32.mrb[6].mxu1  ;;  %v559_v59 = vpop.f32.mrb[2].mxu0 }
 0x3a5   :  { %v560_v60 = vadd.f32 %v559_v59, %v2369_v30  ;;  %v2032_v61 = vpop.f32.mrb[7].mxu1  ;;  %v2037_v62 = vpop.f32.mrb[3].mxu0 }
 0x3a7   :  { %v641_v63 = vsel %vm159_vm2, %v560_v60, -inf }
 0x3a8   :  { %642 = vmax.xlane.f32.xlu1 %v641_v63  ;;  %v637_v0 = vpop.f32.mrb[8].mxu1 }
 0x3a9   :  { %v638_v1 = vadd.f32 %v637_v0, %v2373_v35  ;;  %v2042_v2 = vpop.f32.mrb[9].mxu1 }
 0x3ab   :  { %v644_v3 = vsel %vm159_vm2, %v638_v1, -inf }
 0x3ac   :  { %645 = vmax.xlane.f32.xlu0 %v644_v3 }
 0x3b9   :  { %815 = vrot.lane.b32.xlu1 %v2336_v16, %s2244_s20 }
 0x3bd   :  { %1065 = vrot.lane.b32.xlu1 %v2339_v17, %s2245_s21 }
 0x3c1   :  { %1147 = vrot.lane.b32.xlu1 %v2336_v16, %s2246_s22 }
 0x3c2   :  { %895 = vrot.lane.b32.xlu0 %v2339_v17, %s2243_s1 }
 0x3c6   :  { %893 = vrot.lane.b32.xlu0 %v2339_v17, %s2244_s20 }
 0x3ca   :  { %989 = vrot.lane.b32.xlu0 %v2336_v16, %s2245_s21 }
 0x435   :  { %v643_v6 = vpop.xlane.xlu1 %642 }
 0x436   :  { %v647_v9 = vsub.f32 %v560_v60, %v643_v6 }
 0x438   :  { %v649_v13 = vmul.f32 1.442695, %v647_v9 }
 0x439   :  { %v646_v14 = vpop.xlane.xlu0 %645  ;;  %v816_v22 = vpop.permute.xlu1 %815 }
 0x43a   :  { %2195 = vpow2.f32 %v649_v13  ;;  %v648_v15 = vsub.f32 %v638_v1, %v646_v14 }
 0x43c   :  { %v651_v18 = vmul.f32 1.442695, %v648_v15 }
 0x43d   :  { %v896_v19 = vpop.permute.xlu0 %895  ;;  %v1066_v25 = vpop.permute.xlu1 %1065 }
 0x43e   :  { %2197 = vpow2.f32 %v651_v18 }
 0x441   :  { %v894_v20 = vpop.permute.xlu0 %893  ;;  %v1148_v40 = vpop.permute.xlu1 %1147 }
 0x444   :  { %v2425_v21 = vpop.eup %2195 }
 0x445   :  { %2046 = vmatmul.mubr.msk.f32.vlgmr.msra.gmra.mrb[4].mxu0 %vm159_vm2, %v2425_v21  ;;  %v990_v24 = vpop.permute.xlu0 %989 }
 0x446   :  { %2054 = vmatpush3.xpose.msk.msra.mxu0 %vm159_vm2, %v818_v4  ;;  %2055 = vmatprep.mubr.msk.f32.mxu0 %vm2236_vm1, %v2235_v8 }
 0x447   :  { %2063 = vmatprep.subr.mxu0 %v2235_v8 }
 0x448   :  { %v2433_v23 = vpop.eup %2197 }
 0x449   :  { %2051 = vmatmul.mubr.msk.f32.vlgmr.msra.gmra.mrb[10].mxu1 %vm159_vm2, %v2433_v23  ;;  %2056 = vmatmul.mubr.msk.f32.vlgmr.msra.gmra.mrb[6].mxu0 %vm159_vm2, %v816_v22  ;;  %v656_v4 = vsel %vm159_vm2, %v2433_v23, 0.0  ;;  %v323_v22 = vsel %vm159_vm2, %v2385_v52, 0.0 }
 0x44a   :  { %2059 = vmatpush3.xpose.msk.msra.mxu1 %vm159_vm2, %v896_v19  ;;  %2064 = vmatpush3.msra.mxu0 %v990_v24  ;;  %v326_v24 = vsel %vm159_vm2, %v2393_v53, 0.0 }
 0x44b   :  { %2060 = vmatprep.mubr.msk.f32.mxu1 %vm2236_vm1, %v2235_v8  ;;  %2068 = vmatprep.subr.mxu1 %v2235_v8 }
 0x44c   :  { %2065 = vmatprep.mubr.msk.f32.mxu0 %vm2236_vm1, %v2235_v8  ;;  %2073 = vmatprep.subr.mxu0 %v2235_v8 }
 0x44d   :  { %2061 = vmatmul.mubr.msk.f32.vlgmr.msra.gmra.mrb[12].mxu1 %vm159_vm2, %v894_v20 }
 0x44e   :  { %2069 = vmatpush3.msra.mxu1 %v1066_v25  ;;  %2070 = vmatprep.mubr.msk.f32.mxu1 %vm2236_vm1, %v2235_v8 }
 0x44f   :  { %2078 = vmatprep.subr.mxu1 %v2235_v8 }
 0x518   :  { %v2449_v26 = vpop.f32.mrb[4].mxu0 }
 0x519   :  { %v2047_v27 = vpop.f32.mrb[5].mxu0 }
 0x51c   :  { %v2451_v28 = vpop.f32.mrb[10].mxu1  ;;  %v889_v29 = vpop.f32.mrb[6].mxu0 }
 0x51d   :  { %v890_v31 = vadd.f32 %v889_v29, %v2369_v30  ;;  %v2052_v32 = vpop.f32.mrb[11].mxu1  ;;  %v2057_v33 = vpop.f32.mrb[7].mxu0 }
 0x51f   :  { %v971_v34 = vsel %vm159_vm2, %v890_v31, -inf }
 0x520   :  { %972 = vmax.xlane.f32.xlu1 %v971_v34  ;;  %v967_v36 = vpop.f32.mrb[12].mxu1 }
 0x521   :  { %v968_v37 = vadd.f32 %v967_v36, %v2373_v35  ;;  %v2062_v38 = vpop.f32.mrb[13].mxu1 }
 0x523   :  { %v974_v39 = vsel %vm159_vm2, %v968_v37, -inf }
 0x524   :  { %975 = vmax.xlane.f32.xlu0 %v974_v39  ;;  %v1507_v39 = vld [vmem:[%s2606_s3] sm:$0xff] }
 0x531   :  { %1145 = vrot.lane.b32.xlu1 %v2336_v16, %s2247_s23 }
 0x53a   :  { %1225 = vrot.lane.b32.xlu0 %v2339_v17, %s2246_s22 }
 0x53e   :  { %1223 = vrot.lane.b32.xlu0 %v2339_v17, %s2247_s23 }
 0x5ad   :  { %v973_v41 = vpop.xlane.xlu1 %972 }
 0x5ae   :  { %v977_v42 = vsub.f32 %v890_v31, %v973_v41 }
 0x5b0   :  { %v979_v43 = vmul.f32 1.442695, %v977_v42  ;;  %v1510_v42 = vld [vmem:[%s2606_s3 + $0x18] sm:$0xff] }
 0x5b1   :  { %v976_v44 = vpop.xlane.xlu0 %975  ;;  %v1146_v50 = vpop.permute.xlu1 %1145 }
 0x5b2   :  { %2199 = vpow2.f32 %v979_v43  ;;  %v978_v45 = vsub.f32 %v968_v37, %v976_v44 }
 0x5b4   :  { %v981_v46 = vmul.f32 1.442695, %v978_v45 }
 0x5b5   :  { %v1226_v48 = vpop.permute.xlu0 %1225 }
 0x5b6   :  { %2201 = vpow2.f32 %v981_v46 }
 0x5b9   :  { %v1224_v51 = vpop.permute.xlu0 %1223 }
 0x5bc   :  { %v2200_v47 = vpop.eup %2199 }
 0x5bd   :  { %2066 = vmatmul.mubr.msk.f32.vlgmr.msra.gmra.mrb[8].mxu0 %vm159_vm2, %v2200_v47 }
 0x5be   :  { %2074 = vmatpush3.xpose.msk.msra.mxu0 %vm159_vm2, %v1148_v40  ;;  %2075 = vmatprep.mubr.msk.f32.mxu0 %vm2236_vm1, %v2235_v8 }
 0x5bf   :  { %2083 = vmatprep.subr.mxu0 %v2235_v8 }
 0x5c0   :  { %v2202_v49 = vpop.eup %2201 }
 0x5c1   :  { %2071 = vmatmul.mubr.msk.f32.vlgmr.msra.gmra.mrb[14].mxu1 %vm159_vm2, %v2202_v49  ;;  %2076 = vmatmul.mubr.msk.f32.vlgmr.msra.gmra.mrb[10].mxu0 %vm159_vm2, %v1146_v50 }
 0x5c2   :  { %2079 = vmatpush3.xpose.msk.msra.mxu1 %vm159_vm2, %v1226_v48  ;;  %2080 = vmatprep.mubr.msk.f32.mxu1 %vm2236_vm1, %v2235_v8 }
 0x5c3   :  { %2088 = vmatprep.subr.mxu1 %v2235_v8  ;;  %2085 = vmatprep.mubr.msk.f32.mxu0 %vm2236_vm1, %v2235_v8 }
 0x5c5   :  { %2081 = vmatmul.mubr.msk.f32.vlgmr.msra.gmra.mrb[16].mxu1 %vm159_vm2, %v1224_v51 }
 0x5c6   :  { %2090 = vmatprep.mubr.msk.f32.mxu1 %vm2236_vm1, %v2235_v8  ;;  %v653_v8 = vsel %vm159_vm2, %v2425_v21, 0.0 }
 0x690   :  { %v2477_v54 = vpop.f32.mrb[8].mxu0 }
 0x691   :  { %v2067_v55 = vpop.f32.mrb[9].mxu0 }
 0x694   :  { %v1137_v57 = vpop.f32.mrb[14].mxu1  ;;  %v1219_v59 = vpop.f32.mrb[10].mxu0 }
 0x695   :  { %v1220_v60 = vadd.f32 %v1219_v59, %v2369_v30  ;;  %v2072_v61 = vpop.f32.mrb[15].mxu1  ;;  %v2077_v62 = vpop.f32.mrb[11].mxu0  ;;  %v986_v30 = vsel %vm159_vm2, %v2202_v49, 0.0 }
 0x697   :  { %v1301_v63 = vsel %vm159_vm2, %v1220_v60, -inf }
 0x698   :  { %1302 = vmax.xlane.f32.xlu1 %v1301_v63  ;;  %v1297_v0 = vpop.f32.mrb[16].mxu1 }
 0x699   :  { %v1298_v1 = vadd.f32 %v1297_v0, %v2373_v35  ;;  %v2082_v2 = vpop.f32.mrb[17].mxu1  ;;  %v983_v35 = vsel %vm159_vm2, %v2200_v47, 0.0 }
 0x69b   :  { %v1304_v3 = vsel %vm159_vm2, %v1298_v1, -inf }
 0x69c   :  { %1305 = vmax.xlane.f32.xlu0 %v1304_v3 }
 0x6a9   :  { %1395 = vrot.lane.b32.xlu1 %v2339_v17, %s2248_s24 }
 0x6b2   :  { %1319 = vrot.lane.b32.xlu0 %v2336_v16, %s2248_s24 }
 0x6cd   :  { %654 = vadd.xlane.f32.xlu1 %v653_v8 }
 0x6d1   :  { %987 = vadd.xlane.f32.xlu1 %v986_v30  ;;  %657 = vadd.xlane.f32.xlu0 %v656_v4 }
 0x6d5   :  { %984 = vadd.xlane.f32.xlu0 %v983_v35 }
 0x725   :  { %v1303_v6 = vpop.xlane.xlu1 %1302 }
 0x726   :  { %v1307_v9 = vsub.f32 %v1220_v60, %v1303_v6 }
 0x728   :  { %v1309_v13 = vmul.f32 1.442695, %v1307_v9 }
 0x729   :  { %v1396_v17 = vpop.permute.xlu1 %1395  ;;  %v1306_v14 = vpop.xlane.xlu0 %1305 }
 0x72a   :  { %2203 = vpow2.f32 %v1309_v13  ;;  %v1308_v16 = vsub.f32 %v1298_v1, %v1306_v14  ;;  %2089 = vmatpush3.msra.mxu1 %v1396_v17 }
 0x72c   :  { %v1311_v15 = vmul.f32 1.442695, %v1308_v16 }
 0x72d   :  { %v1320_v18 = vpop.permute.xlu0 %1319 }
 0x72e   :  { %2205 = vpow2.f32 %v1311_v15  ;;  %2084 = vmatpush3.msra.mxu0 %v1320_v18 }
 0x734   :  { %v2204_v19 = vpop.eup %2203 }
 0x735   :  { %2086 = vmatmul.mubr.msk.f32.vlgmr.msra.gmra.mrb[12].mxu0 %vm159_vm2, %v2204_v19  ;;  %v1313_v20 = vsel %vm159_vm2, %v2204_v19, 0.0 }
 0x736   :  { %1314 = vadd.xlane.f32.xlu0 %v1313_v20 }
 0x738   :  { %v2206_v21 = vpop.eup %2205 }
 0x739   :  { %2091 = vmatmul.mubr.msk.f32.vlgmr.msra.gmra.mrb[18].mxu1 %vm159_vm2, %v2206_v21  ;;  %v1316_v23 = vsel %vm159_vm2, %v2206_v21, 0.0 }
 0x73a   :  { %324 = vadd.xlane.f32.xlu0 %v323_v22  ;;  %1317 = vadd.xlane.f32.xlu1 %v1316_v23 }
 0x73e   :  { %327 = vadd.xlane.f32.xlu1 %v326_v24 }
 0x75a   :  { %v655_v25 = vpop.xlane.xlu1 %654 }
 0x75b   :  { %2207 = vrcp.f32 %v655_v25 }
 0x75e   :  { %v988_v27 = vpop.xlane.xlu1 %987  ;;  %v658_v29 = vpop.xlane.xlu0 %657 }
 0x75f   :  { %2209 = vrcp.f32 %v988_v27 }
 0x760   :  { %2211 = vrcp.f32 %v658_v29 }
 0x762   :  { %v985_v31 = vpop.xlane.xlu0 %984 }
 0x763   :  { %2213 = vrcp.f32 %v985_v31 }
 0x765   :  { %v2208_v32 = vpop.eup %2207 }
 0x766   :  { %v812_v33 = vmul.f32 %v2208_v32, %v2449_v26  ;;  %v1508_v26 = vld [vmem:[%s2606_s3 + $0x8] sm:$0xff] }
 0x767   :  { %v2142_v40 = vpack.c.bf16 %v1508_v26, %v1507_v39  ;;  %v1731_v39 = vld [vmem:[%s2608_s5 + $0x8] sm:$0xff]  ;;  %v1732_v26 = vld [vmem:[%s2608_s5 + $0x10] sm:$0xff] }
 0x768   :  { %1477 = vrot.lane.b32.xlu0 %v812_v33, %s2249_s25  ;;  %v1639_v33 = vld [vmem:[%s2607_s4] sm:$0xff] }
 0x769   :  { %v2210_v52 = vpop.eup %2209  ;;  %2143 = vmatprep.subr.bf16.mxu0 %v2142_v40 }
 0x76a   :  { %v2212_v34 = vpop.eup %2211  ;;  %v1144_v36 = vmul.f32 %v2210_v52, %v1137_v57  ;;  %2145 = vmatpush3.bf16.msra.mxu0 %v2142_v40  ;;  %v1640_v52 = vld [vmem:[%s2607_s4 + $0x8] sm:$0xff] }
 0x76b   :  { %v814_v37 = vmul.f32 %v2212_v34, %v2451_v28  ;;  %v1509_v28 = vld [vmem:[%s2606_s3 + $0x10] sm:$0xff]  ;;  %v2150_v34 = vpack.c.bf16 %v1640_v52, %v1639_v33 }
 0x76c   :  { %1487 = vrot.lane.b32.xlu0 %v1144_v36, %s2250_s26  ;;  %v2146_v43 = vpack.c.bf16 %v1510_v42, %v1509_v28  ;;  %v1641_v36 = vld [vmem:[%s2607_s4 + $0x10] sm:$0xff]  ;;  %v1734_v42 = vld [vmem:[%s2608_s5 + $0x20] sm:$0xff] }
 0x76d   :  { %v2214_v53 = vpop.eup %2213  ;;  %1479 = vrot.lane.b32.xlu1 %v814_v37, %s2249_s25  ;;  %v1642_v37 = vld [vmem:[%s2607_s4 + $0x18] sm:$0xff]  ;;  %2151 = vmatprep.subr.bf16.mxu1 %v2150_v34 }
 0x76e   :  { %v1142_v38 = vmul.f32 %v2214_v53, %v2477_v54  ;;  %2147 = vmatprep.subr.bf16.mxu0 %v2146_v43  ;;  %v2154_v53 = vpack.c.bf16 %v1642_v37, %v1641_v36  ;;  %2153 = vmatpush3.bf16.msra.mxu1 %v2150_v34 }
 0x76f   :  { %2149 = vmatpush3.bf16.msra.mxu0 %v2146_v43  ;;  %v1735_v43 = vld [vmem:[%s2608_s5 + $0x28] sm:$0xff] }
 0x770   :  { %2155 = vmatprep.subr.bf16.mxu1 %v2154_v53 }
 0x771   :  { %1485 = vrot.lane.b32.xlu1 %v1142_v38, %s2250_s26  ;;  %v1730_v38 = vld [vmem:[%s2608_s5] sm:$0xff] }
 0x772   :  { %2157 = vmatpush3.bf16.msra.mxu1 %v2154_v53  ;;  %v2158_v40 = vpack.c.bf16 %v1731_v39, %v1730_v38 }
 0x774   :  { %2159 = vmatprep.subr.bf16.mxu0 %v2158_v40 }
 0x7c3   :  { %v1315_v41 = vpop.xlane.xlu0 %1314 }
 0x7c4   :  { %2215 = vrcp.f32 %v1315_v41  ;;  %v1733_v41 = vld [vmem:[%s2608_s5 + $0x18] sm:$0xff] }
 0x7c5   :  { %v2162_v28 = vpack.c.bf16 %v1733_v41, %v1732_v26  ;;  %v1856_v41 = vsub.s32 6, %v2320_v10 }
 0x7c7   :  { %v1318_v44 = vpop.xlane.xlu1 %1317  ;;  %v325_v55 = vpop.xlane.xlu0 %324 }
 0x7c8   :  { %2217 = vrcp.f32 %v1318_v44  ;;  %v2166_v44 = vpack.c.bf16 %v1735_v43, %v1734_v42  ;;  %v1857_v42 = vrot.slane %v2332_v12, %v1856_v41 }
 0x7c9   :  { %2219 = vrcp.f32 %v325_v55 }
 0x7cb   :  { %v328_v57 = vpop.xlane.xlu1 %327 }
 0x7cc   :  { %2221 = vrcp.f32 %v328_v57 }
 0x7ce   :  { %v2216_v45 = vpop.eup %2215 }
 0x7d2   :  { %v2218_v49 = vpop.eup %2217 }
 0x7d3   :  { %v2220_v60 = vpop.eup %2219 }
 0x7d4   :  { %v482_v0 = vmul.f32 %v2220_v60, %v2409_v56  ;;  %v1596_v56 = vsub.s32 1, %v2320_v10 }
 0x7d6   :  { %v2222_v62 = vpop.eup %2221 }
 0x7d7   :  { %v484_v2 = vmul.f32 %v2222_v62, %v2411_v58  ;;  %v1597_v58 = vrot.slane %v2332_v12, %v1596_v56 }
 0x7da   :  { %v1478_v61 = vpop.permute.xlu0 %1477 }
 0x7db   :  { %v1499_v1 = vsel %vm159_vm2, %v482_v0, %v1478_v61 }
 0x7de   :  { %v1488_v3 = vpop.permute.xlu0 %1487 }
 0x7df   :  { %v1480_v59 = vpop.permute.xlu1 %1479 }
 0x7e0   :  { %v1500_v4 = vsel %vm159_vm2, %v484_v2, %v1480_v59 }
 0x7e1   :  { %v1503_v6 = vsel %vm1501_vm5, %v1500_v4, %v1488_v3  ;;  %v1736_v3 = vld [vmem:[%s2608_s5 + $0x30] sm:$0xff]  ;;  %v1645_v4 = vsub.s32 4, %v2320_v10 }
 0x7e3   :  { %v1486_v63 = vpop.permute.xlu1 %1485 }
 0x7e4   :  { %v1502_v8 = vsel %vm1501_vm5, %v1499_v1, %v1486_v63 }
 0x808   :  { %v1391_v46 = vpop.f32.mrb[12].mxu0 }
 0x809   :  { %v1472_v47 = vmul.f32 %v2216_v45, %v1391_v46  ;;  %v2087_v48 = vpop.f32.mrb[13].mxu0 }
 0x80b   :  { %1493 = vrot.lane.b32.xlu1 %v1472_v47, %s2251_s12 }
 0x80c   :  { %v1467_v50 = vpop.f32.mrb[18].mxu1 }
 0x80d   :  { %v1474_v51 = vmul.f32 %v2218_v49, %v1467_v50  ;;  %v2092_v54 = vpop.f32.mrb[19].mxu1 }
 0x80e   :  { %v1635_v54 = vsub.s32 3, %v2320_v10 }
 0x80f   :  { %1495 = vrot.lane.b32.xlu0 %v1474_v51, %s2251_s12  ;;  %v1629_v51 = vsub.s32 2, %v2320_v10 }
 0x810   :  { %v1636_v62 = vrot.slane %v2332_v12, %v1635_v54 }
 0x811   :  { %v1630_v55 = vrot.slane %v2332_v12, %v1629_v51 }
 0x87d   :  { %v1494_v30 = vpop.permute.xlu1 %1493 }
 0x87e   :  { %v1505_v35 = vsel %vm1504_vm4, %v1502_v8, %v1494_v30  ;;  %v1737_v8 = vld [vmem:[%s2608_s5 + $0x38] sm:$0xff] }
 0x87f   :  { %2101 = vmatprep.mubr.msk.f32.mxu0 %vm38_vm0, %v1505_v35  ;;  %v2170_v30 = vpack.c.bf16 %v1737_v8, %v1736_v3  ;;  %v1646_v35 = vrot.slane %v2332_v12, %v1645_v4 }
 0x881   :  { %v1496_v9 = vpop.permute.xlu0 %1495 }
 0x882   :  { %v1506_v13 = vsel %vm1504_vm4, %v1503_v6, %v1496_v9 }
 0x883   :  { %2102 = vmatmul.mubr.msk.f32.vlgmr.msra.gmra.mrb[14].mxu0 %vm38_vm0, %v1506_v13 }
 0x884   :  { %2161 = vmatpush3.bf16.msra.mxu0 %v2158_v40 }
 0x885   :  { %2163 = vmatprep.subr.bf16.mxu0 %v2162_v28 }
 0x888   :  { %2165 = vmatpush3.bf16.msra.mxu0 %v2162_v28  ;;  %v1862_v28 = vsub.s32 7, %v2320_v10 }
 0x889   :  { %2167 = vmatprep.subr.bf16.mxu0 %v2166_v44 }
 0x88c   :  { %2169 = vmatpush3.bf16.msra.mxu0 %v2166_v44 }
 0x88d   :  { %2171 = vmatprep.subr.bf16.mxu0 %v2170_v30 }
 0x890   :  { %2173 = vmatpush3.bf16.msra.mxu0 %v2170_v30 }
 0x956   :  { %v2103_v17 = vpop.f32.mrb[14].mxu0 }
 0x957   :  { %v1593_v14 = vadd.f32 %v2103_v17, %v2314_v7  ;;  %v1583_v16 = vpop.f32.mrb[15].mxu0 }
 0x958   :  { %v1592_v15 = vadd.f32 %v1583_v16, %v2307_v5  ;;  %v1824_v16 = vsub.s32 5, %v2320_v10 }
 0x959   :  { %v1599_v18 = vadd.f32 %v1597_v58, %v1593_v14 }
 0x95a   :  { %v1598_v19 = vadd.f32 %v1597_v58, %v1592_v15  ;;  %v1825_v15 = vrot.slane %v2332_v12, %v1824_v16 }
 0x95b   :  { %v1603_v20 = vsel %vm38_vm0, %v1599_v18, 0.0 }
 0x95c   :  { %1604 = vadd.xlane.f32.xlu0 %v1603_v20  ;;  %v1600_v21 = vsel %vm38_vm0, %v1598_v19, 0.0 }
 0x95d   :  { %1601 = vadd.xlane.f32.xlu1 %v1600_v21 }
 0x9e9   :  { %v1605_v22 = vpop.xlane.xlu0 %1604 }
 0x9ea   :  { %v1608_v23 = vmul.f32 0.03125, %v1605_v22  ;;  %v1602_v24 = vpop.xlane.xlu1 %1601 }
 0x9eb   :  { %v1607_v25 = vmul.f32 0.03125, %v1602_v24 }
 0x9ec   :  { %v1610_v27 = vsub.f32 %v1599_v18, %v1608_v23 }
 0x9ed   :  { %v1609_v29 = vsub.f32 %v1598_v19, %v1607_v25 }
 0x9ee   :  { %v1612_v31 = vmul.f32 %v1610_v27, %v1610_v27 }
 0x9ef   :  { %v1611_v32 = vmul.f32 %v1609_v29, %v1609_v29 }
 0x9f0   :  { %v1616_v7 = vsel %vm38_vm0, %v1612_v31, 0.0 }
 0x9f1   :  { %1617 = vadd.xlane.f32.xlu1 %v1616_v7  ;;  %v1613_v5 = vsel %vm38_vm0, %v1611_v32, 0.0 }
 0x9f2   :  { %1614 = vadd.xlane.f32.xlu0 %v1613_v5 }
 0xa7e   :  { %v1618_v45 = vpop.xlane.xlu1 %1617 }
 0xa7f   :  { %v1620_v46 = vmul.f32 0.03125, %v1618_v45  ;;  %v1615_v47 = vpop.xlane.xlu0 %1614 }
 0xa80   :  { %v1619_v48 = vmul.f32 0.03125, %v1615_v47 }
 0xa81   :  { %v1622_v49 = vadd.f32 1e-05, %v1620_v46  ;;  %v1863_v46 = vrot.slane %v2332_v12, %v1862_v28 }
 0xa82   :  { %v1621_v50 = vadd.f32 1e-05, %v1619_v48 }
 0xa83   :  { %2223 = vrsqrt.f32 %v1622_v49 }
 0xa84   :  { %2225 = vrsqrt.f32 %v1621_v50 }
 0xa8d   :  { %v2224_v57 = vpop.eup %2223 }
 0xa8e   :  { %v2226_v59 = vpop.eup %2225  ;;  %v1626_v60 = vmul.f32 %v2224_v57, %v1610_v27 }
 0xa8f   :  { %v1625_v61 = vmul.f32 %v2226_v59, %v1609_v29 }
 0xa90   :  { %v1632_v63 = vmul.f32 %v1630_v55, %v1626_v60 }
 0xa91   :  { %v1631_v0 = vmul.f32 %v1630_v55, %v1625_v61 }
 0xa92   :  { %v1638_v2 = vadd.f32 %v1636_v62, %v1632_v63 }
 0xa93   :  { %v1637_v1 = vadd.f32 %v1636_v62, %v1631_v0 }
 0xa95   :  { %2112 = vmatprep.mubr.msk.f32.mxu1 %vm38_vm0, %v1637_v1 }
 0xa96   :  { %2113 = vmatmul.mubr.msk.f32.vlgmr.msra.gmra.mrb[20].mxu1 %vm38_vm0, %v1638_v2 }
 0xb69   :  { %v2114_v6 = vpop.f32.mrb[20].mxu1 }
 0xb6a   :  { %v1725_v9 = vadd.f32 %v2114_v6, %v1646_v35  ;;  %v1719_v13 = vpop.f32.mrb[21].mxu1 }
 0xb6b   :  { %v1720_v58 = vadd.f32 %v1719_v13, %v1646_v35 }
 0xb6c   :  { %v1729_v14 = vmax.f32 %v1725_v9, 0.0  ;;  %v29_v9 = vld [vmem:[%s2604_s6 + $0x8] sm:$0x3] }
 0xb6d   :  { %v1728_v17 = vmax.f32 %v1720_v58, 0.0  ;;  %v1895_v13 = vrot.slane %v29_v9, %v2327_v11 }
 0xb6f   :  { %2131 = vmatprep.mubr.msk.f32.mxu0 %vm1738_vm6, %v1728_v17 }
 0xb70   :  { %2132 = vmatmul.mubr.msk.f32.vlgmr.msra.gmra.mrb[16].mxu0 %vm1738_vm6, %v1729_v14  ;;  %v1901_v14 = vrot.slane %v29_v9, %v1596_v56 }
 0xc43   :  { %v2133_v18 = vpop.f32.mrb[16].mxu0 }
 0xc44   :  { %v1821_v19 = vadd.f32 %v2133_v18, %v1638_v2  ;;  %v1811_v20 = vpop.f32.mrb[17].mxu0 }
 0xc45   :  { %v1820_v21 = vadd.f32 %v1811_v20, %v1637_v1 }
 0xc46   :  { %v1827_v22 = vadd.f32 %v1825_v15, %v1821_v19 }
 0xc47   :  { %v1826_v23 = vadd.f32 %v1825_v15, %v1820_v21 }
 0xc48   :  { %v1831_v24 = vsel %vm38_vm0, %v1827_v22, 0.0 }
 0xc49   :  { %1832 = vadd.xlane.f32.xlu1 %v1831_v24  ;;  %v1828_v25 = vsel %vm38_vm0, %v1826_v23, 0.0 }
 0xc4a   :  { %1829 = vadd.xlane.f32.xlu0 %v1828_v25 }
 0xcd6   :  { %v1833_v27 = vpop.xlane.xlu1 %1832 }
 0xcd7   :  { %v1835_v29 = vmul.f32 0.03125, %v1833_v27  ;;  %v1830_v31 = vpop.xlane.xlu0 %1829 }
 0xcd8   :  { %v1834_v32 = vmul.f32 0.03125, %v1830_v31 }
 0xcd9   :  { %v1837_v7 = vsub.f32 %v1827_v22, %v1835_v29 }
 0xcda   :  { %v1836_v5 = vsub.f32 %v1826_v23, %v1834_v32 }
 0xcdb   :  { %v1839_v33 = vmul.f32 %v1837_v7, %v1837_v7 }
 0xcdc   :  { %v1838_v52 = vmul.f32 %v1836_v5, %v1836_v5 }
 0xcdd   :  { %v1843_v34 = vsel %vm38_vm0, %v1839_v33, 0.0 }
 0xcde   :  { %1844 = vadd.xlane.f32.xlu1 %v1843_v34  ;;  %v1840_v36 = vsel %vm38_vm0, %v1838_v52, 0.0 }
 0xcdf   :  { %1841 = vadd.xlane.f32.xlu0 %v1840_v36 }
 0xd6b   :  { %v1845_v37 = vpop.xlane.xlu1 %1844 }
 0xd6c   :  { %v1847_v53 = vmul.f32 0.03125, %v1845_v37  ;;  %v1842_v38 = vpop.xlane.xlu0 %1841 }
 0xd6d   :  { %v1846_v39 = vmul.f32 0.03125, %v1842_v38 }
 0xd6e   :  { %v1849_v26 = vadd.f32 1e-05, %v1847_v53 }
 0xd6f   :  { %v1848_v40 = vadd.f32 1e-05, %v1846_v39 }
 0xd70   :  { %2227 = vrsqrt.f32 %v1849_v26 }
 0xd71   :  { %2229 = vrsqrt.f32 %v1848_v40 }
 0xd7a   :  { %v2228_v43 = vpop.eup %2227 }
 0xd7b   :  { %v2230_v44 = vpop.eup %2229  ;;  %v1853_v45 = vmul.f32 %v2228_v43, %v1837_v7 }
 0xd7c   :  { %v1852_v47 = vmul.f32 %v2230_v44, %v1836_v5 }
 0xd7d   :  { %v1859_v48 = vmul.f32 %v1857_v42, %v1853_v45 }
 0xd7e   :  { %v1858_v49 = vmul.f32 %v1857_v42, %v1852_v47 }
 0xd7f   :  { %v1865_v50 = vadd.f32 %v1863_v46, %v1859_v48 }
 0xd80   :  { %v1864_v51 = vadd.f32 %v1863_v46, %v1858_v49 }
 0xd81   :  { %v1869_v54 = vsel %vm38_vm0, %v1865_v50, 0.0 }
 0xd82   :  { %1870 = vadd.xlane.f32.xlu1 %v1869_v54  ;;  %v1866_v55 = vsel %vm38_vm0, %v1864_v51, 0.0 }
 0xd83   :  { %1867 = vadd.xlane.f32.xlu0 %v1866_v55 }
 0xe0f   :  { %v1871_v57 = vpop.xlane.xlu1 %1870 }
 0xe10   :  { %v1873_v59 = vmul.f32 0.03125, %v1871_v57  ;;  %v1868_v60 = vpop.xlane.xlu0 %1867 }
 0xe11   :  { %v1872_v61 = vmul.f32 0.03125, %v1868_v60 }
 0xe12   :  { %v1875_v62 = vsub.f32 %v1865_v50, %v1873_v59 }
 0xe13   :  { %v1874_v63 = vsub.f32 %v1864_v51, %v1872_v61 }
 0xe14   :  { %v1877_v0 = vmul.f32 %v1875_v62, %v1875_v62 }
 0xe15   :  { %v1876_v1 = vmul.f32 %v1874_v63, %v1874_v63 }
 0xe16   :  { %v1881_v12 = vsel %vm38_vm0, %v1877_v0, 0.0 }
 0xe17   :  { %1882 = vadd.xlane.f32.xlu1 %v1881_v12  ;;  %v1878_v2 = vsel %vm38_vm0, %v1876_v1, 0.0 }
 0xe18   :  { %1879 = vadd.xlane.f32.xlu0 %v1878_v2 }
 0xea4   :  { %v1883_v3 = vpop.xlane.xlu1 %1882 }
 0xea5   :  { %v1885_v8 = vmul.f32 0.03125, %v1883_v3  ;;  %v1880_v30 = vpop.xlane.xlu0 %1879 }
 0xea6   :  { %v1884_v4 = vmul.f32 0.03125, %v1880_v30 }
 0xea7   :  { %v1887_v35 = vadd.f32 1e-05, %v1885_v8 }
 0xea8   :  { %v1886_v6 = vadd.f32 1e-05, %v1884_v4 }
 0xea9   :  { %2231 = vrsqrt.f32 %v1887_v35 }
 0xeaa   :  { %2233 = vrsqrt.f32 %v1886_v6 }
 0xeb3   :  { %v2232_v58 = vpop.eup %2231 }
 0xeb4   :  { %v2234_v17 = vpop.eup %2233  ;;  %v1891_v16 = vmul.f32 %v2232_v58, %v1875_v62 }
 0xeb5   :  { %v1890_v15 = vmul.f32 %v2234_v17, %v1874_v63 }
 0xeb6   :  { %v1897_v18 = vmul.f32 %v1895_v13, %v1891_v16 }
 0xeb7   :  { %v1896_v19 = vmul.f32 %v1895_v13, %v1890_v15 }
 0xeb8   :  { %v1903_v20 = vadd.f32 %v1901_v14, %v1897_v18 }
 0xeb9   :  { %v1902_v21 = vadd.f32 %v1901_v14, %v1896_v19 }
 0xeba   :  { %1905 = vst.msk [vmem:[%s2609_s7 + $0x8] sm:$0xff] %vm38_vm0, %v1903_v20 }
 0xebb   :  { %1904 = vst.msk [vmem:[%s2609_s7] sm:$0xff] %vm38_vm0, %v1902_v21 }

// kernel: transformer_seq2seq.7
= control target key start
LH: loop header
LB: loop body
LE: loop exit
PB: predicated region body
PF: predicated region fallthrough
CT: control target
= control target key end

     0   :  { %vm49_vm0 = vcmask 261120   ;;  %v4082_v8 = vmov 0.0   ;;  %v45_v9 = vlaneseq  ;;  %vm4083_vm1 = vmmov 0   ;;  %s4084_s25 = smov 96   ;;  %s4085_s26 = smov 64   ;;  %s4728_s2 = inlined_call_operand.vmem [shape: f32[32,96], index: 2, kind: input, shape index: {}]   ;;  %s4729_s0 = inlined_call_operand.vmem [shape: f32[16,32], index: 0, kind: input, shape index: {}]   ;;  %s4730_s9 = inlined_call_operand.vmem [shape: f32[13,128], index: 9, kind: input, shape index: {}]   ;;  %s4731_s3 = inlined_call_operand.vmem [shape: f32[32,32], index: 3, kind: input, shape index: {}]   ;;  %s4732_s5 = inlined_call_operand.vmem [shape: f32[32,64], index: 5, kind: input, shape index: {}]   ;;  %s4733_s4 = inlined_call_operand.vmem [shape: f32[32,32], index: 4, kind: input, shape index: {}]   ;;  %s4734_s1 = inlined_call_operand.vmem [shape: f32[16,32], index: 1, kind: input, shape index: {}]   ;;  %s4735_s6 = inlined_call_operand.vmem [shape: f32[32,32], index: 6, kind: input, shape index: {}]   ;;  %s4736_s7 = inlined_call_operand.vmem [shape: f32[32,64], index: 7, kind: input, shape index: {}]   ;;  %s4737_s8 = inlined_call_operand.vmem [shape: f32[64,32], index: 8, kind: input, shape index: {}]   ;;  %s4738_s10 = inlined_call_operand.vmem [shape: f32[16,32], index: 10, kind: output, shape index: {}]  }
   0x1   :  { %v41_v0 = vld [vmem:[%s4728_s2] sm:$0xff]  ;;  %v42_v1 = vld [vmem:[%s4728_s2 + $0x8] sm:$0xff]  ;;  %v43_v2 = vld [vmem:[%s4728_s2 + $0x10] sm:$0xff]  ;;  %3701 = vmatprep.subr.mxu0 %v4082_v8  ;;  %3703 = vmatprep.mubr.msk.f32.mxu0 %vm4083_vm1, %v4082_v8  ;;  %s4086_s27 = smov 88   ;;  %s4087_s28 = smov 120   ;;  %vm140_vm2 = vcmask 64512  }
   0x2   :  { %v3925_v3 = vpack.c.bf16 %v42_v1, %v41_v0  ;;  %v44_v4 = vld [vmem:[%s4728_s2 + $0x18] sm:$0xff]  ;;  %v4168_v5 = vld [vmem:[%s4729_s0] sm:$0xff]  ;;  %v4175_v7 = vld [vmem:[%s4729_s0 + $0x8] sm:$0xff]  ;;  %v4181_v10 = vshrl.u32 %v45_v9, 7  ;;  %s4088_s29 = smov 56   ;;  %v134_v21 = vand.u32 127, %v45_v9 }
   0x3   :  { %v3929_v6 = vpack.c.bf16 %v44_v4, %v43_v2  ;;  %3688 = vmatprep.mubr.msk.f32.mxu1 %vm49_vm0, %v4168_v5  ;;  %v4191_v12 = vld [vmem:[%s4730_s9] sm:$0xff]  ;;  %s4089_s30 = smov 80   ;;  %s4090_s11 = smov 112   ;;  %vm1485_vm4 = vcmask 195584   ;;  %vm1482_vm5 = vcmask 130048   ;;  %vm3374_vm6 = vcmask 523264  }
   0x4   :  { %3926 = vmatprep.subr.bf16.mxu1 %v3925_v3  ;;  %v47_v11 = vsub.s32 0, %v4181_v10  ;;  %vm135_vm3 = vcmp.gt.s32.totalorder %v134_v21, %v4181_v10  ;;  %s4091_s12 = smov 48   ;;  %s4092_s13 = smov 72  }
   0x5   :  { %3928 = vmatpush3.bf16.msra.mxu1 %v3925_v3  ;;  %v4231_v22 = vsel %vm135_vm3, -1e+30, %v4082_v8  ;;  %s4093_s14 = smov 104   ;;  %s4094_s15 = smov 40  }
   0x6   :  { %3930 = vmatprep.subr.bf16.mxu1 %v3929_v6  ;;  %v48_v13 = vrot.slane %v4191_v12, %v47_v11  ;;  %s4095_s16 = smov 8   ;;  %s4096_s17 = smov 16  }
   0x7   :  { %s4097_s2 = smov 24  }
   0x9   :  { %3932 = vmatpush3.bf16.msra.mxu1 %v3929_v6 }
   0xa   :  { %3691 = vmatprep.subr.mxu1 %v4082_v8 }
   0xc   :  { %3689 = vmatmul.mubr.msk.f32.vlgmr.msra.gmra.mrb[0].mxu1 %vm49_vm0, %v4175_v7 }
   0xd   :  { %3693 = vmatprep.mubr.msk.f32.mxu1 %vm4083_vm1, %v4082_v8 }
  0xdf   :  { %v3690_v14 = vpop.f32.mrb[0].mxu1 }
  0xe0   :  { %v122_v15 = vpop.f32.mrb[1].mxu1  ;;  %v4200_v17 = vadd.f32 %v3690_v14, %v48_v13 }
  0xe1   :  { %v4196_v16 = vadd.f32 %v122_v15, %v48_v13 }
  0xe3   :  { %138 = vrot.lane.b32.xlu0 %v4196_v16, %s4084_s25 }
  0xe7   :  { %216 = vrot.lane.b32.xlu0 %v4200_v17, %s4084_s25 }
  0xeb   :  { %310 = vrot.lane.b32.xlu0 %v4196_v16, %s4085_s26 }
  0xef   :  { %468 = vrot.lane.b32.xlu0 %v4196_v16, %s4086_s27 }
  0xf3   :  { %546 = vrot.lane.b32.xlu0 %v4200_v17, %s4086_s27 }
  0xf7   :  { %466 = vrot.lane.b32.xlu0 %v4196_v16, %s4087_s28 }
  0xfb   :  { %544 = vrot.lane.b32.xlu0 %v4200_v17, %s4087_s28 }
  0xff   :  { %640 = vrot.lane.b32.xlu0 %v4196_v16, %s4088_s29 }
 0x155   :  { %v139_v18 = vpop.permute.xlu0 %138 }
 0x156   :  { %3692 = vmatpush3.xpose.msk.msra.mxu1 %vm140_vm2, %v139_v18 }
 0x157   :  { %3696 = vmatprep.subr.mxu1 %v4082_v8 }
 0x159   :  { %3694 = vmatmul.mubr.msk.f32.vlgmr.msra.gmra.mrb[2].mxu1 %vm140_vm2, %v4196_v16  ;;  %v217_v19 = vpop.permute.xlu0 %216 }
 0x15a   :  { %3697 = vmatpush3.xpose.msk.msra.mxu1 %vm140_vm2, %v217_v19  ;;  %3698 = vmatprep.mubr.msk.f32.mxu1 %vm4083_vm1, %v4082_v8 }
 0x15b   :  { %3706 = vmatprep.subr.mxu1 %v4082_v8 }
 0x15d   :  { %3699 = vmatmul.mubr.msk.f32.vlgmr.msra.gmra.mrb[4].mxu1 %vm140_vm2, %v4200_v17  ;;  %v311_v20 = vpop.permute.xlu0 %310 }
 0x15e   :  { %3702 = vmatpush3.msra.mxu0 %v311_v20  ;;  %3708 = vmatprep.mubr.msk.f32.mxu1 %vm4083_vm1, %v4082_v8 }
 0x15f   :  { %3711 = vmatprep.subr.mxu0 %v4082_v8 }
 0x161   :  { %v469_v31 = vpop.permute.xlu0 %468 }
 0x165   :  { %v547_v34 = vpop.permute.xlu0 %546 }
 0x169   :  { %v467_v39 = vpop.permute.xlu0 %466 }
 0x16d   :  { %v545_v41 = vpop.permute.xlu0 %544 }
 0x171   :  { %v641_v44 = vpop.permute.xlu0 %640 }
 0x22c   :  { %v211_v23 = vpop.f32.mrb[2].mxu1 }
 0x22d   :  { %v212_v24 = vadd.f32 %v211_v23, %v4231_v22  ;;  %v3695_v25 = vpop.f32.mrb[3].mxu1 }
 0x22f   :  { %v292_v26 = vsel %vm140_vm2, %v212_v24, -inf }
 0x230   :  { %293 = vmax.xlane.f32.xlu1 %v292_v26  ;;  %v288_v27 = vpop.f32.mrb[4].mxu1 }
 0x231   :  { %v289_v28 = vadd.f32 %v288_v27, %v4231_v22  ;;  %v3700_v29 = vpop.f32.mrb[5].mxu1 }
 0x233   :  { %v295_v30 = vsel %vm140_vm2, %v289_v28, -inf }
 0x234   :  { %296 = vmax.xlane.f32.xlu1 %v295_v30 }
 0x245   :  { %386 = vrot.lane.b32.xlu1 %v4200_v17, %s4085_s26 }
 0x249   :  { %716 = vrot.lane.b32.xlu1 %v4200_v17, %s4088_s29 }
 0x24d   :  { %798 = vrot.lane.b32.xlu1 %v4196_v16, %s4089_s30 }
 0x2bd   :  { %v294_v32 = vpop.xlane.xlu1 %293 }
 0x2be   :  { %v298_v33 = vsub.f32 %v212_v24, %v294_v32 }
 0x2c0   :  { %v300_v35 = vmul.f32 1.442695, %v298_v33 }
 0x2c1   :  { %v297_v36 = vpop.xlane.xlu1 %296 }
 0x2c2   :  { %4005 = vpow2.f32 %v300_v35  ;;  %v299_v37 = vsub.f32 %v289_v28, %v297_v36 }
 0x2c4   :  { %v302_v38 = vmul.f32 1.442695, %v299_v37 }
 0x2c5   :  { %v387_v40 = vpop.permute.xlu1 %386 }
 0x2c6   :  { %4007 = vpow2.f32 %v302_v38  ;;  %3707 = vmatpush3.msra.mxu1 %v387_v40 }
 0x2c7   :  { %3716 = vmatprep.subr.mxu1 %v4082_v8 }
 0x2c9   :  { %v717_v45 = vpop.permute.xlu1 %716 }
 0x2cc   :  { %v4244_v42 = vpop.eup %4005 }
 0x2cd   :  { %3704 = vmatmul.mubr.msk.f32.vlgmr.msra.gmra.mrb[0].mxu0 %vm140_vm2, %v4244_v42  ;;  %v799_v58 = vpop.permute.xlu1 %798 }
 0x2ce   :  { %3712 = vmatpush3.xpose.msk.msra.mxu0 %vm140_vm2, %v469_v31  ;;  %3713 = vmatprep.mubr.msk.f32.mxu0 %vm4083_vm1, %v4082_v8 }
 0x2cf   :  { %3721 = vmatprep.subr.mxu0 %v4082_v8 }
 0x2d0   :  { %v4252_v43 = vpop.eup %4007 }
 0x2d1   :  { %3709 = vmatmul.mubr.msk.f32.vlgmr.msra.gmra.mrb[6].mxu1 %vm140_vm2, %v4252_v43  ;;  %3714 = vmatmul.mubr.msk.f32.vlgmr.msra.gmra.mrb[2].mxu0 %vm140_vm2, %v467_v39 }
 0x2d2   :  { %3717 = vmatpush3.xpose.msk.msra.mxu1 %vm140_vm2, %v547_v34  ;;  %3722 = vmatpush3.msra.mxu0 %v641_v44 }
 0x2d3   :  { %3718 = vmatprep.mubr.msk.f32.mxu1 %vm4083_vm1, %v4082_v8  ;;  %3726 = vmatprep.subr.mxu1 %v4082_v8 }
 0x2d4   :  { %3723 = vmatprep.mubr.msk.f32.mxu0 %vm4083_vm1, %v4082_v8  ;;  %3731 = vmatprep.subr.mxu0 %v4082_v8 }
 0x2d5   :  { %3719 = vmatmul.mubr.msk.f32.vlgmr.msra.gmra.mrb[8].mxu1 %vm140_vm2, %v545_v41 }
 0x2d6   :  { %3727 = vmatpush3.msra.mxu1 %v717_v45  ;;  %3728 = vmatprep.mubr.msk.f32.mxu1 %vm4083_vm1, %v4082_v8 }
 0x2d7   :  { %3736 = vmatprep.subr.mxu1 %v4082_v8 }
 0x3a0   :  { %v4268_v46 = vpop.f32.mrb[0].mxu0 }
 0x3a1   :  { %v3705_v47 = vpop.f32.mrb[1].mxu0 }
 0x3a4   :  { %v4270_v48 = vpop.f32.mrb[6].mxu1  ;;  %v540_v49 = vpop.f32.mrb[2].mxu0 }
 0x3a5   :  { %v541_v50 = vadd.f32 %v540_v49, %v4231_v22  ;;  %v3710_v51 = vpop.f32.mrb[7].mxu1  ;;  %v3715_v52 = vpop.f32.mrb[3].mxu0 }
 0x3a7   :  { %v622_v53 = vsel %vm140_vm2, %v541_v50, -inf }
 0x3a8   :  { %623 = vmax.xlane.f32.xlu1 %v622_v53  ;;  %v618_v54 = vpop.f32.mrb[8].mxu1 }
 0x3a9   :  { %v619_v55 = vadd.f32 %v618_v54, %v4231_v22  ;;  %v3720_v56 = vpop.f32.mrb[9].mxu1 }
 0x3ab   :  { %v625_v57 = vsel %vm140_vm2, %v619_v55, -inf }
 0x3ac   :  { %626 = vmax.xlane.f32.xlu0 %v625_v57 }
 0x3b9   :  { %796 = vrot.lane.b32.xlu1 %v4196_v16, %s4090_s11 }
 0x3bd   :  { %1046 = vrot.lane.b32.xlu1 %v4200_v17, %s4091_s12 }
 0x3c1   :  { %1128 = vrot.lane.b32.xlu1 %v4196_v16, %s4092_s13 }
 0x3c2   :  { %876 = vrot.lane.b32.xlu0 %v4200_v17, %s4089_s30 }
 0x3c6   :  { %874 = vrot.lane.b32.xlu0 %v4200_v17, %s4090_s11 }
 0x3ca   :  { %970 = vrot.lane.b32.xlu0 %v4196_v16, %s4091_s12 }
 0x435   :  { %v624_v59 = vpop.xlane.xlu1 %623 }
 0x436   :  { %v628_v60 = vsub.f32 %v541_v50, %v624_v59 }
 0x438   :  { %v630_v61 = vmul.f32 1.442695, %v628_v60 }
 0x439   :  { %v627_v62 = vpop.xlane.xlu0 %626  ;;  %v797_v4 = vpop.permute.xlu1 %796 }
 0x43a   :  { %4009 = vpow2.f32 %v630_v61  ;;  %v629_v63 = vsub.f32 %v619_v55, %v627_v62 }
 0x43c   :  { %v632_v0 = vmul.f32 1.442695, %v629_v63 }
 0x43d   :  { %v877_v1 = vpop.permute.xlu0 %876  ;;  %v1047_v13 = vpop.permute.xlu1 %1046 }
 0x43e   :  { %4011 = vpow2.f32 %v632_v0 }
 0x441   :  { %v875_v2 = vpop.permute.xlu0 %874  ;;  %v1129_v29 = vpop.permute.xlu1 %1128 }
 0x444   :  { %v4286_v3 = vpop.eup %4009 }
 0x445   :  { %3724 = vmatmul.mubr.msk.f32.vlgmr.msra.gmra.mrb[4].mxu0 %vm140_vm2, %v4286_v3  ;;  %v971_v9 = vpop.permute.xlu0 %970  ;;  %v634_v57 = vsel %vm140_vm2, %v4286_v3, 0.0 }
 0x446   :  { %3732 = vmatpush3.xpose.msk.msra.mxu0 %vm140_vm2, %v799_v58  ;;  %3733 = vmatprep.mubr.msk.f32.mxu0 %vm4083_vm1, %v4082_v8 }
 0x447   :  { %3741 = vmatprep.subr.mxu0 %v4082_v8 }
 0x448   :  { %v4294_v6 = vpop.eup %4011 }
 0x449   :  { %3729 = vmatmul.mubr.msk.f32.vlgmr.msra.gmra.mrb[10].mxu1 %vm140_vm2, %v4294_v6  ;;  %3734 = vmatmul.mubr.msk.f32.vlgmr.msra.gmra.mrb[6].mxu0 %vm140_vm2, %v797_v4  ;;  %v637_v59 = vsel %vm140_vm2, %v4294_v6, 0.0  ;;  %v304_v6 = vsel %vm140_vm2, %v4244_v42, 0.0 }
 0x44a   :  { %3737 = vmatpush3.xpose.msk.msra.mxu1 %vm140_vm2, %v877_v1  ;;  %3742 = vmatpush3.msra.mxu0 %v971_v9 }
 0x44b   :  { %3738 = vmatprep.mubr.msk.f32.mxu1 %vm4083_vm1, %v4082_v8  ;;  %3746 = vmatprep.subr.mxu1 %v4082_v8 }
 0x44c   :  { %3743 = vmatprep.mubr.msk.f32.mxu0 %vm4083_vm1, %v4082_v8  ;;  %3751 = vmatprep.subr.mxu0 %v4082_v8 }
 0x44d   :  { %3739 = vmatmul.mubr.msk.f32.vlgmr.msra.gmra.mrb[12].mxu1 %vm140_vm2, %v875_v2 }
 0x44e   :  { %3747 = vmatpush3.msra.mxu1 %v1047_v13  ;;  %3748 = vmatprep.mubr.msk.f32.mxu1 %vm4083_vm1, %v4082_v8  ;;  %v307_v13 = vsel %vm140_vm2, %v4252_v43, 0.0 }
 0x44f   :  { %3756 = vmatprep.subr.mxu1 %v4082_v8 }
 0x518   :  { %v4310_v14 = vpop.f32.mrb[4].mxu0 }
 0x519   :  { %v3725_v15 = vpop.f32.mrb[5].mxu0 }
 0x51c   :  { %v4312_v18 = vpop.f32.mrb[10].mxu1  ;;  %v870_v19 = vpop.f32.mrb[6].mxu0 }
 0x51d   :  { %v871_v20 = vadd.f32 %v870_v19, %v4231_v22  ;;  %v3730_v21 = vpop.f32.mrb[11].mxu1  ;;  %v3735_v23 = vpop.f32.mrb[7].mxu0 }
 0x51f   :  { %v952_v24 = vsel %vm140_vm2, %v871_v20, -inf }
 0x520   :  { %953 = vmax.xlane.f32.xlu1 %v952_v24  ;;  %v948_v25 = vpop.f32.mrb[12].mxu1 }
 0x521   :  { %v949_v26 = vadd.f32 %v948_v25, %v4231_v22  ;;  %v3740_v27 = vpop.f32.mrb[13].mxu1 }
 0x523   :  { %v955_v28 = vsel %vm140_vm2, %v949_v26, -inf }
 0x524   :  { %956 = vmax.xlane.f32.xlu0 %v955_v28 }
 0x531   :  { %1126 = vrot.lane.b32.xlu1 %v4196_v16, %s4093_s14 }
 0x53a   :  { %1206 = vrot.lane.b32.xlu0 %v4200_v17, %s4092_s13 }
 0x53e   :  { %1204 = vrot.lane.b32.xlu0 %v4200_v17, %s4093_s14 }
 0x5ad   :  { %v954_v30 = vpop.xlane.xlu1 %953 }
 0x5ae   :  { %v958_v31 = vsub.f32 %v871_v20, %v954_v30 }
 0x5b0   :  { %v960_v32 = vmul.f32 1.442695, %v958_v31  ;;  %v1490_v31 = vld [vmem:[%s4731_s3 + $0x10] sm:$0xff] }
 0x5b1   :  { %v957_v33 = vpop.xlane.xlu0 %956  ;;  %v1127_v39 = vpop.permute.xlu1 %1126 }
 0x5b2   :  { %4013 = vpow2.f32 %v960_v32  ;;  %v959_v34 = vsub.f32 %v949_v26, %v957_v33  ;;  %v1491_v32 = vld [vmem:[%s4731_s3 + $0x18] sm:$0xff] }
 0x5b3   :  { %v3937_v33 = vpack.c.bf16 %v1491_v32, %v1490_v31  ;;  %v38_v31 = vld [vmem:[%s4734_s1 + $0x8] sm:$0xff]  ;;  %v1622_v32 = vld [vmem:[%s4733_s4 + $0x10] sm:$0xff] }
 0x5b4   :  { %v962_v35 = vmul.f32 1.442695, %v959_v34 }
 0x5b5   :  { %v1207_v37 = vpop.permute.xlu0 %1206 }
 0x5b6   :  { %4015 = vpow2.f32 %v962_v35 }
 0x5b9   :  { %v1205_v40 = vpop.permute.xlu0 %1204 }
 0x5bc   :  { %v4014_v36 = vpop.eup %4013 }
 0x5bd   :  { %3744 = vmatmul.mubr.msk.f32.vlgmr.msra.gmra.mrb[8].mxu0 %vm140_vm2, %v4014_v36 }
 0x5be   :  { %3752 = vmatpush3.xpose.msk.msra.mxu0 %vm140_vm2, %v1129_v29  ;;  %3753 = vmatprep.mubr.msk.f32.mxu0 %vm4083_vm1, %v4082_v8  ;;  %v1489_v29 = vld [vmem:[%s4731_s3 + $0x8] sm:$0xff] }
 0x5bf   :  { %3761 = vmatprep.subr.mxu0 %v4082_v8 }
 0x5c0   :  { %v4016_v38 = vpop.eup %4015 }
 0x5c1   :  { %3749 = vmatmul.mubr.msk.f32.vlgmr.msra.gmra.mrb[14].mxu1 %vm140_vm2, %v4016_v38  ;;  %3754 = vmatmul.mubr.msk.f32.vlgmr.msra.gmra.mrb[10].mxu0 %vm140_vm2, %v1127_v39  ;;  %v967_v58 = vsel %vm140_vm2, %v4016_v38, 0.0 }
 0x5c2   :  { %3757 = vmatpush3.xpose.msk.msra.mxu1 %vm140_vm2, %v1207_v37  ;;  %3758 = vmatprep.mubr.msk.f32.mxu1 %vm4083_vm1, %v4082_v8 }
 0x5c3   :  { %3766 = vmatprep.subr.mxu1 %v4082_v8  ;;  %3763 = vmatprep.mubr.msk.f32.mxu0 %vm4083_vm1, %v4082_v8 }
 0x5c5   :  { %3759 = vmatmul.mubr.msk.f32.vlgmr.msra.gmra.mrb[16].mxu1 %vm140_vm2, %v1205_v40 }
 0x5c6   :  { %3768 = vmatprep.mubr.msk.f32.mxu1 %vm4083_vm1, %v4082_v8 }
 0x690   :  { %v4340_v41 = vpop.f32.mrb[8].mxu0 }
 0x691   :  { %v3745_v44 = vpop.f32.mrb[9].mxu0 }
 0x694   :  { %v1118_v45 = vpop.f32.mrb[14].mxu1  ;;  %v1200_v47 = vpop.f32.mrb[10].mxu0 }
 0x695   :  { %v1201_v49 = vadd.f32 %v1200_v47, %v4231_v22  ;;  %v3750_v50 = vpop.f32.mrb[15].mxu1  ;;  %v3755_v51 = vpop.f32.mrb[11].mxu0 }
 0x697   :  { %v1282_v52 = vsel %vm140_vm2, %v1201_v49, -inf }
 0x698   :  { %1283 = vmax.xlane.f32.xlu1 %v1282_v52  ;;  %v1278_v53 = vpop.f32.mrb[16].mxu1 }
 0x699   :  { %v1279_v54 = vadd.f32 %v1278_v53, %v4231_v22  ;;  %v3760_v55 = vpop.f32.mrb[17].mxu1  ;;  %v964_v22 = vsel %vm140_vm2, %v4014_v36, 0.0 }
 0x69b   :  { %v1285_v56 = vsel %vm140_vm2, %v1279_v54, -inf }
 0x69c   :  { %1286 = vmax.xlane.f32.xlu0 %v1285_v56 }
 0x6a9   :  { %1376 = vrot.lane.b32.xlu1 %v4200_v17, %s4094_s15 }
 0x6b2   :  { %1300 = vrot.lane.b32.xlu0 %v4196_v16, %s4094_s15 }
 0x6cd   :  { %635 = vadd.xlane.f32.xlu1 %v634_v57 }
 0x6d1   :  { %968 = vadd.xlane.f32.xlu1 %v967_v58  ;;  %638 = vadd.xlane.f32.xlu0 %v637_v59 }
 0x6d5   :  { %965 = vadd.xlane.f32.xlu0 %v964_v22 }
 0x725   :  { %v1284_v60 = vpop.xlane.xlu1 %1283 }
 0x726   :  { %v1288_v61 = vsub.f32 %v1201_v49, %v1284_v60 }
 0x728   :  { %v1290_v62 = vmul.f32 1.442695, %v1288_v61 }
 0x729   :  { %v1377_v17 = vpop.permute.xlu1 %1376  ;;  %v1287_v63 = vpop.xlane.xlu0 %1286 }
 0x72a   :  { %4017 = vpow2.f32 %v1290_v62  ;;  %v1289_v16 = vsub.f32 %v1279_v54, %v1287_v63  ;;  %3767 = vmatpush3.msra.mxu1 %v1377_v17 }
 0x72c   :  { %v1292_v0 = vmul.f32 1.442695, %v1289_v16 }
 0x72d   :  { %v1301_v1 = vpop.permute.xlu0 %1300 }
 0x72e   :  { %4019 = vpow2.f32 %v1292_v0  ;;  %3762 = vmatpush3.msra.mxu0 %v1301_v1 }
 0x734   :  { %v4018_v2 = vpop.eup %4017 }
 0x735   :  { %3764 = vmatmul.mubr.msk.f32.vlgmr.msra.gmra.mrb[12].mxu0 %vm140_vm2, %v4018_v2  ;;  %v1294_v3 = vsel %vm140_vm2, %v4018_v2, 0.0 }
 0x736   :  { %1295 = vadd.xlane.f32.xlu0 %v1294_v3 }
 0x738   :  { %v4020_v4 = vpop.eup %4019 }
 0x739   :  { %3769 = vmatmul.mubr.msk.f32.vlgmr.msra.gmra.mrb[18].mxu1 %vm140_vm2, %v4020_v4  ;;  %v1297_v9 = vsel %vm140_vm2, %v4020_v4, 0.0 }
 0x73a   :  { %305 = vadd.xlane.f32.xlu0 %v304_v6  ;;  %1298 = vadd.xlane.f32.xlu1 %v1297_v9 }
 0x73e   :  { %308 = vadd.xlane.f32.xlu1 %v307_v13 }
 0x75a   :  { %v636_v15 = vpop.xlane.xlu1 %635 }
 0x75b   :  { %4021 = vrcp.f32 %v636_v15 }
 0x75e   :  { %v969_v19 = vpop.xlane.xlu1 %968  ;;  %v639_v20 = vpop.xlane.xlu0 %638 }
 0x75f   :  { %4023 = vrcp.f32 %v969_v19 }
 0x760   :  { %4025 = vrcp.f32 %v639_v20 }
 0x762   :  { %v966_v21 = vpop.xlane.xlu0 %965 }
 0x763   :  { %4027 = vrcp.f32 %v966_v21 }
 0x765   :  { %v4022_v23 = vpop.eup %4021 }
 0x766   :  { %v793_v24 = vmul.f32 %v4022_v23, %v4310_v14  ;;  %v1488_v14 = vld [vmem:[%s4731_s3] sm:$0xff] }
 0x767   :  { %v3933_v30 = vpack.c.bf16 %v1489_v29, %v1488_v14  ;;  %v1620_v14 = vld [vmem:[%s4733_s4] sm:$0xff]  ;;  %v1621_v29 = vld [vmem:[%s4733_s4 + $0x8] sm:$0xff] }
 0x768   :  { %1458 = vrot.lane.b32.xlu0 %v793_v24, %s4095_s16 }
 0x769   :  { %v4024_v42 = vpop.eup %4023  ;;  %3934 = vmatprep.subr.bf16.mxu0 %v3933_v30 }
 0x76a   :  { %v4026_v25 = vpop.eup %4025  ;;  %v1125_v26 = vmul.f32 %v4024_v42, %v1118_v45  ;;  %3936 = vmatpush3.bf16.msra.mxu0 %v3933_v30  ;;  %v1709_v42 = vld [vmem:[%s4732_s5] sm:$0xff]  ;;  %v3941_v30 = vpack.c.bf16 %v1621_v29, %v1620_v14 }
 0x76b   :  { %v795_v43 = vmul.f32 %v4026_v25, %v4312_v18  ;;  %3938 = vmatprep.subr.bf16.mxu0 %v3937_v33  ;;  %v1710_v25 = vld [vmem:[%s4732_s5 + $0x8] sm:$0xff] }
 0x76c   :  { %1468 = vrot.lane.b32.xlu0 %v1125_v26, %s4096_s17  ;;  %v3949_v26 = vpack.c.bf16 %v1710_v25, %v1709_v42  ;;  %3942 = vmatprep.subr.bf16.mxu1 %v3941_v30 }
 0x76d   :  { %v4028_v27 = vpop.eup %4027  ;;  %1460 = vrot.lane.b32.xlu1 %v795_v43, %s4095_s16  ;;  %v1711_v43 = vld [vmem:[%s4732_s5 + $0x10] sm:$0xff]  ;;  %3944 = vmatpush3.bf16.msra.mxu1 %v3941_v30 }
 0x76e   :  { %v1123_v28 = vmul.f32 %v4028_v27, %v4340_v41  ;;  %3940 = vmatpush3.bf16.msra.mxu0 %v3937_v33  ;;  %v1712_v27 = vld [vmem:[%s4732_s5 + $0x18] sm:$0xff] }
 0x76f   :  { %3950 = vmatprep.subr.bf16.mxu0 %v3949_v26  ;;  %v1623_v33 = vld [vmem:[%s4733_s4 + $0x18] sm:$0xff] }
 0x771   :  { %1466 = vrot.lane.b32.xlu1 %v1123_v28, %s4096_s17  ;;  %v3953_v28 = vpack.c.bf16 %v1712_v27, %v1711_v43 }
 0x7c3   :  { %v1296_v18 = vpop.xlane.xlu0 %1295 }
 0x7c4   :  { %4029 = vrcp.f32 %v1296_v18  ;;  %v37_v18 = vld [vmem:[%s4734_s1] sm:$0xff] }
 0x7c7   :  { %v1299_v34 = vpop.xlane.xlu1 %1298  ;;  %v306_v45 = vpop.xlane.xlu0 %305 }
 0x7c8   :  { %4031 = vrcp.f32 %v1299_v34  ;;  %v3945_v34 = vpack.c.bf16 %v1623_v33, %v1622_v32 }
 0x7c9   :  { %4033 = vrcp.f32 %v306_v45 }
 0x7ca   :  { %3946 = vmatprep.subr.bf16.mxu1 %v3945_v34 }
 0x7cb   :  { %v309_v47 = vpop.xlane.xlu1 %308  ;;  %3948 = vmatpush3.bf16.msra.mxu1 %v3945_v34 }
 0x7cc   :  { %4035 = vrcp.f32 %v309_v47  ;;  %3804 = vmatprep.subr.mxu1 %v4082_v8 }
 0x7ce   :  { %v4030_v35 = vpop.eup %4029 }
 0x7d2   :  { %v4032_v39 = vpop.eup %4031 }
 0x7d3   :  { %v4034_v50 = vpop.eup %4033 }
 0x7d4   :  { %v463_v54 = vmul.f32 %v4034_v50, %v4268_v46 }
 0x7d6   :  { %v4036_v52 = vpop.eup %4035 }
 0x7d7   :  { %v465_v56 = vmul.f32 %v4036_v52, %v4270_v48  ;;  %v1577_v48 = vsub.s32 1, %v4181_v10 }
 0x7d9   :  { %v1578_v17 = vrot.slane %v4191_v12, %v1577_v48 }
 0x7da   :  { %v1459_v51 = vpop.permute.xlu0 %1458 }
 0x7db   :  { %v1480_v55 = vsel %vm140_vm2, %v463_v54, %v1459_v51 }
 0x7de   :  { %v1469_v57 = vpop.permute.xlu0 %1468 }
 0x7df   :  { %v1461_v49 = vpop.permute.xlu1 %1460 }
 0x7e0   :  { %v1481_v22 = vsel %vm140_vm2, %v465_v56, %v1461_v49 }
 0x7e1   :  { %v1484_v61 = vsel %vm1482_vm5, %v1481_v22, %v1469_v57  ;;  %v1715_v57 = vsub.s32 5, %v4181_v10 }
 0x7e3   :  { %v1467_v53 = vpop.permute.xlu1 %1466 }
 0x7e4   :  { %v1483_v58 = vsel %vm1482_vm5, %v1480_v55, %v1467_v53 }
 0x808   :  { %v1372_v36 = vpop.f32.mrb[12].mxu0 }
 0x809   :  { %v1453_v37 = vmul.f32 %v4030_v35, %v1372_v36  ;;  %v3765_v38 = vpop.f32.mrb[13].mxu0 }
 0x80b   :  { %1474 = vrot.lane.b32.xlu1 %v1453_v37, %s4097_s2 }
 0x80c   :  { %v1448_v40 = vpop.f32.mrb[18].mxu1 }
 0x80d   :  { %v1455_v41 = vmul.f32 %v4032_v39, %v1448_v40  ;;  %v3770_v44 = vpop.f32.mrb[19].mxu1 }
 0x80e   :  { %v1616_v44 = vsub.s32 3, %v4181_v10 }
 0x80f   :  { %1476 = vrot.lane.b32.xlu0 %v1455_v41, %s4097_s2  ;;  %v1610_v41 = vsub.s32 2, %v4181_v10 }
 0x810   :  { %v1617_v52 = vrot.slane %v4191_v12, %v1616_v44 }
 0x811   :  { %v1611_v45 = vrot.slane %v4191_v12, %v1610_v41 }
 0x87d   :  { %v1475_v59 = vpop.permute.xlu1 %1474 }
 0x87e   :  { %v1486_v60 = vsel %vm1485_vm4, %v1483_v58, %v1475_v59  ;;  %v1716_v58 = vrot.slane %v4191_v12, %v1715_v57 }
 0x87f   :  { %3779 = vmatprep.mubr.msk.f32.mxu0 %vm49_vm0, %v1486_v60 }
 0x881   :  { %v1477_v62 = vpop.permute.xlu0 %1476 }
 0x882   :  { %v1487_v46 = vsel %vm1485_vm4, %v1484_v61, %v1477_v62 }
 0x883   :  { %3780 = vmatmul.mubr.msk.f32.vlgmr.msra.gmra.mrb[14].mxu0 %vm49_vm0, %v1487_v46  ;;  %v1626_v46 = vsub.s32 4, %v4181_v10 }
 0x884   :  { %3952 = vmatpush3.bf16.msra.mxu0 %v3949_v26  ;;  %3801 = vmatprep.mubr.msk.f32.mxu0 %vm49_vm0, %v37_v18 }
 0x885   :  { %3954 = vmatprep.subr.bf16.mxu0 %v3953_v28 }
 0x888   :  { %3956 = vmatpush3.bf16.msra.mxu0 %v3953_v28 }
 0x889   :  { %3814 = vmatprep.subr.mxu0 %v4082_v8 }
 0x88b   :  { %3802 = vmatmul.mubr.msk.f32.vlgmr.msra.gmra.mrb[16].mxu0 %vm49_vm0, %v38_v31 }
 0x88c   :  { %3816 = vmatprep.mubr.msk.f32.mxu0 %vm4083_vm1, %v4082_v8 }
 0x956   :  { %v3781_v63 = vpop.f32.mrb[14].mxu0 }
 0x957   :  { %v1574_v16 = vadd.f32 %v3781_v63, %v4175_v7  ;;  %v1564_v0 = vpop.f32.mrb[15].mxu0 }
 0x958   :  { %v1573_v1 = vadd.f32 %v1564_v0, %v4168_v5 }
 0x959   :  { %v1580_v2 = vadd.f32 %v1578_v17, %v1574_v16 }
 0x95a   :  { %v1579_v3 = vadd.f32 %v1578_v17, %v1573_v1  ;;  %v1627_v17 = vrot.slane %v4191_v12, %v1626_v46 }
 0x95b   :  { %v1584_v4 = vsel %vm49_vm0, %v1580_v2, 0.0 }
 0x95c   :  { %1585 = vadd.xlane.f32.xlu0 %v1584_v4  ;;  %v1581_v6 = vsel %vm49_vm0, %v1579_v3, 0.0 }
 0x95d   :  { %1582 = vadd.xlane.f32.xlu1 %v1581_v6 }
 0x95e   :  { %v3803_v59 = vpop.f32.mrb[16].mxu0 }
 0x95f   :  { %v4459_v22 = vadd.f32 %v3803_v59, %v1716_v58  ;;  %v1789_v60 = vpop.f32.mrb[17].mxu0 }
 0x960   :  { %v4461_v61 = vadd.f32 %v1789_v60, %v1716_v58 }
 0x9e9   :  { %v1586_v9 = vpop.xlane.xlu0 %1585 }
 0x9ea   :  { %v1589_v13 = vmul.f32 0.03125, %v1586_v9  ;;  %v1583_v15 = vpop.xlane.xlu1 %1582 }
 0x9eb   :  { %v1588_v19 = vmul.f32 0.03125, %v1583_v15 }
 0x9ec   :  { %v1591_v20 = vsub.f32 %v1580_v2, %v1589_v13 }
 0x9ed   :  { %v1590_v21 = vsub.f32 %v1579_v3, %v1588_v19 }
 0x9ee   :  { %v1593_v23 = vmul.f32 %v1591_v20, %v1591_v20 }
 0x9ef   :  { %v1592_v24 = vmul.f32 %v1590_v21, %v1590_v21 }
 0x9f0   :  { %v1597_v7 = vsel %vm49_vm0, %v1593_v23, 0.0 }
 0x9f1   :  { %1598 = vadd.xlane.f32.xlu1 %v1597_v7  ;;  %v1594_v5 = vsel %vm49_vm0, %v1592_v24, 0.0 }
 0x9f2   :  { %1595 = vadd.xlane.f32.xlu0 %v1594_v5 }
 0xa02   :  { %2044 = vrot.lane.b32.xlu1 %v4459_v22, %s4084_s25 }
 0xa06   :  { %2126 = vrot.lane.b32.xlu1 %v4461_v61, %s4087_s28 }
 0xa08   :  { %1968 = vrot.lane.b32.xlu0 %v4461_v61, %s4084_s25 }
 0xa7e   :  { %v1599_v35 = vpop.xlane.xlu1 %1598 }
 0xa7f   :  { %v1601_v36 = vmul.f32 0.03125, %v1599_v35  ;;  %v1596_v37 = vpop.xlane.xlu0 %1595 }
 0xa80   :  { %v1600_v38 = vmul.f32 0.03125, %v1596_v37 }
 0xa81   :  { %v1603_v39 = vadd.f32 1e-05, %v1601_v36 }
 0xa82   :  { %v1602_v40 = vadd.f32 1e-05, %v1600_v38  ;;  %v2045_v12 = vpop.permute.xlu1 %2044 }
 0xa83   :  { %4037 = vrsqrt.f32 %v1603_v39  ;;  %v1969_v62 = vpop.permute.xlu0 %1968 }
 0xa84   :  { %4039 = vrsqrt.f32 %v1602_v40  ;;  %3815 = vmatpush3.msra.mxu0 %v1969_v62 }
 0xa85   :  { %3824 = vmatprep.subr.mxu0 %v4082_v8 }
 0xa86   :  { %v2127_v15 = vpop.permute.xlu1 %2126 }
 0xa8d   :  { %v4038_v47 = vpop.eup %4037 }
 0xa8e   :  { %v4040_v49 = vpop.eup %4039  ;;  %v1607_v50 = vmul.f32 %v4038_v47, %v1591_v20 }
 0xa8f   :  { %v1606_v51 = vmul.f32 %v4040_v49, %v1590_v21 }
 0xa90   :  { %v1613_v53 = vmul.f32 %v1611_v45, %v1607_v50 }
 0xa91   :  { %v1612_v54 = vmul.f32 %v1611_v45, %v1606_v51 }
 0xa92   :  { %v4449_v56 = vadd.f32 %v1617_v52, %v1613_v53 }
 0xa93   :  { %v4447_v55 = vadd.f32 %v1617_v52, %v1612_v54 }
 0xa95   :  { %3790 = vmatprep.mubr.msk.f32.mxu1 %vm49_vm0, %v4447_v55 }
 0xa96   :  { %3791 = vmatmul.mubr.msk.f32.vlgmr.msra.gmra.mrb[20].mxu1 %vm49_vm0, %v4449_v56 }
 0xa97   :  { %3806 = vmatprep.mubr.msk.f32.mxu1 %vm4083_vm1, %v4082_v8  ;;  %3805 = vmatpush3.xpose.msk.msra.mxu1 %vm140_vm2, %v4461_v61 }
 0xa98   :  { %3809 = vmatprep.subr.mxu1 %v4082_v8 }
 0xb69   :  { %v3792_v63 = vpop.f32.mrb[20].mxu1 }
 0xb6a   :  { %v1700_v16 = vpop.f32.mrb[21].mxu1  ;;  %v4485_v1 = vadd.f32 %v3792_v63, %v1627_v17 }
 0xb6b   :  { %v4477_v0 = vadd.f32 %v1700_v16, %v1627_v17 }
 0xb6d   :  { %3807 = vmatmul.mubr.msk.f32.vlgmr.msra.gmra.mrb[22].mxu1 %vm140_vm2, %v4477_v0 }
 0xb6e   :  { %3810 = vmatpush3.xpose.msk.msra.mxu1 %vm140_vm2, %v4459_v22  ;;  %3811 = vmatprep.mubr.msk.f32.mxu1 %vm4083_vm1, %v4082_v8 }
 0xb6f   :  { %3819 = vmatprep.subr.mxu1 %v4082_v8 }
 0xb71   :  { %3812 = vmatmul.mubr.msk.f32.vlgmr.msra.gmra.mrb[24].mxu1 %vm140_vm2, %v4485_v1 }
 0xb72   :  { %3820 = vmatpush3.msra.mxu1 %v2045_v12  ;;  %3821 = vmatprep.mubr.msk.f32.mxu1 %vm4083_vm1, %v4082_v8 }
 0xb73   :  { %3829 = vmatprep.subr.mxu1 %v4082_v8 }
 0xc40   :  { %v1870_v2 = vpop.f32.mrb[22].mxu1 }
 0xc41   :  { %v3808_v3 = vpop.f32.mrb[23].mxu1  ;;  %v1950_v4 = vsel %vm140_vm2, %v1870_v2, -inf }
 0xc42   :  { %1951 = vmax.xlane.f32.xlu0 %v1950_v4 }
 0xc44   :  { %v1946_v6 = vpop.f32.mrb[24].mxu1 }
 0xc45   :  { %v3813_v9 = vpop.f32.mrb[25].mxu1  ;;  %v1953_v13 = vsel %vm140_vm2, %v1946_v6, -inf }
 0xc46   :  { %1954 = vmax.xlane.f32.xlu1 %v1953_v13 }
 0xc57   :  { %2124 = vrot.lane.b32.xlu1 %v4477_v0, %s4087_s28 }
 0xc58   :  { %2204 = vrot.lane.b32.xlu0 %v4459_v22, %s4087_s28 }
 0xc5b   :  { %2374 = vrot.lane.b32.xlu1 %v4459_v22, %s4086_s27 }
 0xc5c   :  { %2202 = vrot.lane.b32.xlu0 %v4485_v1, %s4087_s28 }
 0xc5f   :  { %2456 = vrot.lane.b32.xlu1 %v4461_v61, %s4090_s11 }
 0xc60   :  { %2298 = vrot.lane.b32.xlu0 %v4461_v61, %s4086_s27 }
 0xccf   :  { %v1952_v19 = vpop.xlane.xlu0 %1951 }
 0xcd0   :  { %v1956_v20 = vsub.f32 %v1870_v2, %v1952_v19 }
 0xcd2   :  { %v1958_v21 = vmul.f32 1.442695, %v1956_v20 }
 0xcd3   :  { %v1955_v23 = vpop.xlane.xlu1 %1954  ;;  %v2205_v5 = vpop.permute.xlu0 %2204 }
 0xcd4   :  { %4041 = vpow2.f32 %v1958_v21  ;;  %v1957_v24 = vsub.f32 %v1946_v6, %v1955_v23 }
 0xcd6   :  { %v1960_v7 = vmul.f32 1.442695, %v1957_v24 }
 0xcd7   :  { %v2203_v42 = vpop.permute.xlu0 %2202  ;;  %v2125_v26 = vpop.permute.xlu1 %2124 }
 0xcd8   :  { %4043 = vpow2.f32 %v1960_v7 }
 0xcdb   :  { %v2299_v27 = vpop.permute.xlu0 %2298  ;;  %v2375_v28 = vpop.permute.xlu1 %2374 }
 0xcde   :  { %v4507_v25 = vpop.eup %4041 }
 0xcdf   :  { %3817 = vmatmul.mubr.msk.f32.vlgmr.msra.gmra.mrb[18].mxu0 %vm140_vm2, %v4507_v25  ;;  %v2457_v37 = vpop.permute.xlu1 %2456 }
 0xce0   :  { %3825 = vmatpush3.xpose.msk.msra.mxu0 %vm140_vm2, %v2127_v15  ;;  %3826 = vmatprep.mubr.msk.f32.mxu0 %vm4083_vm1, %v4082_v8 }
 0xce1   :  { %3834 = vmatprep.subr.mxu0 %v4082_v8 }
 0xce2   :  { %v4515_v43 = vpop.eup %4043 }
 0xce3   :  { %3822 = vmatmul.mubr.msk.f32.vlgmr.msra.gmra.mrb[26].mxu1 %vm140_vm2, %v4515_v43  ;;  %3827 = vmatmul.mubr.msk.f32.vlgmr.msra.gmra.mrb[20].mxu0 %vm140_vm2, %v2125_v26 }
 0xce4   :  { %3830 = vmatpush3.xpose.msk.msra.mxu1 %vm140_vm2, %v2205_v5  ;;  %3835 = vmatpush3.msra.mxu0 %v2299_v27 }
 0xce5   :  { %3831 = vmatprep.mubr.msk.f32.mxu1 %vm4083_vm1, %v4082_v8  ;;  %3839 = vmatprep.subr.mxu1 %v4082_v8 }
 0xce6   :  { %3836 = vmatprep.mubr.msk.f32.mxu0 %vm4083_vm1, %v4082_v8  ;;  %3844 = vmatprep.subr.mxu0 %v4082_v8 }
 0xce7   :  { %3832 = vmatmul.mubr.msk.f32.vlgmr.msra.gmra.mrb[28].mxu1 %vm140_vm2, %v2203_v42 }
 0xce8   :  { %3840 = vmatpush3.msra.mxu1 %v2375_v28  ;;  %3841 = vmatprep.mubr.msk.f32.mxu1 %vm4083_vm1, %v4082_v8 }
 0xce9   :  { %3849 = vmatprep.subr.mxu1 %v4082_v8 }
 0xdb2   :  { %v4531_v14 = vpop.f32.mrb[18].mxu0 }
 0xdb3   :  { %v3818_v29 = vpop.f32.mrb[19].mxu0 }
 0xdb6   :  { %v4533_v30 = vpop.f32.mrb[26].mxu1  ;;  %v2198_v18 = vpop.f32.mrb[20].mxu0 }
 0xdb7   :  { %v3823_v31 = vpop.f32.mrb[27].mxu1  ;;  %v3828_v32 = vpop.f32.mrb[21].mxu0  ;;  %v2280_v33 = vsel %vm140_vm2, %v2198_v18, -inf }
 0xdb8   :  { %2281 = vmax.xlane.f32.xlu1 %v2280_v33 }
 0xdba   :  { %v2276_v34 = vpop.f32.mrb[28].mxu1 }
 0xdbb   :  { %v3833_v35 = vpop.f32.mrb[29].mxu1  ;;  %v2283_v36 = vsel %vm140_vm2, %v2276_v34, -inf }
 0xdbc   :  { %2284 = vmax.xlane.f32.xlu0 %v2283_v36 }
 0xdc9   :  { %2454 = vrot.lane.b32.xlu1 %v4477_v0, %s4090_s11 }
 0xdcd   :  { %2704 = vrot.lane.b32.xlu1 %v4459_v22, %s4089_s30 }
 0xdd1   :  { %2786 = vrot.lane.b32.xlu1 %v4461_v61, %s4093_s14 }
 0xdd2   :  { %2534 = vrot.lane.b32.xlu0 %v4459_v22, %s4090_s11 }
 0xdd6   :  { %2532 = vrot.lane.b32.xlu0 %v4485_v1, %s4090_s11 }
 0xdda   :  { %2628 = vrot.lane.b32.xlu0 %v4461_v61, %s4089_s30 }
 0xe45   :  { %v2282_v38 = vpop.xlane.xlu1 %2281 }
 0xe46   :  { %v2286_v39 = vsub.f32 %v2198_v18, %v2282_v38 }
 0xe48   :  { %v2288_v40 = vmul.f32 1.442695, %v2286_v39 }
 0xe49   :  { %v2285_v45 = vpop.xlane.xlu0 %2284  ;;  %v2455_v53 = vpop.permute.xlu1 %2454 }
 0xe4a   :  { %4045 = vpow2.f32 %v2288_v40  ;;  %v2287_v47 = vsub.f32 %v2276_v34, %v2285_v45 }
 0xe4c   :  { %v2290_v49 = vmul.f32 1.442695, %v2287_v47 }
 0xe4d   :  { %v2535_v50 = vpop.permute.xlu0 %2534  ;;  %v2705_v58 = vpop.permute.xlu1 %2704 }
 0xe4e   :  { %4047 = vpow2.f32 %v2290_v49 }
 0xe51   :  { %v2533_v51 = vpop.permute.xlu0 %2532  ;;  %v2787_v6 = vpop.permute.xlu1 %2786 }
 0xe54   :  { %v4549_v52 = vpop.eup %4045 }
 0xe55   :  { %3837 = vmatmul.mubr.msk.f32.vlgmr.msra.gmra.mrb[22].mxu0 %vm140_vm2, %v4549_v52  ;;  %v2629_v57 = vpop.permute.xlu0 %2628 }
 0xe56   :  { %3845 = vmatpush3.xpose.msk.msra.mxu0 %vm140_vm2, %v2457_v37  ;;  %3846 = vmatprep.mubr.msk.f32.mxu0 %vm4083_vm1, %v4082_v8 }
 0xe57   :  { %3854 = vmatprep.subr.mxu0 %v4082_v8 }
 0xe58   :  { %v4557_v54 = vpop.eup %4047 }
 0xe59   :  { %3842 = vmatmul.mubr.msk.f32.vlgmr.msra.gmra.mrb[30].mxu1 %vm140_vm2, %v4557_v54  ;;  %3847 = vmatmul.mubr.msk.f32.vlgmr.msra.gmra.mrb[24].mxu0 %vm140_vm2, %v2455_v53  ;;  %v2295_v35 = vsel %vm140_vm2, %v4557_v54, 0.0  ;;  %v1965_v54 = vsel %vm140_vm2, %v4515_v43, 0.0 }
 0xe5a   :  { %3850 = vmatpush3.xpose.msk.msra.mxu1 %vm140_vm2, %v2535_v50  ;;  %3855 = vmatpush3.msra.mxu0 %v2629_v57 }
 0xe5b   :  { %3851 = vmatprep.mubr.msk.f32.mxu1 %vm4083_vm1, %v4082_v8  ;;  %3859 = vmatprep.subr.mxu1 %v4082_v8 }
 0xe5c   :  { %3856 = vmatprep.mubr.msk.f32.mxu0 %vm4083_vm1, %v4082_v8  ;;  %3864 = vmatprep.subr.mxu0 %v4082_v8 }
 0xe5d   :  { %3852 = vmatmul.mubr.msk.f32.vlgmr.msra.gmra.mrb[32].mxu1 %vm140_vm2, %v2533_v51 }
 0xe5e   :  { %3860 = vmatpush3.msra.mxu1 %v2705_v58  ;;  %3861 = vmatprep.mubr.msk.f32.mxu1 %vm4083_vm1, %v4082_v8 }
 0xe5f   :  { %3869 = vmatprep.subr.mxu1 %v4082_v8 }
 0xf28   :  { %v4573_v59 = vpop.f32.mrb[22].mxu0 }
 0xf29   :  { %v3838_v60 = vpop.f32.mrb[23].mxu0 }
 0xf2c   :  { %v4575_v62 = vpop.f32.mrb[30].mxu1  ;;  %v2528_v17 = vpop.f32.mrb[24].mxu0 }
 0xf2d   :  { %v3843_v63 = vpop.f32.mrb[31].mxu1  ;;  %v3848_v16 = vpop.f32.mrb[25].mxu0  ;;  %v2610_v12 = vsel %vm140_vm2, %v2528_v17, -inf }
 0xf2e   :  { %2611 = vmax.xlane.f32.xlu1 %v2610_v12 }
 0xf30   :  { %v2606_v2 = vpop.f32.mrb[32].mxu1 }
 0xf31   :  { %v3853_v3 = vpop.f32.mrb[33].mxu1  ;;  %v2613_v4 = vsel %vm140_vm2, %v2606_v2, -inf }
 0xf32   :  { %2614 = vmax.xlane.f32.xlu0 %v2613_v4 }
 0xf3f   :  { %2784 = vrot.lane.b32.xlu1 %v4477_v0, %s4093_s14 }
 0xf48   :  { %2864 = vrot.lane.b32.xlu0 %v4459_v22, %s4093_s14 }
 0xf4c   :  { %2862 = vrot.lane.b32.xlu0 %v4485_v1, %s4093_s14 }
 0xfbb   :  { %v2612_v9 = vpop.xlane.xlu1 %2611 }
 0xfbc   :  { %v2616_v13 = vsub.f32 %v2528_v17, %v2612_v9 }
 0xfbe   :  { %v2618_v15 = vmul.f32 1.442695, %v2616_v13  ;;  %v3146_v13 = vld [vmem:[%s4735_s6 + $0x10] sm:$0xff] }
 0xfbf   :  { %v2615_v19 = vpop.xlane.xlu0 %2614  ;;  %v2785_v1 = vpop.permute.xlu1 %2784 }
 0xfc0   :  { %4049 = vpow2.f32 %v2618_v15  ;;  %v2617_v20 = vsub.f32 %v2606_v2, %v2615_v19  ;;  %v3147_v15 = vld [vmem:[%s4735_s6 + $0x18] sm:$0xff] }
 0xfc1   :  { %v3961_v19 = vpack.c.bf16 %v3147_v15, %v3146_v13  ;;  %v3367_v13 = vld [vmem:[%s4737_s8 + $0x8] sm:$0xff]  ;;  %v3368_v15 = vld [vmem:[%s4737_s8 + $0x10] sm:$0xff] }
 0xfc2   :  { %v2620_v21 = vmul.f32 1.442695, %v2617_v20 }
 0xfc3   :  { %v2865_v24 = vpop.permute.xlu0 %2864 }
 0xfc4   :  { %4051 = vpow2.f32 %v2620_v21 }
 0xfc7   :  { %v2863_v7 = vpop.permute.xlu0 %2862 }
 0xfca   :  { %v4050_v23 = vpop.eup %4049 }
 0xfcb   :  { %3857 = vmatmul.mubr.msk.f32.vlgmr.msra.gmra.mrb[26].mxu0 %vm140_vm2, %v4050_v23  ;;  %v2622_v36 = vsel %vm140_vm2, %v4050_v23, 0.0 }
 0xfcc   :  { %3865 = vmatpush3.xpose.msk.msra.mxu0 %vm140_vm2, %v2787_v6  ;;  %3866 = vmatprep.mubr.msk.f32.mxu0 %vm4083_vm1, %v4082_v8  ;;  %v3145_v6 = vld [vmem:[%s4735_s6 + $0x8] sm:$0xff] }
 0xfcd   :  { %3874 = vmatprep.subr.mxu0 %v4082_v8 }
 0xfce   :  { %v4052_v0 = vpop.eup %4051 }
 0xfcf   :  { %3862 = vmatmul.mubr.msk.f32.vlgmr.msra.gmra.mrb[34].mxu1 %vm140_vm2, %v4052_v0  ;;  %3867 = vmatmul.mubr.msk.f32.vlgmr.msra.gmra.mrb[28].mxu0 %vm140_vm2, %v2785_v1  ;;  %v2625_v34 = vsel %vm140_vm2, %v4052_v0, 0.0 }
 0xfd0   :  { %3870 = vmatpush3.xpose.msk.msra.mxu1 %vm140_vm2, %v2865_v24  ;;  %3871 = vmatprep.mubr.msk.f32.mxu1 %vm4083_vm1, %v4082_v8 }
 0xfd1   :  { %3879 = vmatprep.subr.mxu1 %v4082_v8  ;;  %3876 = vmatprep.mubr.msk.f32.mxu0 %vm4083_vm1, %v4082_v8 }
 0xfd3   :  { %3872 = vmatmul.mubr.msk.f32.vlgmr.msra.gmra.mrb[36].mxu1 %vm140_vm2, %v2863_v7 }
 0xfd4   :  { %3881 = vmatprep.mubr.msk.f32.mxu1 %vm4083_vm1, %v4082_v8  ;;  %v2292_v8 = vsel %vm140_vm2, %v4549_v52, 0.0  ;;  %v1962_v52 = vsel %vm140_vm2, %v4507_v25, 0.0 }
0x109e   :  { %v4601_v5 = vpop.f32.mrb[26].mxu0 }
0x109f   :  { %v3858_v42 = vpop.f32.mrb[27].mxu0 }
0x10a2   :  { %v2776_v26 = vpop.f32.mrb[34].mxu1  ;;  %v2858_v27 = vpop.f32.mrb[28].mxu0 }
0x10a3   :  { %v3863_v28 = vpop.f32.mrb[35].mxu1  ;;  %v3868_v29 = vpop.f32.mrb[29].mxu0  ;;  %v2940_v18 = vsel %vm140_vm2, %v2858_v27, -inf }
0x10a4   :  { %2941 = vmax.xlane.f32.xlu1 %v2940_v18 }
0x10a6   :  { %v2936_v31 = vpop.f32.mrb[36].mxu1 }
0x10a7   :  { %v3873_v32 = vpop.f32.mrb[37].mxu1  ;;  %v2943_v33 = vsel %vm140_vm2, %v2936_v31, -inf }
0x10a8   :  { %2944 = vmax.xlane.f32.xlu0 %v2943_v33 }
0x10b5   :  { %3034 = vrot.lane.b32.xlu1 %v4459_v22, %s4092_s13 }
0x10be   :  { %2958 = vrot.lane.b32.xlu0 %v4461_v61, %s4092_s13 }
0x10d9   :  { %2293 = vadd.xlane.f32.xlu1 %v2292_v8 }
0x10dd   :  { %2626 = vadd.xlane.f32.xlu1 %v2625_v34  ;;  %2296 = vadd.xlane.f32.xlu0 %v2295_v35 }
0x10e1   :  { %2623 = vadd.xlane.f32.xlu0 %v2622_v36 }
0x1131   :  { %v2942_v37 = vpop.xlane.xlu1 %2941 }
0x1132   :  { %v2946_v38 = vsub.f32 %v2858_v27, %v2942_v37 }
0x1134   :  { %v2948_v22 = vmul.f32 1.442695, %v2946_v38 }
0x1135   :  { %v3035_v39 = vpop.permute.xlu1 %3034  ;;  %v2945_v40 = vpop.xlane.xlu0 %2944 }
0x1136   :  { %4053 = vpow2.f32 %v2948_v22  ;;  %v2947_v61 = vsub.f32 %v2936_v31, %v2945_v40  ;;  %3880 = vmatpush3.msra.mxu1 %v3035_v39 }
0x1138   :  { %v2950_v45 = vmul.f32 1.442695, %v2947_v61 }
0x1139   :  { %v2959_v47 = vpop.permute.xlu0 %2958 }
0x113a   :  { %4055 = vpow2.f32 %v2950_v45  ;;  %3875 = vmatpush3.msra.mxu0 %v2959_v47 }
0x1140   :  { %v4054_v49 = vpop.eup %4053 }
0x1141   :  { %3877 = vmatmul.mubr.msk.f32.vlgmr.msra.gmra.mrb[30].mxu0 %vm140_vm2, %v4054_v49  ;;  %v2952_v50 = vsel %vm140_vm2, %v4054_v49, 0.0 }
0x1142   :  { %2953 = vadd.xlane.f32.xlu0 %v2952_v50 }
0x1144   :  { %v4056_v51 = vpop.eup %4055 }
0x1145   :  { %3882 = vmatmul.mubr.msk.f32.vlgmr.msra.gmra.mrb[38].mxu1 %vm140_vm2, %v4056_v51  ;;  %v2955_v53 = vsel %vm140_vm2, %v4056_v51, 0.0 }
0x1146   :  { %1963 = vadd.xlane.f32.xlu0 %v1962_v52  ;;  %2956 = vadd.xlane.f32.xlu1 %v2955_v53 }
0x114a   :  { %1966 = vadd.xlane.f32.xlu1 %v1965_v54 }
0x1166   :  { %v2294_v57 = vpop.xlane.xlu1 %2293 }
0x1167   :  { %4057 = vrcp.f32 %v2294_v57 }
0x116a   :  { %v2627_v58 = vpop.xlane.xlu1 %2626  ;;  %v2297_v60 = vpop.xlane.xlu0 %2296 }
0x116b   :  { %4059 = vrcp.f32 %v2627_v58 }
0x116c   :  { %4061 = vrcp.f32 %v2297_v60 }
0x116e   :  { %v2624_v17 = vpop.xlane.xlu0 %2623 }
0x116f   :  { %4063 = vrcp.f32 %v2624_v17 }
0x1171   :  { %v4058_v63 = vpop.eup %4057 }
0x1172   :  { %v2451_v16 = vmul.f32 %v4058_v63, %v4573_v59  ;;  %v3144_v59 = vld [vmem:[%s4735_s6] sm:$0xff] }
0x1173   :  { %v3957_v9 = vpack.c.bf16 %v3145_v6, %v3144_v59  ;;  %v3277_v59 = vld [vmem:[%s4736_s7 + $0x10] sm:$0xff]  ;;  %v3278_v6 = vld [vmem:[%s4736_s7 + $0x18] sm:$0xff] }
0x1174   :  { %3116 = vrot.lane.b32.xlu0 %v2451_v16, %s4095_s16 }
0x1175   :  { %v4060_v25 = vpop.eup %4059  ;;  %3958 = vmatprep.subr.bf16.mxu0 %v3957_v9 }
0x1176   :  { %v4062_v12 = vpop.eup %4061  ;;  %v2783_v2 = vmul.f32 %v4060_v25, %v2776_v26  ;;  %3960 = vmatpush3.bf16.msra.mxu0 %v3957_v9  ;;  %v3969_v9 = vpack.c.bf16 %v3278_v6, %v3277_v59 }
0x1177   :  { %v2453_v3 = vmul.f32 %v4062_v12, %v4575_v62  ;;  %3962 = vmatprep.subr.bf16.mxu0 %v3961_v19 }
0x1178   :  { %3126 = vrot.lane.b32.xlu0 %v2783_v2, %s4096_s17 }
0x1179   :  { %v4064_v43 = vpop.eup %4063  ;;  %3118 = vrot.lane.b32.xlu1 %v2453_v3, %s4095_s16  ;;  %v3275_v3 = vld [vmem:[%s4736_s7] sm:$0xff] }
0x117a   :  { %v2781_v4 = vmul.f32 %v4064_v43, %v4601_v5  ;;  %3964 = vmatpush3.bf16.msra.mxu0 %v3961_v19  ;;  %v3276_v43 = vld [vmem:[%s4736_s7 + $0x8] sm:$0xff] }
0x117d   :  { %3124 = vrot.lane.b32.xlu1 %v2781_v4, %s4096_s17  ;;  %v3965_v4 = vpack.c.bf16 %v3276_v43, %v3275_v3 }
0x117f   :  { %3966 = vmatprep.subr.bf16.mxu1 %v3965_v4 }
0x1180   :  { %3968 = vmatpush3.bf16.msra.mxu1 %v3965_v4 }
0x1181   :  { %3970 = vmatprep.subr.bf16.mxu1 %v3969_v9 }
0x1184   :  { %3972 = vmatpush3.bf16.msra.mxu1 %v3969_v9 }
0x11cf   :  { %v2954_v62 = vpop.xlane.xlu0 %2953 }
0x11d0   :  { %4065 = vrcp.f32 %v2954_v62  ;;  %v3366_v62 = vld [vmem:[%s4737_s8] sm:$0xff] }
0x11d1   :  { %v3973_v19 = vpack.c.bf16 %v3367_v13, %v3366_v62 }
0x11d3   :  { %v2957_v20 = vpop.xlane.xlu1 %2956  ;;  %v1964_v26 = vpop.xlane.xlu0 %1963  ;;  %3974 = vmatprep.subr.bf16.mxu0 %v3973_v19 }
0x11d4   :  { %4067 = vrcp.f32 %v2957_v20  ;;  %v3369_v20 = vld [vmem:[%s4737_s8 + $0x18] sm:$0xff] }
0x11d5   :  { %4069 = vrcp.f32 %v1964_v26 }
0x11d7   :  { %v1967_v27 = vpop.xlane.xlu1 %1966 }
0x11d8   :  { %4071 = vrcp.f32 %v1967_v27 }
0x11da   :  { %v4066_v21 = vpop.eup %4065 }
0x11de   :  { %v4068_v1 = vpop.eup %4067 }
0x11df   :  { %v4070_v29 = vpop.eup %4069 }
0x11e0   :  { %v2121_v33 = vmul.f32 %v4070_v29, %v4531_v14  ;;  %v3233_v14 = vsub.s32 6, %v4181_v10  ;;  %v40_v29 = vld [vmem:[%s4730_s9 + $0x8] sm:$0x1f] }
0x11e1   :  { %v3493_v13 = vrot.slane %v40_v29, %v1616_v44 }
0x11e2   :  { %v4072_v31 = vpop.eup %4071 }
0x11e3   :  { %v2123_v34 = vmul.f32 %v4072_v31, %v4533_v30  ;;  %v4081_v30 = vld [vmem:[%s4730_s9] sm:$0xff] }
0x11e4   :  { %v3234_v45 = vrot.slane %v4081_v30, %v3233_v14 }
0x11e6   :  { %v3117_v18 = vpop.permute.xlu0 %3116 }
0x11e7   :  { %v3138_v8 = vsel %vm140_vm2, %v2121_v33, %v3117_v18 }
0x11ea   :  { %v3127_v35 = vpop.permute.xlu0 %3126 }
0x11eb   :  { %v3119_v28 = vpop.permute.xlu1 %3118 }
0x11ec   :  { %v3139_v38 = vsel %vm140_vm2, %v2123_v34, %v3119_v28  ;;  %v3265_v28 = vsub.s32 7, %v4181_v10 }
0x11ed   :  { %v3141_v39 = vsel %vm1482_vm5, %v3139_v38, %v3127_v35 }
0x11ee   :  { %v3266_v18 = vrot.slane %v4081_v30, %v3265_v28 }
0x11ef   :  { %v3125_v32 = vpop.permute.xlu1 %3124 }
0x11f0   :  { %v3140_v36 = vsel %vm1482_vm5, %v3138_v8, %v3125_v32  ;;  %v3272_v8 = vrot.slane %v40_v29, %v47_v11  ;;  %v3282_v11 = vrot.slane %v40_v29, %v1577_v48 }
0x1214   :  { %v3030_v23 = vpop.f32.mrb[30].mxu0 }
0x1215   :  { %v3111_v24 = vmul.f32 %v4066_v21, %v3030_v23  ;;  %v3878_v0 = vpop.f32.mrb[31].mxu0  ;;  %v3977_v21 = vpack.c.bf16 %v3369_v20, %v3368_v15  ;;  %v3370_v23 = vld [vmem:[%s4737_s8 + $0x20] sm:$0xff]  ;;  %v3499_v20 = vrot.slane %v40_v29, %v1626_v46 }
0x1217   :  { %3132 = vrot.lane.b32.xlu1 %v3111_v24, %s4097_s2  ;;  %v3371_v24 = vld [vmem:[%s4737_s8 + $0x28] sm:$0xff] }
0x1218   :  { %v3106_v7 = vpop.f32.mrb[38].mxu1  ;;  %v3981_v0 = vpack.c.bf16 %v3371_v24, %v3370_v23 }
0x1219   :  { %v3113_v5 = vmul.f32 %v4068_v1, %v3106_v7  ;;  %v3883_v42 = vpop.f32.mrb[39].mxu1 }
0x121b   :  { %3134 = vrot.lane.b32.xlu0 %v3113_v5, %s4097_s2 }
0x1289   :  { %v3133_v37 = vpop.permute.xlu1 %3132 }
0x128a   :  { %v3142_v22 = vsel %vm1485_vm4, %v3140_v36, %v3133_v37 }
0x128b   :  { %3892 = vmatprep.mubr.msk.f32.mxu0 %vm49_vm0, %v3142_v22  ;;  %v3372_v22 = vld [vmem:[%s4737_s8 + $0x30] sm:$0xff] }
0x128d   :  { %v3135_v40 = vpop.permute.xlu0 %3134 }
0x128e   :  { %v3143_v61 = vsel %vm1485_vm4, %v3141_v39, %v3135_v40  ;;  %v3373_v39 = vld [vmem:[%s4737_s8 + $0x38] sm:$0xff] }
0x128f   :  { %3893 = vmatmul.mubr.msk.f32.vlgmr.msra.gmra.mrb[32].mxu0 %vm49_vm0, %v3143_v61  ;;  %v3985_v40 = vpack.c.bf16 %v3373_v39, %v3372_v22 }
0x1290   :  { %3976 = vmatpush3.bf16.msra.mxu0 %v3973_v19 }
0x1291   :  { %3978 = vmatprep.subr.bf16.mxu0 %v3977_v21 }
0x1294   :  { %3980 = vmatpush3.bf16.msra.mxu0 %v3977_v21 }
0x1295   :  { %3982 = vmatprep.subr.bf16.mxu0 %v3981_v0 }
0x1298   :  { %3984 = vmatpush3.bf16.msra.mxu0 %v3981_v0 }
0x1299   :  { %3986 = vmatprep.subr.bf16.mxu0 %v3985_v40 }
0x129c   :  { %3988 = vmatpush3.bf16.msra.mxu0 %v3985_v40 }
0x1362   :  { %v3894_v47 = vpop.f32.mrb[32].mxu0 }
0x1363   :  { %v3230_v49 = vadd.f32 %v3894_v47, %v4449_v56  ;;  %v3220_v50 = vpop.f32.mrb[33].mxu0 }
0x1364   :  { %v3229_v51 = vadd.f32 %v3220_v50, %v4447_v55  ;;  %v3461_v50 = vrot.slane %v40_v29, %v1610_v41 }
0x1365   :  { %v3236_v52 = vadd.f32 %v3234_v45, %v3230_v49 }
0x1366   :  { %v3235_v53 = vadd.f32 %v3234_v45, %v3229_v51 }
0x1367   :  { %v3240_v54 = vsel %vm49_vm0, %v3236_v52, 0.0 }
0x1368   :  { %3241 = vadd.xlane.f32.xlu0 %v3240_v54  ;;  %v3237_v57 = vsel %vm49_vm0, %v3235_v53, 0.0 }
0x1369   :  { %3238 = vadd.xlane.f32.xlu1 %v3237_v57 }
0x13f5   :  { %v3242_v58 = vpop.xlane.xlu0 %3241 }
0x13f6   :  { %v3244_v60 = vmul.f32 0.03125, %v3242_v58  ;;  %v3239_v17 = vpop.xlane.xlu1 %3238 }
0x13f7   :  { %v3243_v63 = vmul.f32 0.03125, %v3239_v17 }
0x13f8   :  { %v3246_v16 = vsub.f32 %v3236_v52, %v3244_v60 }
0x13f9   :  { %v3245_v25 = vsub.f32 %v3235_v53, %v3243_v63 }
0x13fa   :  { %v3248_v12 = vmul.f32 %v3246_v16, %v3246_v16 }
0x13fb   :  { %v3247_v2 = vmul.f32 %v3245_v25, %v3245_v25 }
0x13fc   :  { %v3252_v56 = vsel %vm49_vm0, %v3248_v12, 0.0 }
0x13fd   :  { %3253 = vadd.xlane.f32.xlu1 %v3252_v56  ;;  %v3249_v55 = vsel %vm49_vm0, %v3247_v2, 0.0 }
0x13fe   :  { %3250 = vadd.xlane.f32.xlu0 %v3249_v55 }
0x148a   :  { %v3254_v1 = vpop.xlane.xlu1 %3253 }
0x148b   :  { %v3256_v7 = vmul.f32 0.03125, %v3254_v1  ;;  %v3251_v5 = vpop.xlane.xlu0 %3250 }
0x148c   :  { %v3255_v42 = vmul.f32 0.03125, %v3251_v5 }
0x148d   :  { %v3258_v26 = vadd.f32 1e-05, %v3256_v7 }
0x148e   :  { %v3257_v27 = vadd.f32 1e-05, %v3255_v42 }
0x148f   :  { %4073 = vrsqrt.f32 %v3258_v26 }
0x1490   :  { %4075 = vrsqrt.f32 %v3257_v27 }
0x1499   :  { %v4074_v31 = vpop.eup %4073 }
0x149a   :  { %v4076_v32 = vpop.eup %4075  ;;  %v3262_v33 = vmul.f32 %v4074_v31, %v3246_v16 }
0x149b   :  { %v3261_v34 = vmul.f32 %v4076_v32, %v3245_v25 }
0x149c   :  { %v3268_v35 = vmul.f32 %v3266_v18, %v3262_v33 }
0x149d   :  { %v3267_v36 = vmul.f32 %v3266_v18, %v3261_v34 }
0x149e   :  { %v3274_v38 = vadd.f32 %v3272_v8, %v3268_v35 }
0x149f   :  { %v3273_v37 = vadd.f32 %v3272_v8, %v3267_v36 }
0x14a1   :  { %3903 = vmatprep.mubr.msk.f32.mxu1 %vm49_vm0, %v3273_v37 }
0x14a2   :  { %3904 = vmatmul.mubr.msk.f32.vlgmr.msra.gmra.mrb[40].mxu1 %vm49_vm0, %v3274_v38 }
0x1575   :  { %v3905_v61 = vpop.f32.mrb[40].mxu1 }
0x1576   :  { %v3361_v14 = vadd.f32 %v3905_v61, %v3282_v11  ;;  %v3355_v30 = vpop.f32.mrb[41].mxu1 }
0x1577   :  { %v3356_v45 = vadd.f32 %v3355_v30, %v3282_v11 }
0x1578   :  { %v3365_v49 = vmax.f32 %v3361_v14, 0.0 }
0x1579   :  { %v3364_v47 = vmax.f32 %v3356_v45, 0.0 }
0x157b   :  { %3922 = vmatprep.mubr.msk.f32.mxu0 %vm3374_vm6, %v3364_v47 }
0x157c   :  { %3923 = vmatmul.mubr.msk.f32.vlgmr.msra.gmra.mrb[34].mxu0 %vm3374_vm6, %v3365_v49 }
0x164f   :  { %v3924_v51 = vpop.f32.mrb[34].mxu0 }
0x1650   :  { %v3457_v52 = vadd.f32 %v3924_v51, %v3274_v38  ;;  %v3447_v53 = vpop.f32.mrb[35].mxu0 }
0x1651   :  { %v3456_v54 = vadd.f32 %v3447_v53, %v3273_v37 }
0x1652   :  { %v3463_v57 = vadd.f32 %v3461_v50, %v3457_v52 }
0x1653   :  { %v3462_v58 = vadd.f32 %v3461_v50, %v3456_v54 }
0x1654   :  { %v3467_v48 = vsel %vm49_vm0, %v3463_v57, 0.0 }
0x1655   :  { %3468 = vadd.xlane.f32.xlu1 %v3467_v48  ;;  %v3464_v60 = vsel %vm49_vm0, %v3462_v58, 0.0 }
0x1656   :  { %3465 = vadd.xlane.f32.xlu0 %v3464_v60 }
0x16e2   :  { %v3469_v17 = vpop.xlane.xlu1 %3468 }
0x16e3   :  { %v3471_v63 = vmul.f32 0.03125, %v3469_v17  ;;  %v3466_v16 = vpop.xlane.xlu0 %3465 }
0x16e4   :  { %v3470_v25 = vmul.f32 0.03125, %v3466_v16 }
0x16e5   :  { %v3473_v12 = vsub.f32 %v3463_v57, %v3471_v63 }
0x16e6   :  { %v3472_v2 = vsub.f32 %v3462_v58, %v3470_v25 }
0x16e7   :  { %v3475_v56 = vmul.f32 %v3473_v12, %v3473_v12 }
0x16e8   :  { %v3474_v41 = vmul.f32 %v3472_v2, %v3472_v2 }
0x16e9   :  { %v3479_v55 = vsel %vm49_vm0, %v3475_v56, 0.0 }
0x16ea   :  { %3480 = vadd.xlane.f32.xlu1 %v3479_v55  ;;  %v3476_v3 = vsel %vm49_vm0, %v3474_v41, 0.0 }
0x16eb   :  { %3477 = vadd.xlane.f32.xlu0 %v3476_v3 }
0x1777   :  { %v3481_v43 = vpop.xlane.xlu1 %3480 }
0x1778   :  { %v3483_v4 = vmul.f32 0.03125, %v3481_v43  ;;  %v3478_v59 = vpop.xlane.xlu0 %3477 }
0x1779   :  { %v3482_v6 = vmul.f32 0.03125, %v3478_v59 }
0x177a   :  { %v3485_v9 = vadd.f32 1e-05, %v3483_v4 }
0x177b   :  { %v3484_v62 = vadd.f32 1e-05, %v3482_v6 }
0x177c   :  { %4077 = vrsqrt.f32 %v3485_v9 }
0x177d   :  { %4079 = vrsqrt.f32 %v3484_v62 }
0x1786   :  { %v4078_v15 = vpop.eup %4077 }
0x1787   :  { %v4080_v19 = vpop.eup %4079  ;;  %v3489_v21 = vmul.f32 %v4078_v15, %v3473_v12 }
0x1788   :  { %v3488_v23 = vmul.f32 %v4080_v19, %v3472_v2 }
0x1789   :  { %v3495_v24 = vmul.f32 %v3493_v13, %v3489_v21 }
0x178a   :  { %v3494_v0 = vmul.f32 %v3493_v13, %v3488_v23 }
0x178b   :  { %v3501_v1 = vadd.f32 %v3499_v20, %v3495_v24 }
0x178c   :  { %v3500_v7 = vadd.f32 %v3499_v20, %v3494_v0 }
0x178d   :  { %3503 = vst.msk [vmem:[%s4738_s10 + $0x8] sm:$0xff] %vm49_vm0, %v3501_v1 }
0x178e   :  { %3502 = vst.msk [vmem:[%s4738_s10] sm:$0xff] %vm49_vm0, %v3500_v7 }

</bundles_post_ra>
